<compile_context>
chip_gen: v6e
topology: v6e:2x2x1
jax: 0.10.0
libtpu: 0.0.40
codegen_flags: <defaults>
</compile_context>

<pallas_src>
import math

import jax
import jax.numpy as jnp
import numpy as np
from jax.experimental import pallas as pl
from jax.experimental.pallas import tpu as pltpu

# ---- scaled-down DenseNetEncoder hyperparameters (small shapes) ----
GROWTH_RATE = 8
BLOCK_CONFIG = (2, 2)
IN_CHANNELS = 4
NUM_INIT_FEATURES = 16
BN_SIZE = 2
DROP_RATE = 0.2      # F.dropout(training=False) at inference -> identity
CONV_BIAS = True
BATCH_NORM = False   # module default

_HIGHEST = jax.lax.Precision.HIGHEST
_NEG_F32 = float(np.finfo(np.float32).min)   # MaxPool1d implicit -inf padding


def _elu(x):
    # PyTorch nn.ELU(alpha=1.0); min() guards exp overflow on the dead branch.
    return jnp.where(x > 0, x, jnp.exp(jnp.minimum(x, 0.0)) - 1.0)


def _stage_plan():
    """Static per-conv metadata: name, cout, cin, kernel, column offset in the
    packed weight/bias slabs. Shared by the wrapper (packing) and the kernel
    (slicing)."""
    stages = []
    off = 0

    def add(name, cout, cin, k):
        nonlocal off
        stages.append(dict(name=name, cout=cout, cin=cin, k=k, off=off))
        off += cout

    add("conv0", NUM_INIT_FEATURES, IN_CHANNELS, 7)
    nf = NUM_INIT_FEATURES
    for i, num_layers in enumerate(BLOCK_CONFIG):
        for j in range(num_layers):
            cin = nf + j * GROWTH_RATE
            add(f"b{i}_l{j}_conv1", BN_SIZE * GROWTH_RATE, cin, 1)
            add(f"b{i}_l{j}_conv2", GROWTH_RATE, BN_SIZE * GROWTH_RATE, 3)
        nf += num_layers * GROWTH_RATE
        if i != len(BLOCK_CONFIG) - 1:
            add(f"trans{i}", nf // 2, nf, 1)
            nf //= 2
    return stages


# ---------------------- fused Pallas kernel ----------------------
def _fused_kernel(*refs):
    x_ref, w_ref, b_ref, out_ref = refs[:4]
    scratch = refs[4:]
    pad0_s, padm_s, pad3_s = scratch[:3]
    nb = len(BLOCK_CONFIG)
    blk_refs = scratch[3:3 + nb]            # dense-block feature accumulators
    tr_refs = scratch[3 + nb:]              # transition-conv outputs

    plan = iter(_stage_plan())
    L = x_ref.shape[1]                      # input length (spatial on sublanes)

    def wb(st):
        # weight slice (K*Cin, Cout) and bias slice (1, Cout) from the slabs
        r = st["k"] * st["cin"]
        c0, cout = st["off"], st["cout"]
        return w_ref[0:r, c0:c0 + cout], b_ref[:, c0:c0 + cout]

    def mm(a, w):
        # The only MXU work in the kernel: useful weight contractions.
        return jnp.dot(a, w, precision=_HIGHEST,
                       preferred_element_type=jnp.float32)

    # ---- conv0: kernel=7, stride=2, pad=3 -> single im2col matmul ----
    st = next(plan)
    l0 = (L + 2 * 3 - 7) // 2 + 1
    pad0_s[...] = jnp.zeros(pad0_s.shape, jnp.float32)
    pad0_s[3:3 + L, :] = x_ref[0]                       # (L, Cin)
    cols = jnp.concatenate(
        [pad0_s[pl.ds(k, l0, stride=2), :] for k in range(7)], axis=1)
    w, b = wb(st)
    h = _elu(mm(cols, w) + b)                           # (l0, 16)

    # ---- MaxPool1d(kernel=3, stride=2, padding=1): strided slices + VPU max
    l1 = (l0 + 2 - 3) // 2 + 1
    padm_s[...] = jnp.full(padm_s.shape, _NEG_F32, jnp.float32)
    padm_s[1:1 + l0, :] = h
    h = jnp.maximum(
        jnp.maximum(padm_s[pl.ds(0, l1, stride=2), :],
                    padm_s[pl.ds(1, l1, stride=2), :]),
        padm_s[pl.ds(2, l1, stride=2), :])              # (l1, 16)

    def conv1x1(a, st):
        w, b = wb(st)
        return mm(a, w) + b

    def conv3x1_p1(a, st, lcur):
        # a: (lcur, 16) post-ELU; zero padding is applied AFTER the activation
        # (matches Conv1d zero padding of the activated features).
        pad3_s[0:lcur + 2, :] = jnp.zeros((lcur + 2, pad3_s.shape[1]),
                                          jnp.float32)
        pad3_s[1:1 + lcur, :] = a
        cols = jnp.concatenate(
            [pad3_s[k:k + lcur, :] for k in range(3)], axis=1)   # (lcur, 48)
        w, b = wb(st)
        return mm(cols, w) + b

    # ---- dense blocks ----
    lcur = l1
    nf = NUM_INIT_FEATURES
    for i, num_layers in enumerate(BLOCK_CONFIG):
        blk = blk_refs[i]
        blk[:, 0:nf] = h                                # block input features
        for j in range(num_layers):
            cin = nf + j * GROWTH_RATE
            y = conv1x1(_elu(blk[:, 0:cin]), next(plan))
            y = conv3x1_p1(_elu(y), next(plan), lcur)
            # dense connectivity: in-place "concat" into the VMEM accumulator
            blk[:, cin:cin + GROWTH_RATE] = y
        nf += num_layers * GROWTH_RATE
        if i != nb - 1:
            tr = tr_refs[i]
            tr[...] = conv1x1(_elu(blk[...]), next(plan))
            lcur //= 2
            nf //= 2
            # AvgPool1d(2, 2): mean of the two stride-2 phases (VPU only)
            h = 0.5 * (tr[pl.ds(0, lcur, stride=2), :]
                       + tr[pl.ds(1, lcur, stride=2), :])

    # ---- final ReLU + AvgPool1d(kernel=7, stride=3) ----
    blk = blk_refs[-1]
    blk[...] = jnp.maximum(blk[...], 0.0)
    lf = (lcur - 7) // 3 + 1
    acc = blk[pl.ds(0, lf, stride=3), :]
    for k in range(1, 7):
        acc = acc + blk[pl.ds(k, lf, stride=3), :]
    out_ref[0] = acc * (1.0 / 7.0)                      # (lf, nf)


# ---------------------- wrapper ----------------------
def _pack_params(params):
    """Pack all conv weights into one (max_K*Cin, sum_Cout) slab in im2col
    layout and all biases into one (1, sum_Cout) slab."""
    plan = _stage_plan()
    rows = max(st["k"] * st["cin"] for st in plan)
    w_pieces, b_pieces = [], []
    for st in plan:
        w, b = params[st["name"]]                        # (Cout, Cin, K), (Cout,)
        w2 = jnp.transpose(w, (2, 1, 0)).reshape(st["k"] * st["cin"],
                                                 st["cout"])
        w2 = jnp.pad(w2, ((0, rows - w2.shape[0]), (0, 0)))
        w_pieces.append(w2)
        b_pieces.append(b)
    w_slab = jnp.concatenate(w_pieces, axis=1)           # (rows, sum_Cout)
    b_slab = jnp.concatenate(b_pieces)[None, :]          # (1,    sum_Cout)
    return w_slab, b_slab


def densenet_forward(params, x):
    B, _, L = x.shape
    xt = jnp.transpose(x, (0, 2, 1))                     # (B, L, Cin)
    w_slab, b_slab = _pack_params(params)

    # static per-stage shape plan
    l0 = (L + 2 * 3 - 7) // 2 + 1
    l1 = (l0 + 2 - 3) // 2 + 1
    scratch = [
        pltpu.VMEM((L + 6, IN_CHANNELS), jnp.float32),           # conv0 pad
        pltpu.VMEM((l0 + 2, NUM_INIT_FEATURES), jnp.float32),    # maxpool pad
        pltpu.VMEM((l1 + 2, BN_SIZE * GROWTH_RATE), jnp.float32),  # k3 pad
    ]
    nf = NUM_INIT_FEATURES
    lcur = l1
    blk_shapes, tr_shapes = [], []
    for i, n_layers in enumerate(BLOCK_CONFIG):
        nf += n_layers * GROWTH_RATE
        blk_shapes.append((lcur, nf))
        if i != len(BLOCK_CONFIG) - 1:
            nf //= 2
            tr_shapes.append((lcur, nf))
            lcur //= 2
    lf = (lcur - 7) // 3 + 1
    scratch += [pltpu.VMEM(s, jnp.float32) for s in blk_shapes]
    scratch += [pltpu.VMEM(s, jnp.float32) for s in tr_shapes]

    feats = pl.pallas_call(
        _fused_kernel,
        out_shape=jax.ShapeDtypeStruct((B, lf, nf), jnp.float32),
        grid=(B,),
        in_specs=[
            pl.BlockSpec((1, L, IN_CHANNELS), lambda b: (b, 0, 0)),
            pl.BlockSpec(w_slab.shape, lambda b: (0, 0)),
            pl.BlockSpec(b_slab.shape, lambda b: (0, 0)),
        ],
        out_specs=pl.BlockSpec((1, lf, nf), lambda b: (b, 0, 0)),
        scratch_shapes=scratch,
        compiler_params=pltpu.CompilerParams(
            dimension_semantics=("parallel",)),
    )(xt, w_slab, b_slab)
    # kernel emits (B, L_final, C); PyTorch flattens (B, C, L_final)
    return jnp.transpose(feats, (0, 2, 1)).reshape(B, -1)


# ---------------------- parameters ----------------------
def init_params(key):
    params = {}

    def conv(k, cout, cin, ksz):
        kw, kb = jax.random.split(k)
        fan_in = cin * ksz
        w = math.sqrt(2.0 / fan_in) * jax.random.normal(
            kw, (cout, cin, ksz), jnp.float32)          # kaiming_normal_
        bound = 1.0 / math.sqrt(fan_in)
        b = jax.random.uniform(kb, (cout,), jnp.float32, -bound, bound)
        return w, b

    keys = iter(jax.random.split(key, 64))
    for st in _stage_plan():
        params[st["name"]] = conv(next(keys), st["cout"], st["cin"], st["k"])
    nf = NUM_INIT_FEATURES
    for i, num_layers in enumerate(BLOCK_CONFIG):
        nf += num_layers * GROWTH_RATE
        if i != len(BLOCK_CONFIG) - 1:
            nf //= 2
    return params, nf


# ---------------------- pure-JAX reference ----------------------
def _conv1d_ref(x, w, b, stride, padding):
    out = jax.lax.conv_general_dilated(
        x, w, window_strides=(stride,), padding=[(padding, padding)],
        dimension_numbers=("NCH", "OIH", "NCH"), precision=_HIGHEST)
    return out + b[None, :, None]


def densenet_forward_ref(params, x):
    w0, b0 = params["conv0"]
    h = _conv1d_ref(x, w0, b0, 2, 3)
    h = jax.nn.elu(h)
    h = jax.lax.reduce_window(h, -jnp.inf, jax.lax.max,
                              (1, 1, 3), (1, 1, 2),
                              ((0, 0), (0, 0), (1, 1)))
    for i, num_layers in enumerate(BLOCK_CONFIG):
        for j in range(num_layers):
            w1, b1 = params[f"b{i}_l{j}_conv1"]
            w2, b2 = params[f"b{i}_l{j}_conv2"]
            y = _conv1d_ref(jax.nn.elu(h), w1, b1, 1, 0)
            y = _conv1d_ref(jax.nn.elu(y), w2, b2, 1, 1)
            h = jnp.concatenate([h, y], axis=1)
        if i != len(BLOCK_CONFIG) - 1:
            wt, bt = params[f"trans{i}"]
            h = _conv1d_ref(jax.nn.elu(h), wt, bt, 1, 0)
            h = jax.lax.reduce_window(h, 0.0, jax.lax.add,
                                      (1, 1, 2), (1, 1, 2), "VALID") / 2.0
    h = jnp.maximum(h, 0.0)
    h = jax.lax.reduce_window(h, 0.0, jax.lax.add,
                              (1, 1, 7), (1, 1, 3), "VALID") / 7.0
    return h.reshape(h.shape[0], -1)


if __name__ == "__main__":
    key = jax.random.PRNGKey(0)
    kp, kx = jax.random.split(key)
    params, num_features = init_params(kp)

    B, L = 2, 128
    x = jax.random.normal(kx, (B, IN_CHANNELS, L), dtype=jnp.float32)

    out = jax.jit(densenet_forward)(params, x)
    out = jax.block_until_ready(out)

    ref = jax.jit(densenet_forward_ref)(params, x)
    ref = jax.block_until_ready(ref)

    assert out.shape == ref.shape, (out.shape, ref.shape)
    np.testing.assert_allclose(np.asarray(out), np.asarray(ref),
                               rtol=2e-3, atol=2e-3)
    print("KERNEL_OK")
</pallas_src>

<mosaic_0001>
module attributes {stable_mosaic.version = 11 : i64} {
  func.func @_fused_kernel(%arg0: i32, %arg1: memref<1x128x4xf32, #tpu.memory_space<vmem>>, %arg2: memref<48x128xf32, #tpu.memory_space<vmem>>, %arg3: memref<1x128xf32, #tpu.memory_space<vmem>>, %arg4: memref<1x4x32xf32, #tpu.memory_space<vmem>>, %arg5: memref<134x4xf32, #tpu.memory_space<vmem>>, %arg6: memref<66x16xf32, #tpu.memory_space<vmem>>, %arg7: memref<34x16xf32, #tpu.memory_space<vmem>>, %arg8: memref<32x32xf32, #tpu.memory_space<vmem>>, %arg9: memref<16x32xf32, #tpu.memory_space<vmem>>, %arg10: memref<32x16xf32, #tpu.memory_space<vmem>>) attributes {dimension_semantics = [#tpu.dimension_semantics<parallel>], iteration_bounds = array<i64: 2>, scalar_prefetch = 0 : i64, scratch_operands = 6 : i64, tpu.core_type = #tpu.core_type<tc>, window_params = [{transform_indices = @transform_0, window_bounds = array<i64: 1, 128, 4>}, {pipeline_mode = #tpu.pipeline_mode<synchronous>, transform_indices = @transform_1, window_bounds = array<i64: 48, 128>}, {pipeline_mode = #tpu.pipeline_mode<synchronous>, transform_indices = @transform_2, window_bounds = array<i64: 1, 128>}, {transform_indices = @transform_3, window_bounds = array<i64: 1, 4, 32>}]} {
    %cst = arith.constant 0.000000e+00 : f32
    %0 = vector.broadcast %cst : f32 to vector<134x4xf32>
    %c0 = arith.constant 0 : index
    %c0_0 = arith.constant 0 : index
    %1 = vector.load %arg5[%c0, %c0_0] : memref<134x4xf32, #tpu.memory_space<vmem>>, vector<134x4xf32>
    tpu.vector_store %arg5[%c0, %c0_0], %0 {strides = array<i32>} : memref<134x4xf32, #tpu.memory_space<vmem>>, vector<134x4xf32>,
    %c0_1 = arith.constant 0 : index
    %c0_2 = arith.constant 0 : index
    %c0_3 = arith.constant 0 : index
    %2 = vector.load %arg1[%c0_1, %c0_2, %c0_3] : memref<1x128x4xf32, #tpu.memory_space<vmem>>, vector<1x128x4xf32>
    %3 = vector.shape_cast %2 : vector<1x128x4xf32> to vector<128x4xf32>
    %c3 = arith.constant 3 : index
    %c0_4 = arith.constant 0 : index
    %4 = vector.load %arg5[%c3, %c0_4] : memref<134x4xf32, #tpu.memory_space<vmem>>, vector<128x4xf32>
    tpu.vector_store %arg5[%c3, %c0_4], %3 {strides = array<i32>} : memref<134x4xf32, #tpu.memory_space<vmem>>, vector<128x4xf32>,
    %c0_5 = arith.constant 0 : index
    %c0_6 = arith.constant 0 : index
    %5 = tpu.strided_load %arg5[%c0_5, %c0_6] {strides = array<i32: 2, 1>} : memref<134x4xf32, #tpu.memory_space<vmem>>, vector<64x4xf32>
    %c1 = arith.constant 1 : index
    %c0_7 = arith.constant 0 : index
    %6 = tpu.strided_load %arg5[%c1, %c0_7] {strides = array<i32: 2, 1>} : memref<134x4xf32, #tpu.memory_space<vmem>>, vector<64x4xf32>
    %c2 = arith.constant 2 : index
    %c0_8 = arith.constant 0 : index
    %7 = tpu.strided_load %arg5[%c2, %c0_8] {strides = array<i32: 2, 1>} : memref<134x4xf32, #tpu.memory_space<vmem>>, vector<64x4xf32>
    %c3_9 = arith.constant 3 : index
    %c0_10 = arith.constant 0 : index
    %8 = tpu.strided_load %arg5[%c3_9, %c0_10] {strides = array<i32: 2, 1>} : memref<134x4xf32, #tpu.memory_space<vmem>>, vector<64x4xf32>
    %c4 = arith.constant 4 : index
    %c0_11 = arith.constant 0 : index
    %9 = tpu.strided_load %arg5[%c4, %c0_11] {strides = array<i32: 2, 1>} : memref<134x4xf32, #tpu.memory_space<vmem>>, vector<64x4xf32>
    %c5 = arith.constant 5 : index
    %c0_12 = arith.constant 0 : index
    %10 = tpu.strided_load %arg5[%c5, %c0_12] {strides = array<i32: 2, 1>} : memref<134x4xf32, #tpu.memory_space<vmem>>, vector<64x4xf32>
    %c6 = arith.constant 6 : index
    %c0_13 = arith.constant 0 : index
    %11 = tpu.strided_load %arg5[%c6, %c0_13] {strides = array<i32: 2, 1>} : memref<134x4xf32, #tpu.memory_space<vmem>>, vector<64x4xf32>
    %12 = tpu.concatenate %5, %6, %7, %8, %9, %10, %11 in 1 : vector<64x4xf32>, vector<64x4xf32>, vector<64x4xf32>, vector<64x4xf32>, vector<64x4xf32>, vector<64x4xf32>, vector<64x4xf32> -> vector<64x28xf32>
    %c0_14 = arith.constant 0 : index
    %c0_15 = arith.constant 0 : index
    %13 = vector.load %arg2[%c0_14, %c0_15] : memref<48x128xf32, #tpu.memory_space<vmem>>, vector<28x16xf32>
    %c0_16 = arith.constant 0 : index
    %c0_17 = arith.constant 0 : index
    %14 = vector.load %arg3[%c0_16, %c0_17] : memref<1x128xf32, #tpu.memory_space<vmem>>, vector<1x16xf32>
    %cst_18 = arith.constant dense<0.000000e+00> : vector<64x16xf32>
    %15 = tpu.matmul %12, %13, %cst_18 {dimension_numbers = #tpu.dot_dimension_numbers<[1], [0], [0], [1], [0, 0, 1, 1], [], []>, precision = #tpu.contract_precision<fp32>} : vector<64x28xf32>, vector<28x16xf32>, vector<64x16xf32> -> vector<64x16xf32>
    %16 = vector.broadcast %14 : vector<1x16xf32> to vector<64x16xf32>
    %17 = arith.addf %15, %16 : vector<64x16xf32>
    %cst_19 = arith.constant 0.000000e+00 : f32
    %18 = vector.broadcast %cst_19 : f32 to vector<64x16xf32>
    %19 = arith.cmpf ogt, %17, %18 : vector<64x16xf32>
    %cst_20 = arith.constant 0.000000e+00 : f32
    %20 = vector.broadcast %cst_20 : f32 to vector<64x16xf32>
    %21 = arith.minimumf %17, %20 : vector<64x16xf32>
    %22 = math.exp %21 : vector<64x16xf32>
    %cst_21 = arith.constant 1.000000e+00 : f32
    %23 = vector.broadcast %cst_21 : f32 to vector<64x16xf32>
    %24 = arith.subf %22, %23 : vector<64x16xf32>
    %25 = arith.select %19, %17, %24 : vector<64x16xi1>, vector<64x16xf32>
    %cst_22 = arith.constant -3.40282347E+38 : f32
    %26 = vector.broadcast %cst_22 : f32 to vector<66x16xf32>
    %c0_23 = arith.constant 0 : index
    %c0_24 = arith.constant 0 : index
    %27 = vector.load %arg6[%c0_23, %c0_24] : memref<66x16xf32, #tpu.memory_space<vmem>>, vector<66x16xf32>
    tpu.vector_store %arg6[%c0_23, %c0_24], %26 {strides = array<i32>} : memref<66x16xf32, #tpu.memory_space<vmem>>, vector<66x16xf32>,
    %c1_25 = arith.constant 1 : index
    %c0_26 = arith.constant 0 : index
    %28 = vector.load %arg6[%c1_25, %c0_26] : memref<66x16xf32, #tpu.memory_space<vmem>>, vector<64x16xf32>
    tpu.vector_store %arg6[%c1_25, %c0_26], %25 {strides = array<i32>} : memref<66x16xf32, #tpu.memory_space<vmem>>, vector<64x16xf32>,
    %c0_27 = arith.constant 0 : index
    %c0_28 = arith.constant 0 : index
    %29 = tpu.strided_load %arg6[%c0_27, %c0_28] {strides = array<i32: 2, 1>} : memref<66x16xf32, #tpu.memory_space<vmem>>, vector<32x16xf32>
    %c1_29 = arith.constant 1 : index
    %c0_30 = arith.constant 0 : index
    %30 = tpu.strided_load %arg6[%c1_29, %c0_30] {strides = array<i32: 2, 1>} : memref<66x16xf32, #tpu.memory_space<vmem>>, vector<32x16xf32>
    %31 = arith.maximumf %29, %30 : vector<32x16xf32>
    %c2_31 = arith.constant 2 : index
    %c0_32 = arith.constant 0 : index
    %32 = tpu.strided_load %arg6[%c2_31, %c0_32] {strides = array<i32: 2, 1>} : memref<66x16xf32, #tpu.memory_space<vmem>>, vector<32x16xf32>
    %33 = arith.maximumf %31, %32 : vector<32x16xf32>
    %c0_33 = arith.constant 0 : index
    %c0_34 = arith.constant 0 : index
    %34 = vector.load %arg8[%c0_33, %c0_34] : memref<32x32xf32, #tpu.memory_space<vmem>>, vector<32x16xf32>
    tpu.vector_store %arg8[%c0_33, %c0_34], %33 {strides = array<i32>} : memref<32x32xf32, #tpu.memory_space<vmem>>, vector<32x16xf32>,
    %c0_35 = arith.constant 0 : index
    %c0_36 = arith.constant 0 : index
    %35 = vector.load %arg8[%c0_35, %c0_36] : memref<32x32xf32, #tpu.memory_space<vmem>>, vector<32x16xf32>
    %cst_37 = arith.constant 0.000000e+00 : f32
    %36 = vector.broadcast %cst_37 : f32 to vector<32x16xf32>
    %37 = arith.cmpf ogt, %35, %36 : vector<32x16xf32>
    %cst_38 = arith.constant 0.000000e+00 : f32
    %38 = vector.broadcast %cst_38 : f32 to vector<32x16xf32>
    %39 = arith.minimumf %35, %38 : vector<32x16xf32>
    %40 = math.exp %39 : vector<32x16xf32>
    %cst_39 = arith.constant 1.000000e+00 : f32
    %41 = vector.broadcast %cst_39 : f32 to vector<32x16xf32>
    %42 = arith.subf %40, %41 : vector<32x16xf32>
    %43 = arith.select %37, %35, %42 : vector<32x16xi1>, vector<32x16xf32>
    %c0_40 = arith.constant 0 : index
    %c16 = arith.constant 16 : index
    %44 = vector.load %arg2[%c0_40, %c16] : memref<48x128xf32, #tpu.memory_space<vmem>>, vector<16x16xf32>
    %c0_41 = arith.constant 0 : index
    %c16_42 = arith.constant 16 : index
    %45 = vector.load %arg3[%c0_41, %c16_42] : memref<1x128xf32, #tpu.memory_space<vmem>>, vector<1x16xf32>
    %cst_43 = arith.constant dense<0.000000e+00> : vector<32x16xf32>
    %46 = tpu.matmul %43, %44, %cst_43 {dimension_numbers = #tpu.dot_dimension_numbers<[1], [0], [0], [1], [0, 0, 1, 1], [], []>, precision = #tpu.contract_precision<fp32>} : vector<32x16xf32>, vector<16x16xf32>, vector<32x16xf32> -> vector<32x16xf32>
    %47 = vector.broadcast %45 : vector<1x16xf32> to vector<32x16xf32>
    %48 = arith.addf %46, %47 : vector<32x16xf32>
    %cst_44 = arith.constant 0.000000e+00 : f32
    %49 = vector.broadcast %cst_44 : f32 to vector<32x16xf32>
    %50 = arith.cmpf ogt, %48, %49 : vector<32x16xf32>
    %cst_45 = arith.constant 0.000000e+00 : f32
    %51 = vector.broadcast %cst_45 : f32 to vector<32x16xf32>
    %52 = arith.minimumf %48, %51 : vector<32x16xf32>
    %53 = math.exp %52 : vector<32x16xf32>
    %cst_46 = arith.constant 1.000000e+00 : f32
    %54 = vector.broadcast %cst_46 : f32 to vector<32x16xf32>
    %55 = arith.subf %53, %54 : vector<32x16xf32>
    %56 = arith.select %50, %48, %55 : vector<32x16xi1>, vector<32x16xf32>
    %cst_47 = arith.constant 0.000000e+00 : f32
    %57 = vector.broadcast %cst_47 : f32 to vector<34x16xf32>
    %c0_48 = arith.constant 0 : index
    %c0_49 = arith.constant 0 : index
    %58 = vector.load %arg7[%c0_48, %c0_49] : memref<34x16xf32, #tpu.memory_space<vmem>>, vector<34x16xf32>
    tpu.vector_store %arg7[%c0_48, %c0_49], %57 {strides = array<i32>} : memref<34x16xf32, #tpu.memory_space<vmem>>, vector<34x16xf32>,
    %c1_50 = arith.constant 1 : index
    %c0_51 = arith.constant 0 : index
    %59 = vector.load %arg7[%c1_50, %c0_51] : memref<34x16xf32, #tpu.memory_space<vmem>>, vector<32x16xf32>
    tpu.vector_store %arg7[%c1_50, %c0_51], %56 {strides = array<i32>} : memref<34x16xf32, #tpu.memory_space<vmem>>, vector<32x16xf32>,
    %c0_52 = arith.constant 0 : index
    %c0_53 = arith.constant 0 : index
    %60 = vector.load %arg7[%c0_52, %c0_53] : memref<34x16xf32, #tpu.memory_space<vmem>>, vector<32x16xf32>
    %c1_54 = arith.constant 1 : index
    %c0_55 = arith.constant 0 : index
    %61 = vector.load %arg7[%c1_54, %c0_55] : memref<34x16xf32, #tpu.memory_space<vmem>>, vector<32x16xf32>
    %c2_56 = arith.constant 2 : index
    %c0_57 = arith.constant 0 : index
    %62 = vector.load %arg7[%c2_56, %c0_57] : memref<34x16xf32, #tpu.memory_space<vmem>>, vector<32x16xf32>
    %63 = tpu.concatenate %60, %61, %62 in 1 : vector<32x16xf32>, vector<32x16xf32>, vector<32x16xf32> -> vector<32x48xf32>
    %c0_58 = arith.constant 0 : index
    %c32 = arith.constant 32 : index
    %64 = vector.load %arg2[%c0_58, %c32] : memref<48x128xf32, #tpu.memory_space<vmem>>, vector<48x8xf32>
    %c0_59 = arith.constant 0 : index
    %c32_60 = arith.constant 32 : index
    %65 = vector.load %arg3[%c0_59, %c32_60] : memref<1x128xf32, #tpu.memory_space<vmem>>, vector<1x8xf32>
    %cst_61 = arith.constant dense<0.000000e+00> : vector<32x8xf32>
    %66 = tpu.matmul %63, %64, %cst_61 {dimension_numbers = #tpu.dot_dimension_numbers<[1], [0], [0], [1], [0, 0, 1, 1], [], []>, precision = #tpu.contract_precision<fp32>} : vector<32x48xf32>, vector<48x8xf32>, vector<32x8xf32> -> vector<32x8xf32>
    %67 = vector.broadcast %65 : vector<1x8xf32> to vector<32x8xf32>
    %68 = arith.addf %66, %67 : vector<32x8xf32>
    %c0_62 = arith.constant 0 : index
    %c16_63 = arith.constant 16 : index
    %69 = vector.load %arg8[%c0_62, %c16_63] : memref<32x32xf32, #tpu.memory_space<vmem>>, vector<32x8xf32>
    tpu.vector_store %arg8[%c0_62, %c16_63], %68 {strides = array<i32>} : memref<32x32xf32, #tpu.memory_space<vmem>>, vector<32x8xf32>,
    %c0_64 = arith.constant 0 : index
    %c0_65 = arith.constant 0 : index
    %70 = vector.load %arg8[%c0_64, %c0_65] : memref<32x32xf32, #tpu.memory_space<vmem>>, vector<32x24xf32>
    %cst_66 = arith.constant 0.000000e+00 : f32
    %71 = vector.broadcast %cst_66 : f32 to vector<32x24xf32>
    %72 = arith.cmpf ogt, %70, %71 : vector<32x24xf32>
    %cst_67 = arith.constant 0.000000e+00 : f32
    %73 = vector.broadcast %cst_67 : f32 to vector<32x24xf32>
    %74 = arith.minimumf %70, %73 : vector<32x24xf32>
    %75 = math.exp %74 : vector<32x24xf32>
    %cst_68 = arith.constant 1.000000e+00 : f32
    %76 = vector.broadcast %cst_68 : f32 to vector<32x24xf32>
    %77 = arith.subf %75, %76 : vector<32x24xf32>
    %78 = arith.select %72, %70, %77 : vector<32x24xi1>, vector<32x24xf32>
    %c0_69 = arith.constant 0 : index
    %c40 = arith.constant 40 : index
    %79 = vector.load %arg2[%c0_69, %c40] : memref<48x128xf32, #tpu.memory_space<vmem>>, vector<24x16xf32>
    %c0_70 = arith.constant 0 : index
    %c40_71 = arith.constant 40 : index
    %80 = vector.load %arg3[%c0_70, %c40_71] : memref<1x128xf32, #tpu.memory_space<vmem>>, vector<1x16xf32>
    %cst_72 = arith.constant dense<0.000000e+00> : vector<32x16xf32>
    %81 = tpu.matmul %78, %79, %cst_72 {dimension_numbers = #tpu.dot_dimension_numbers<[1], [0], [0], [1], [0, 0, 1, 1], [], []>, precision = #tpu.contract_precision<fp32>} : vector<32x24xf32>, vector<24x16xf32>, vector<32x16xf32> -> vector<32x16xf32>
    %82 = vector.broadcast %80 : vector<1x16xf32> to vector<32x16xf32>
    %83 = arith.addf %81, %82 : vector<32x16xf32>
    %cst_73 = arith.constant 0.000000e+00 : f32
    %84 = vector.broadcast %cst_73 : f32 to vector<32x16xf32>
    %85 = arith.cmpf ogt, %83, %84 : vector<32x16xf32>
    %cst_74 = arith.constant 0.000000e+00 : f32
    %86 = vector.broadcast %cst_74 : f32 to vector<32x16xf32>
    %87 = arith.minimumf %83, %86 : vector<32x16xf32>
    %88 = math.exp %87 : vector<32x16xf32>
    %cst_75 = arith.constant 1.000000e+00 : f32
    %89 = vector.broadcast %cst_75 : f32 to vector<32x16xf32>
    %90 = arith.subf %88, %89 : vector<32x16xf32>
    %91 = arith.select %85, %83, %90 : vector<32x16xi1>, vector<32x16xf32>
    %cst_76 = arith.constant 0.000000e+00 : f32
    %92 = vector.broadcast %cst_76 : f32 to vector<34x16xf32>
    %c0_77 = arith.constant 0 : index
    %c0_78 = arith.constant 0 : index
    %93 = vector.load %arg7[%c0_77, %c0_78] : memref<34x16xf32, #tpu.memory_space<vmem>>, vector<34x16xf32>
    tpu.vector_store %arg7[%c0_77, %c0_78], %92 {strides = array<i32>} : memref<34x16xf32, #tpu.memory_space<vmem>>, vector<34x16xf32>,
    %c1_79 = arith.constant 1 : index
    %c0_80 = arith.constant 0 : index
    %94 = vector.load %arg7[%c1_79, %c0_80] : memref<34x16xf32, #tpu.memory_space<vmem>>, vector<32x16xf32>
    tpu.vector_store %arg7[%c1_79, %c0_80], %91 {strides = array<i32>} : memref<34x16xf32, #tpu.memory_space<vmem>>, vector<32x16xf32>,
    %c0_81 = arith.constant 0 : index
    %c0_82 = arith.constant 0 : index
    %95 = vector.load %arg7[%c0_81, %c0_82] : memref<34x16xf32, #tpu.memory_space<vmem>>, vector<32x16xf32>
    %c1_83 = arith.constant 1 : index
    %c0_84 = arith.constant 0 : index
    %96 = vector.load %arg7[%c1_83, %c0_84] : memref<34x16xf32, #tpu.memory_space<vmem>>, vector<32x16xf32>
    %c2_85 = arith.constant 2 : index
    %c0_86 = arith.constant 0 : index
    %97 = vector.load %arg7[%c2_85, %c0_86] : memref<34x16xf32, #tpu.memory_space<vmem>>, vector<32x16xf32>
    %98 = tpu.concatenate %95, %96, %97 in 1 : vector<32x16xf32>, vector<32x16xf32>, vector<32x16xf32> -> vector<32x48xf32>
    %c0_87 = arith.constant 0 : index
    %c56 = arith.constant 56 : index
    %99 = vector.load %arg2[%c0_87, %c56] : memref<48x128xf32, #tpu.memory_space<vmem>>, vector<48x8xf32>
    %c0_88 = arith.constant 0 : index
    %c56_89 = arith.constant 56 : index
    %100 = vector.load %arg3[%c0_88, %c56_89] : memref<1x128xf32, #tpu.memory_space<vmem>>, vector<1x8xf32>
    %cst_90 = arith.constant dense<0.000000e+00> : vector<32x8xf32>
    %101 = tpu.matmul %98, %99, %cst_90 {dimension_numbers = #tpu.dot_dimension_numbers<[1], [0], [0], [1], [0, 0, 1, 1], [], []>, precision = #tpu.contract_precision<fp32>} : vector<32x48xf32>, vector<48x8xf32>, vector<32x8xf32> -> vector<32x8xf32>
    %102 = vector.broadcast %100 : vector<1x8xf32> to vector<32x8xf32>
    %103 = arith.addf %101, %102 : vector<32x8xf32>
    %c0_91 = arith.constant 0 : index
    %c24 = arith.constant 24 : index
    %104 = vector.load %arg8[%c0_91, %c24] : memref<32x32xf32, #tpu.memory_space<vmem>>, vector<32x8xf32>
    tpu.vector_store %arg8[%c0_91, %c24], %103 {strides = array<i32>} : memref<32x32xf32, #tpu.memory_space<vmem>>, vector<32x8xf32>,
    %c0_92 = arith.constant 0 : index
    %c0_93 = arith.constant 0 : index
    %105 = vector.load %arg8[%c0_92, %c0_93] : memref<32x32xf32, #tpu.memory_space<vmem>>, vector<32x32xf32>
    %cst_94 = arith.constant 0.000000e+00 : f32
    %106 = vector.broadcast %cst_94 : f32 to vector<32x32xf32>
    %107 = arith.cmpf ogt, %105, %106 : vector<32x32xf32>
    %cst_95 = arith.constant 0.000000e+00 : f32
    %108 = vector.broadcast %cst_95 : f32 to vector<32x32xf32>
    %109 = arith.minimumf %105, %108 : vector<32x32xf32>
    %110 = math.exp %109 : vector<32x32xf32>
    %cst_96 = arith.constant 1.000000e+00 : f32
    %111 = vector.broadcast %cst_96 : f32 to vector<32x32xf32>
    %112 = arith.subf %110, %111 : vector<32x32xf32>
    %113 = arith.select %107, %105, %112 : vector<32x32xi1>, vector<32x32xf32>
    %c0_97 = arith.constant 0 : index
    %c64 = arith.constant 64 : index
    %114 = vector.load %arg2[%c0_97, %c64] : memref<48x128xf32, #tpu.memory_space<vmem>>, vector<32x16xf32>
    %c0_98 = arith.constant 0 : index
    %c64_99 = arith.constant 64 : index
    %115 = vector.load %arg3[%c0_98, %c64_99] : memref<1x128xf32, #tpu.memory_space<vmem>>, vector<1x16xf32>
    %cst_100 = arith.constant dense<0.000000e+00> : vector<32x16xf32>
    %116 = tpu.matmul %113, %114, %cst_100 {dimension_numbers = #tpu.dot_dimension_numbers<[1], [0], [0], [1], [0, 0, 1, 1], [], []>, precision = #tpu.contract_precision<fp32>} : vector<32x32xf32>, vector<32x16xf32>, vector<32x16xf32> -> vector<32x16xf32>
    %117 = vector.broadcast %115 : vector<1x16xf32> to vector<32x16xf32>
    %118 = arith.addf %116, %117 : vector<32x16xf32>
    %c0_101 = arith.constant 0 : index
    %c0_102 = arith.constant 0 : index
    %119 = vector.load %arg10[%c0_101, %c0_102] : memref<32x16xf32, #tpu.memory_space<vmem>>, vector<32x16xf32>
    tpu.vector_store %arg10[%c0_101, %c0_102], %118 {strides = array<i32>} : memref<32x16xf32, #tpu.memory_space<vmem>>, vector<32x16xf32>,
    %c0_103 = arith.constant 0 : index
    %c0_104 = arith.constant 0 : index
    %120 = tpu.strided_load %arg10[%c0_103, %c0_104] {strides = array<i32: 2, 1>} : memref<32x16xf32, #tpu.memory_space<vmem>>, vector<16x16xf32>
    %c1_105 = arith.constant 1 : index
    %c0_106 = arith.constant 0 : index
    %121 = tpu.strided_load %arg10[%c1_105, %c0_106] {strides = array<i32: 2, 1>} : memref<32x16xf32, #tpu.memory_space<vmem>>, vector<16x16xf32>
    %122 = arith.addf %120, %121 : vector<16x16xf32>
    %cst_107 = arith.constant 5.000000e-01 : f32
    %123 = vector.broadcast %cst_107 : f32 to vector<16x16xf32>
    %124 = arith.mulf %123, %122 : vector<16x16xf32>
    %c0_108 = arith.constant 0 : index
    %c0_109 = arith.constant 0 : index
    %125 = vector.load %arg9[%c0_108, %c0_109] : memref<16x32xf32, #tpu.memory_space<vmem>>, vector<16x16xf32>
    tpu.vector_store %arg9[%c0_108, %c0_109], %124 {strides = array<i32>} : memref<16x32xf32, #tpu.memory_space<vmem>>, vector<16x16xf32>,
    %c0_110 = arith.constant 0 : index
    %c0_111 = arith.constant 0 : index
    %126 = vector.load %arg9[%c0_110, %c0_111] : memref<16x32xf32, #tpu.memory_space<vmem>>, vector<16x16xf32>
    %cst_112 = arith.constant 0.000000e+00 : f32
    %127 = vector.broadcast %cst_112 : f32 to vector<16x16xf32>
    %128 = arith.cmpf ogt, %126, %127 : vector<16x16xf32>
    %cst_113 = arith.constant 0.000000e+00 : f32
    %129 = vector.broadcast %cst_113 : f32 to vector<16x16xf32>
    %130 = arith.minimumf %126, %129 : vector<16x16xf32>
    %131 = math.exp %130 : vector<16x16xf32>
    %cst_114 = arith.constant 1.000000e+00 : f32
    %132 = vector.broadcast %cst_114 : f32 to vector<16x16xf32>
    %133 = arith.subf %131, %132 : vector<16x16xf32>
    %134 = arith.select %128, %126, %133 : vector<16x16xi1>, vector<16x16xf32>
    %c0_115 = arith.constant 0 : index
    %c80 = arith.constant 80 : index
    %135 = vector.load %arg2[%c0_115, %c80] : memref<48x128xf32, #tpu.memory_space<vmem>>, vector<16x16xf32>
    %c0_116 = arith.constant 0 : index
    %c80_117 = arith.constant 80 : index
    %136 = vector.load %arg3[%c0_116, %c80_117] : memref<1x128xf32, #tpu.memory_space<vmem>>, vector<1x16xf32>
    %cst_118 = arith.constant dense<0.000000e+00> : vector<16x16xf32>
    %137 = tpu.matmul %134, %135, %cst_118 {dimension_numbers = #tpu.dot_dimension_numbers<[1], [0], [0], [1], [0, 0, 1, 1], [], []>, precision = #tpu.contract_precision<fp32>} : vector<16x16xf32>, vector<16x16xf32>, vector<16x16xf32> -> vector<16x16xf32>
    %138 = vector.broadcast %136 : vector<1x16xf32> to vector<16x16xf32>
    %139 = arith.addf %137, %138 : vector<16x16xf32>
    %cst_119 = arith.constant 0.000000e+00 : f32
    %140 = vector.broadcast %cst_119 : f32 to vector<16x16xf32>
    %141 = arith.cmpf ogt, %139, %140 : vector<16x16xf32>
    %cst_120 = arith.constant 0.000000e+00 : f32
    %142 = vector.broadcast %cst_120 : f32 to vector<16x16xf32>
    %143 = arith.minimumf %139, %142 : vector<16x16xf32>
    %144 = math.exp %143 : vector<16x16xf32>
    %cst_121 = arith.constant 1.000000e+00 : f32
    %145 = vector.broadcast %cst_121 : f32 to vector<16x16xf32>
    %146 = arith.subf %144, %145 : vector<16x16xf32>
    %147 = arith.select %141, %139, %146 : vector<16x16xi1>, vector<16x16xf32>
    %cst_122 = arith.constant 0.000000e+00 : f32
    %148 = vector.broadcast %cst_122 : f32 to vector<18x16xf32>
    %c0_123 = arith.constant 0 : index
    %c0_124 = arith.constant 0 : index
    %149 = vector.load %arg7[%c0_123, %c0_124] : memref<34x16xf32, #tpu.memory_space<vmem>>, vector<18x16xf32>
    tpu.vector_store %arg7[%c0_123, %c0_124], %148 {strides = array<i32>} : memref<34x16xf32, #tpu.memory_space<vmem>>, vector<18x16xf32>,
    %c1_125 = arith.constant 1 : index
    %c0_126 = arith.constant 0 : index
    %150 = vector.load %arg7[%c1_125, %c0_126] : memref<34x16xf32, #tpu.memory_space<vmem>>, vector<16x16xf32>
    tpu.vector_store %arg7[%c1_125, %c0_126], %147 {strides = array<i32>} : memref<34x16xf32, #tpu.memory_space<vmem>>, vector<16x16xf32>,
    %c0_127 = arith.constant 0 : index
    %c0_128 = arith.constant 0 : index
    %151 = vector.load %arg7[%c0_127, %c0_128] : memref<34x16xf32, #tpu.memory_space<vmem>>, vector<16x16xf32>
    %c1_129 = arith.constant 1 : index
    %c0_130 = arith.constant 0 : index
    %152 = vector.load %arg7[%c1_129, %c0_130] : memref<34x16xf32, #tpu.memory_space<vmem>>, vector<16x16xf32>
    %c2_131 = arith.constant 2 : index
    %c0_132 = arith.constant 0 : index
    %153 = vector.load %arg7[%c2_131, %c0_132] : memref<34x16xf32, #tpu.memory_space<vmem>>, vector<16x16xf32>
    %154 = tpu.concatenate %151, %152, %153 in 1 : vector<16x16xf32>, vector<16x16xf32>, vector<16x16xf32> -> vector<16x48xf32>
    %c0_133 = arith.constant 0 : index
    %c96 = arith.constant 96 : index
    %155 = vector.load %arg2[%c0_133, %c96] : memref<48x128xf32, #tpu.memory_space<vmem>>, vector<48x8xf32>
    %c0_134 = arith.constant 0 : index
    %c96_135 = arith.constant 96 : index
    %156 = vector.load %arg3[%c0_134, %c96_135] : memref<1x128xf32, #tpu.memory_space<vmem>>, vector<1x8xf32>
    %cst_136 = arith.constant dense<0.000000e+00> : vector<16x8xf32>
    %157 = tpu.matmul %154, %155, %cst_136 {dimension_numbers = #tpu.dot_dimension_numbers<[1], [0], [0], [1], [0, 0, 1, 1], [], []>, precision = #tpu.contract_precision<fp32>} : vector<16x48xf32>, vector<48x8xf32>, vector<16x8xf32> -> vector<16x8xf32>
    %158 = vector.broadcast %156 : vector<1x8xf32> to vector<16x8xf32>
    %159 = arith.addf %157, %158 : vector<16x8xf32>
    %c0_137 = arith.constant 0 : index
    %c16_138 = arith.constant 16 : index
    %160 = vector.load %arg9[%c0_137, %c16_138] : memref<16x32xf32, #tpu.memory_space<vmem>>, vector<16x8xf32>
    tpu.vector_store %arg9[%c0_137, %c16_138], %159 {strides = array<i32>} : memref<16x32xf32, #tpu.memory_space<vmem>>, vector<16x8xf32>,
    %c0_139 = arith.constant 0 : index
    %c0_140 = arith.constant 0 : index
    %161 = vector.load %arg9[%c0_139, %c0_140] : memref<16x32xf32, #tpu.memory_space<vmem>>, vector<16x24xf32>
    %cst_141 = arith.constant 0.000000e+00 : f32
    %162 = vector.broadcast %cst_141 : f32 to vector<16x24xf32>
    %163 = arith.cmpf ogt, %161, %162 : vector<16x24xf32>
    %cst_142 = arith.constant 0.000000e+00 : f32
    %164 = vector.broadcast %cst_142 : f32 to vector<16x24xf32>
    %165 = arith.minimumf %161, %164 : vector<16x24xf32>
    %166 = math.exp %165 : vector<16x24xf32>
    %cst_143 = arith.constant 1.000000e+00 : f32
    %167 = vector.broadcast %cst_143 : f32 to vector<16x24xf32>
    %168 = arith.subf %166, %167 : vector<16x24xf32>
    %169 = arith.select %163, %161, %168 : vector<16x24xi1>, vector<16x24xf32>
    %c0_144 = arith.constant 0 : index
    %c104 = arith.constant 104 : index
    %170 = vector.load %arg2[%c0_144, %c104] : memref<48x128xf32, #tpu.memory_space<vmem>>, vector<24x16xf32>
    %c0_145 = arith.constant 0 : index
    %c104_146 = arith.constant 104 : index
    %171 = vector.load %arg3[%c0_145, %c104_146] : memref<1x128xf32, #tpu.memory_space<vmem>>, vector<1x16xf32>
    %cst_147 = arith.constant dense<0.000000e+00> : vector<16x16xf32>
    %172 = tpu.matmul %169, %170, %cst_147 {dimension_numbers = #tpu.dot_dimension_numbers<[1], [0], [0], [1], [0, 0, 1, 1], [], []>, precision = #tpu.contract_precision<fp32>} : vector<16x24xf32>, vector<24x16xf32>, vector<16x16xf32> -> vector<16x16xf32>
    %173 = vector.broadcast %171 : vector<1x16xf32> to vector<16x16xf32>
    %174 = arith.addf %172, %173 : vector<16x16xf32>
    %cst_148 = arith.constant 0.000000e+00 : f32
    %175 = vector.broadcast %cst_148 : f32 to vector<16x16xf32>
    %176 = arith.cmpf ogt, %174, %175 : vector<16x16xf32>
    %cst_149 = arith.constant 0.000000e+00 : f32
    %177 = vector.broadcast %cst_149 : f32 to vector<16x16xf32>
    %178 = arith.minimumf %174, %177 : vector<16x16xf32>
    %179 = math.exp %178 : vector<16x16xf32>
    %cst_150 = arith.constant 1.000000e+00 : f32
    %180 = vector.broadcast %cst_150 : f32 to vector<16x16xf32>
    %181 = arith.subf %179, %180 : vector<16x16xf32>
    %182 = arith.select %176, %174, %181 : vector<16x16xi1>, vector<16x16xf32>
    %cst_151 = arith.constant 0.000000e+00 : f32
    %183 = vector.broadcast %cst_151 : f32 to vector<18x16xf32>
    %c0_152 = arith.constant 0 : index
    %c0_153 = arith.constant 0 : index
    %184 = vector.load %arg7[%c0_152, %c0_153] : memref<34x16xf32, #tpu.memory_space<vmem>>, vector<18x16xf32>
    tpu.vector_store %arg7[%c0_152, %c0_153], %183 {strides = array<i32>} : memref<34x16xf32, #tpu.memory_space<vmem>>, vector<18x16xf32>,
    %c1_154 = arith.constant 1 : index
    %c0_155 = arith.constant 0 : index
    %185 = vector.load %arg7[%c1_154, %c0_155] : memref<34x16xf32, #tpu.memory_space<vmem>>, vector<16x16xf32>
    tpu.vector_store %arg7[%c1_154, %c0_155], %182 {strides = array<i32>} : memref<34x16xf32, #tpu.memory_space<vmem>>, vector<16x16xf32>,
    %c0_156 = arith.constant 0 : index
    %c0_157 = arith.constant 0 : index
    %186 = vector.load %arg7[%c0_156, %c0_157] : memref<34x16xf32, #tpu.memory_space<vmem>>, vector<16x16xf32>
    %c1_158 = arith.constant 1 : index
    %c0_159 = arith.constant 0 : index
    %187 = vector.load %arg7[%c1_158, %c0_159] : memref<34x16xf32, #tpu.memory_space<vmem>>, vector<16x16xf32>
    %c2_160 = arith.constant 2 : index
    %c0_161 = arith.constant 0 : index
    %188 = vector.load %arg7[%c2_160, %c0_161] : memref<34x16xf32, #tpu.memory_space<vmem>>, vector<16x16xf32>
    %189 = tpu.concatenate %186, %187, %188 in 1 : vector<16x16xf32>, vector<16x16xf32>, vector<16x16xf32> -> vector<16x48xf32>
    %c0_162 = arith.constant 0 : index
    %c120 = arith.constant 120 : index
    %190 = vector.load %arg2[%c0_162, %c120] : memref<48x128xf32, #tpu.memory_space<vmem>>, vector<48x8xf32>
    %c0_163 = arith.constant 0 : index
    %c120_164 = arith.constant 120 : index
    %191 = vector.load %arg3[%c0_163, %c120_164] : memref<1x128xf32, #tpu.memory_space<vmem>>, vector<1x8xf32>
    %cst_165 = arith.constant dense<0.000000e+00> : vector<16x8xf32>
    %192 = tpu.matmul %189, %190, %cst_165 {dimension_numbers = #tpu.dot_dimension_numbers<[1], [0], [0], [1], [0, 0, 1, 1], [], []>, precision = #tpu.contract_precision<fp32>} : vector<16x48xf32>, vector<48x8xf32>, vector<16x8xf32> -> vector<16x8xf32>
    %193 = vector.broadcast %191 : vector<1x8xf32> to vector<16x8xf32>
    %194 = arith.addf %192, %193 : vector<16x8xf32>
    %c0_166 = arith.constant 0 : index
    %c24_167 = arith.constant 24 : index
    %195 = vector.load %arg9[%c0_166, %c24_167] : memref<16x32xf32, #tpu.memory_space<vmem>>, vector<16x8xf32>
    tpu.vector_store %arg9[%c0_166, %c24_167], %194 {strides = array<i32>} : memref<16x32xf32, #tpu.memory_space<vmem>>, vector<16x8xf32>,
    %c0_168 = arith.constant 0 : index
    %c0_169 = arith.constant 0 : index
    %196 = vector.load %arg9[%c0_168, %c0_169] : memref<16x32xf32, #tpu.memory_space<vmem>>, vector<16x32xf32>
    %cst_170 = arith.constant 0.000000e+00 : f32
    %197 = vector.broadcast %cst_170 : f32 to vector<16x32xf32>
    %198 = arith.maximumf %196, %197 : vector<16x32xf32>
    %c0_171 = arith.constant 0 : index
    %c0_172 = arith.constant 0 : index
    %199 = vector.load %arg9[%c0_171, %c0_172] : memref<16x32xf32, #tpu.memory_space<vmem>>, vector<16x32xf32>
    tpu.vector_store %arg9[%c0_171, %c0_172], %198 {strides = array<i32>} : memref<16x32xf32, #tpu.memory_space<vmem>>, vector<16x32xf32>,
    %c0_173 = arith.constant 0 : index
    %c0_174 = arith.constant 0 : index
    %200 = tpu.strided_load %arg9[%c0_173, %c0_174] {strides = array<i32: 3, 1>} : memref<16x32xf32, #tpu.memory_space<vmem>>, vector<4x32xf32>
    %c1_175 = arith.constant 1 : index
    %c0_176 = arith.constant 0 : index
    %201 = tpu.strided_load %arg9[%c1_175, %c0_176] {strides = array<i32: 3, 1>} : memref<16x32xf32, #tpu.memory_space<vmem>>, vector<4x32xf32>
    %202 = arith.addf %200, %201 : vector<4x32xf32>
    %c2_177 = arith.constant 2 : index
    %c0_178 = arith.constant 0 : index
    %203 = tpu.strided_load %arg9[%c2_177, %c0_178] {strides = array<i32: 3, 1>} : memref<16x32xf32, #tpu.memory_space<vmem>>, vector<4x32xf32>
    %204 = arith.addf %202, %203 : vector<4x32xf32>
    %c3_179 = arith.constant 3 : index
    %c0_180 = arith.constant 0 : index
    %205 = tpu.strided_load %arg9[%c3_179, %c0_180] {strides = array<i32: 3, 1>} : memref<16x32xf32, #tpu.memory_space<vmem>>, vector<4x32xf32>
    %206 = arith.addf %204, %205 : vector<4x32xf32>
    %c4_181 = arith.constant 4 : index
    %c0_182 = arith.constant 0 : index
    %207 = tpu.strided_load %arg9[%c4_181, %c0_182] {strides = array<i32: 3, 1>} : memref<16x32xf32, #tpu.memory_space<vmem>>, vector<4x32xf32>
    %208 = arith.addf %206, %207 : vector<4x32xf32>
    %c5_183 = arith.constant 5 : index
    %c0_184 = arith.constant 0 : index
    %209 = tpu.strided_load %arg9[%c5_183, %c0_184] {strides = array<i32: 3, 1>} : memref<16x32xf32, #tpu.memory_space<vmem>>, vector<4x32xf32>
    %210 = arith.addf %208, %209 : vector<4x32xf32>
    %c6_185 = arith.constant 6 : index
    %c0_186 = arith.constant 0 : index
    %211 = tpu.strided_load %arg9[%c6_185, %c0_186] {strides = array<i32: 3, 1>} : memref<16x32xf32, #tpu.memory_space<vmem>>, vector<4x32xf32>
    %212 = arith.addf %210, %211 : vector<4x32xf32>
    %cst_187 = arith.constant 0.142857149 : f32
    %213 = vector.broadcast %cst_187 : f32 to vector<4x32xf32>
    %214 = arith.mulf %212, %213 : vector<4x32xf32>
    %c0_188 = arith.constant 0 : index
    %c0_189 = arith.constant 0 : index
    %c0_190 = arith.constant 0 : index
    %215 = vector.load %arg4[%c0_188, %c0_189, %c0_190] : memref<1x4x32xf32, #tpu.memory_space<vmem>>, vector<1x4x32xf32>
    %216 = vector.shape_cast %215 : vector<1x4x32xf32> to vector<4x32xf32>
    %217 = vector.shape_cast %214 : vector<4x32xf32> to vector<1x4x32xf32>
    tpu.vector_store %arg4[%c0_188, %c0_189, %c0_190], %217 {strides = array<i32>} : memref<1x4x32xf32, #tpu.memory_space<vmem>>, vector<1x4x32xf32>,
    return
  }
  func.func @transform_0(%arg0: i32) -> (i32, i32, i32) {
    %c0_i32 = arith.constant 0 : i32
    %c0_i32_0 = arith.constant 0 : i32
    %c0_i32_1 = arith.constant 0 : i32
    return %arg0, %c0_i32, %c0_i32_0 : i32, i32, i32
  }
  func.func @transform_1(%arg0: i32) -> (i32, i32) {
    %c0_i32 = arith.constant 0 : i32
    %c0_i32_0 = arith.constant 0 : i32
    %c0_i32_1 = arith.constant 0 : i32
    return %c0_i32, %c0_i32_0 : i32, i32
  }
  func.func @transform_2(%arg0: i32) -> (i32, i32) {
    %c0_i32 = arith.constant 0 : i32
    %c0_i32_0 = arith.constant 0 : i32
    %c0_i32_1 = arith.constant 0 : i32
    return %c0_i32, %c0_i32_0 : i32, i32
  }
  func.func @transform_3(%arg0: i32) -> (i32, i32, i32) {
    %c0_i32 = arith.constant 0 : i32
    %c0_i32_0 = arith.constant 0 : i32
    %c0_i32_1 = arith.constant 0 : i32
    return %arg0, %c0_i32, %c0_i32_0 : i32, i32, i32
  }
}

</mosaic_0001>

<bundles_post_ra>
// kernel: densenet_forward.1
= control target key start
LH: loop header
LB: loop body
LE: loop exit
PB: predicated region body
PF: predicated region fallthrough
CT: control target
= control target key end

     0   :  { %s9088_s12 = smov 0   ;;  %s10744_s0 = inlined_call_operand.vmem [shape: f32[2,128,4], index: 0, kind: input, shape index: {}]   ;;  %s10745_s1 = inlined_call_operand.vmem [shape: f32[48,128], index: 1, kind: input, shape index: {}]   ;;  %s10746_s2 = inlined_call_operand.vmem [shape: f32[1,128], index: 2, kind: input, shape index: {}]   ;;  %s10747_s3 = inlined_call_operand.vmem [shape: f32[2,4,32], index: 3, kind: output, shape index: {}]  }
   0x1 LB: > { %s7596_s13 = sadd.s32 4294967295, %s9051_s12   ;;  %p7600_p0 = scmp.ge.s32.totalorder %s9051_s12, 1  ;;  %s9051_s12 = sphi %s9088_s12, %s13_s12  }
   0x2   : > { %p137_p1 = scmp.lt.s32.totalorder %s9051_s12, 3 }
   0x4   : > { %p138_p2 = pnand %p7600_p0, %p137_p1 }
   0x5   : > { %p9096_p3 = scmp.lt.s32.totalorder (!%p138_p2), %s7596_s13, 1  ;;  %s9054_s19 = smov (!%p138_p2), 8  }
   0x6   : > { %141 = sbr.rel (%p138_p2) target bundleno = 3858 (0xf12), region = 32  ;;  %s9055_s20 = smov (!%p138_p2), 4  }
   0x7   : > { %s9056_s21 = smov (!%p138_p2), 12   ;;  %s9057_s22 = smov (!%p138_p2), 16  }
   0x8   : > { %s9058_s23 = smov (!%p138_p2), 20   ;;  %s9059_s5 = smov (!%p138_p2), 24  }
   0x9   : > { %s9060_s6 = smov (!%p138_p2), 112   ;;  %s9063_s26 = smov (!%p138_p2), 32  }
   0xa   : > { %s9064_s29 = smov (!%p138_p2), 88   ;;  %s9065_s30 = smov (!%p138_p2), 72  }
   0xb   : > { %vm169_vm0 = vcmask 31744   ;;  %vm186_vm1 = vcmask 29696   ;;  %v9053_v0 = vmov 0.0   ;;  %s10750_s13 = smov (!%p9096_p3, %s7596_s13), 1  ;;  %vm549_vm2 = vcmask 130048   ;;  %v578_v30 = vld [vmem:[%s10745_s1 + $0x10] sm:$0xff] }
   0xc   : > { %170 = vst.msk [vmem:[#allocation2] sm:$0xff] %vm169_vm0, %v9053_v0  ;;  %171 = vst.msk [vmem:[#allocation2 + $0x8] sm:$0xff] %vm169_vm0, %v9053_v0  ;;  %s7652_s15 = sshll.u32 %s10750_s13, 7  ;;  %vm612_vm3 = vcmask 1043456   ;;  %v579_v29 = vld [vmem:[%s10745_s1 + $0x18] sm:$0xf] }
   0xd   : > { %172 = vst.msk [vmem:[#allocation2 + $0x10] sm:$0xff] %vm169_vm0, %v9053_v0  ;;  %173 = vst.msk [vmem:[#allocation2 + $0x18] sm:$0xff] %vm169_vm0, %v9053_v0  ;;  %s164_s18 = scalar_lea.vmem %s10744_s0, %s7652_s15  ;;  %v9185_v31 = vld [vmem:[%s10745_s1 + $0x8] sm:$0xff]  ;;  %v614_v32 = vsel %vm612_vm3, %v579_v29, 0  ;;  %v9187_v33 = vand.u32 4294901760, %v578_v30  ;;  %v9195_v35 = vld [vmem:[%s10745_s1] sm:$0xff] }
   0xe   : > { %174 = vst.msk [vmem:[#allocation2 + $0x20] sm:$0xff] %vm169_vm0, %v9053_v0  ;;  %175 = vst.msk [vmem:[#allocation2 + $0x28] sm:$0xff] %vm169_vm0, %v9053_v0  ;;  %v188_v1 = vld [vmem:[%s164_s18] sm:$0xff]  ;;  %v189_v2 = vld [vmem:[%s164_s18 + $0x8] sm:$0xff]  ;;  %v9190_v34 = vand.u32 4294901760, %v9185_v31  ;;  %v9197_v36 = vand.u32 4294901760, %v614_v32 }
   0xf   : > { %176 = vst.msk [vmem:[#allocation2 + $0x30] sm:$0xff] %vm169_vm0, %v9053_v0  ;;  %177 = vst.msk [vmem:[#allocation2 + $0x38] sm:$0xff] %vm169_vm0, %v9053_v0  ;;  %v190_v3 = vld [vmem:[%s164_s18 + $0x10] sm:$0xff]  ;;  %v191_v4 = vld [vmem:[%s164_s18 + $0x18] sm:$0xff]  ;;  %v9200_v37 = vand.u32 4294901760, %v9195_v35  ;;  %v9205_v38 = vsub.f32 %v578_v30, %v9187_v33  ;;  %vm531_vm4 = vcmask 64512  }
  0x10   : > { %178 = vst.msk [vmem:[#allocation2 + $0x40] sm:$0xff] %vm169_vm0, %v9053_v0  ;;  %179 = vst.msk [vmem:[#allocation2 + $0x48] sm:$0xff] %vm169_vm0, %v9053_v0  ;;  %v192_v5 = vld [vmem:[%s164_s18 + $0x20] sm:$0xff]  ;;  %v193_v6 = vld [vmem:[%s164_s18 + $0x28] sm:$0xff]  ;;  %v9209_v39 = vsub.f32 %v9185_v31, %v9190_v34  ;;  %v9212_v42 = vsub.f32 %v614_v32, %v9197_v36  ;;  %8121 = vmatprep.subr.mxu0 %v9197_v36  ;;  %vm540_vm5 = vcmask 97280   ;;  %vm558_vm6 = vcmask 162816  }
  0x11   : > { %180 = vst.msk [vmem:[#allocation2 + $0x50] sm:$0xff] %vm169_vm0, %v9053_v0  ;;  %181 = vst.msk [vmem:[#allocation2 + $0x58] sm:$0xff] %vm169_vm0, %v9053_v0  ;;  %v194_v7 = vld [vmem:[%s164_s18 + $0x30] sm:$0xff]  ;;  %v195_v8 = vld [vmem:[%s164_s18 + $0x38] sm:$0xff]  ;;  %v9216_v43 = vsub.f32 %v9195_v35, %v9200_v37  ;;  %v9220_v44 = vand.u32 4294901760, %v9205_v38  ;;  %8122 = vmatpush3.msra.mxu0 %v9197_v36  ;;  %vm567_vm7 = vcmask 195584  }
  0x12   : > { %182 = vst.msk [vmem:[#allocation2 + $0x60] sm:$0xff] %vm169_vm0, %v9053_v0  ;;  %183 = vst.msk [vmem:[#allocation2 + $0x68] sm:$0xff] %vm169_vm0, %v9053_v0  ;;  %v196_v9 = vld [vmem:[%s164_s18 + $0x40] sm:$0xff]  ;;  %v197_v10 = vld [vmem:[%s164_s18 + $0x48] sm:$0xff]  ;;  %v9223_v45 = vand.u32 4294901760, %v9209_v39  ;;  %v9227_v46 = vand.u32 4294901760, %v9212_v42  ;;  %8123 = vmatprep.subr.mxu0 %v9187_v33 }
  0x13   : > { %184 = vst.msk [vmem:[#allocation2 + $0x70] sm:$0xff] %vm169_vm0, %v9053_v0  ;;  %185 = vst.msk [vmem:[#allocation2 + $0x78] sm:$0xff] %vm169_vm0, %v9053_v0  ;;  %v198_v11 = vld [vmem:[%s164_s18 + $0x50] sm:$0xff]  ;;  %v199_v12 = vld [vmem:[%s164_s18 + $0x58] sm:$0xff]  ;;  %v800_v47 = vsub.f32 %v9205_v38, %v9220_v44  ;;  %v9237_v51 = vand.u32 4294901760, %v9216_v43  ;;  %8124 = vmatpush3.msra.mxu0 %v9187_v33  ;;  %vm587_vm8 = vcmask 228352  }
  0x14   : > { %187 = vst.msk [vmem:[#allocation2 + $0x80] sm:$0x3f] %vm186_vm1, %v9053_v0  ;;  %v200_v13 = vld [vmem:[%s164_s18 + $0x60] sm:$0xff]  ;;  %v201_v14 = vld [vmem:[%s164_s18 + $0x68] sm:$0xff]  ;;  %v202_v15 = vld [vmem:[%s164_s18 + $0x70] sm:$0xff]  ;;  %v793_v50 = vsub.f32 %v9212_v42, %v9227_v46  ;;  %v807_v52 = vsub.f32 %v9209_v39, %v9223_v45  ;;  %8125 = vmatprep.subr.mxu0 %v9190_v34  ;;  %vm1458_vm9 = vcmask 123904  }
  0x15   : > { %204 = vst.msk [vmem:[#allocation2 + $0x3] sm:$0xff] %vm169_vm0, %v188_v1  ;;  %205 = vst.msk [vmem:[#allocation2 + $0xb] sm:$0xff] %vm169_vm0, %v189_v2  ;;  %v203_v16 = vld [vmem:[%s164_s18 + $0x78] sm:$0xff]  ;;  %v801_v54 = vand.u32 4294901760, %v800_v47  ;;  %8126 = vmatpush3.msra.mxu0 %v9190_v34  ;;  %v814_v57 = vsub.f32 %v9216_v43, %v9237_v51  ;;  %s9062_s15 = smov 96   ;;  %s9066_s9 = smov 64  }
  0x16   : > { %206 = vst.msk [vmem:[#allocation2 + $0x13] sm:$0xff] %vm169_vm0, %v190_v3  ;;  %207 = vst.msk [vmem:[#allocation2 + $0x1b] sm:$0xff] %vm169_vm0, %v191_v4  ;;  %v794_v53 = vand.u32 4294901760, %v793_v50  ;;  %8127 = vmatprep.subr.mxu0 %v9200_v37  ;;  %v808_v58 = vand.u32 4294901760, %v807_v52  ;;  %s9067_s18 = smov 48  }
  0x17   : > { %208 = vst.msk [vmem:[#allocation2 + $0x23] sm:$0xff] %vm169_vm0, %v192_v5  ;;  %209 = vst.msk [vmem:[#allocation2 + $0x2b] sm:$0xff] %vm169_vm0, %v193_v6  ;;  %8128 = vmatpush3.msra.mxu0 %v9200_v37  ;;  %v815_v61 = vand.u32 4294901760, %v814_v57 }
  0x18   : > { %210 = vst.msk [vmem:[#allocation2 + $0x33] sm:$0xff] %vm169_vm0, %v194_v7  ;;  %211 = vst.msk [vmem:[#allocation2 + $0x3b] sm:$0xff] %vm169_vm0, %v195_v8  ;;  %8141 = vmatprep.subr.mxu1 %v794_v53  ;;  %8161 = vmatprep.subr.mxu0 %v9212_v42 }
  0x19   : > { %212 = vst.msk [vmem:[#allocation2 + $0x43] sm:$0xff] %vm169_vm0, %v196_v9  ;;  %213 = vst.msk [vmem:[#allocation2 + $0x4b] sm:$0xff] %vm169_vm0, %v197_v10  ;;  %8142 = vmatpush3.msra.mxu1 %v794_v53 }
  0x1a   : > { %214 = vst.msk [vmem:[#allocation2 + $0x53] sm:$0xff] %vm169_vm0, %v198_v11  ;;  %215 = vst.msk [vmem:[#allocation2 + $0x5b] sm:$0xff] %vm169_vm0, %v199_v12  ;;  %8143 = vmatprep.subr.mxu1 %v801_v54 }
  0x1b   : > { %216 = vst.msk [vmem:[#allocation2 + $0x63] sm:$0xff] %vm169_vm0, %v200_v13  ;;  %217 = vst.msk [vmem:[#allocation2 + $0x6b] sm:$0xff] %vm169_vm0, %v201_v14  ;;  %8144 = vmatpush3.msra.mxu1 %v801_v54 }
  0x1c   : > { %218 = vst.msk [vmem:[#allocation2 + $0x73] sm:$0xff] %vm169_vm0, %v202_v15  ;;  %219 = vst.msk [vmem:[#allocation2 + $0x7b] sm:$0xff] %vm169_vm0, %v203_v16  ;;  %v252_v17 = vld [vmem:[#allocation2 + $0x2] ss:$2 sm:$0xff]  ;;  %v236_v18 = vld [vmem:[#allocation2 + $0x1] ss:$2 sm:$0xff]  ;;  %8145 = vmatprep.subr.mxu1 %v808_v58 }
  0x1d   : > { %2174 = vst.msk [vmem:[#allocation4] sm:$0xff] %vm549_vm2, %v9053_v0  ;;  %2175 = vst.msk [vmem:[#allocation4 + $0x8] sm:$0xff] %vm549_vm2, %v9053_v0  ;;  %371 = vrot.lane.b32.xlu1 %v252_v17, %s9054_s19  ;;  %339 = vrot.lane.b32.xlu0 %v236_v18, %s9055_s20  ;;  %v254_v19 = vld [vmem:[#allocation2 + $0x12] ss:$2 sm:$0xff]  ;;  %v238_v20 = vld [vmem:[#allocation2 + $0x11] ss:$2 sm:$0xff] }
  0x1e   : > { %2176 = vst.msk [vmem:[#allocation4 + $0x10] sm:$0xff] %vm549_vm2, %v9053_v0  ;;  %2177 = vst.msk [vmem:[#allocation4 + $0x18] sm:$0xff] %vm549_vm2, %v9053_v0  ;;  %v270_v21 = vld [vmem:[#allocation2 + $0x13] ss:$2 sm:$0xff]  ;;  %v268_v22 = vld [vmem:[#allocation2 + $0x3] ss:$2 sm:$0xff]  ;;  %8146 = vmatpush3.msra.mxu1 %v808_v58 }
  0x1f   : > { %v240_v23 = vld [vmem:[#allocation2 + $0x21] ss:$2 sm:$0xff]  ;;  %v284_v24 = vld [vmem:[#allocation2 + $0x4] ss:$2 sm:$0xff]  ;;  %v286_v26 = vld [vmem:[#allocation2 + $0x14] ss:$2 sm:$0xff]  ;;  %8147 = vmatprep.subr.mxu1 %v815_v61 }
  0x20   : > { %v300_v25 = vld [vmem:[#allocation2 + $0x5] ss:$2 sm:$0xff]  ;;  %v256_v27 = vld [vmem:[#allocation2 + $0x22] ss:$2 sm:$0xff]  ;;  %v302_v41 = vld [vmem:[#allocation2 + $0x15] ss:$2 sm:$0xff]  ;;  %8148 = vmatpush3.msra.mxu1 %v815_v61 }
  0x21   : > { %373 = vrot.lane.b32.xlu1 %v254_v19, %s9054_s19  ;;  %341 = vrot.lane.b32.xlu0 %v238_v20, %s9055_s20  ;;  %v242_v28 = vld [vmem:[#allocation2 + $0x31] ss:$2 sm:$0xff]  ;;  %v316_v40 = vld [vmem:[#allocation2 + $0x6] ss:$2 sm:$0xff]  ;;  %v318_v56 = vld [vmem:[#allocation2 + $0x16] ss:$2 sm:$0xff] }
  0x22   : > { %v272_v48 = vld [vmem:[#allocation2 + $0x23] ss:$2 sm:$0xff]  ;;  %v258_v49 = vld [vmem:[#allocation2 + $0x32] ss:$2 sm:$0xff]  ;;  %v274_v55 = vld [vmem:[#allocation2 + $0x33] ss:$2 sm:$0xff]  ;;  %8181 = vmatprep.subr.mxu1 %v9197_v36 }
  0x23   : > { %v244_v59 = vld [vmem:[#allocation2 + $0x41] ss:$2 sm:$0xff]  ;;  %v288_v60 = vld [vmem:[#allocation2 + $0x24] ss:$2 sm:$0xff]  ;;  %v290_v63 = vld [vmem:[#allocation2 + $0x34] ss:$2 sm:$0xff] }
  0x24   : > { %v304_v62 = vld [vmem:[#allocation2 + $0x25] ss:$2 sm:$0xff]  ;;  %v260_v1 = vld [vmem:[#allocation2 + $0x42] ss:$2 sm:$0xff]  ;;  %v306_v4 = vld [vmem:[#allocation2 + $0x35] ss:$2 sm:$0xff] }
  0x25   : > { %405 = vrot.lane.b32.xlu1 %v270_v21, %s9056_s21  ;;  %403 = vrot.lane.b32.xlu0 %v268_v22, %s9056_s21  ;;  %v246_v2 = vld [vmem:[#allocation2 + $0x51] ss:$2 sm:$0xff]  ;;  %v320_v3 = vld [vmem:[#allocation2 + $0x26] ss:$2 sm:$0xff]  ;;  %v322_v8 = vld [vmem:[#allocation2 + $0x36] ss:$2 sm:$0xff] }
  0x26   : > { %v276_v5 = vld [vmem:[#allocation2 + $0x43] ss:$2 sm:$0xff]  ;;  %v262_v6 = vld [vmem:[#allocation2 + $0x52] ss:$2 sm:$0xff]  ;;  %v278_v7 = vld [vmem:[#allocation2 + $0x53] ss:$2 sm:$0xff] }
  0x27   : > { %v248_v9 = vld [vmem:[#allocation2 + $0x61] ss:$2 sm:$0xff]  ;;  %v292_v10 = vld [vmem:[#allocation2 + $0x44] ss:$2 sm:$0xff]  ;;  %v294_v12 = vld [vmem:[#allocation2 + $0x54] ss:$2 sm:$0xff] }
  0x28   : > { %v308_v11 = vld [vmem:[#allocation2 + $0x45] ss:$2 sm:$0xff]  ;;  %v264_v13 = vld [vmem:[#allocation2 + $0x62] ss:$2 sm:$0xff]  ;;  %v310_v16 = vld [vmem:[#allocation2 + $0x55] ss:$2 sm:$0xff] }
  0x29   : > { %343 = vrot.lane.b32.xlu1 %v240_v23, %s9055_s20  ;;  %435 = vrot.lane.b32.xlu0 %v284_v24, %s9057_s22  ;;  %v250_v14 = vld [vmem:[#allocation2 + $0x71] ss:$2 sm:$0xff]  ;;  %v324_v15 = vld [vmem:[#allocation2 + $0x46] ss:$2 sm:$0xff]  ;;  %v326_v20 = vld [vmem:[#allocation2 + $0x56] ss:$2 sm:$0xff] }
  0x2a   : > { %v280_v17 = vld [vmem:[#allocation2 + $0x63] ss:$2 sm:$0xff]  ;;  %v266_v18 = vld [vmem:[#allocation2 + $0x72] ss:$2 sm:$0xff]  ;;  %v282_v19 = vld [vmem:[#allocation2 + $0x73] ss:$2 sm:$0xff] }
  0x2b   : > { %v298_v21 = vld [vmem:[#allocation2 + $0x74] ss:$2 sm:$0xff]  ;;  %v296_v22 = vld [vmem:[#allocation2 + $0x64] ss:$2 sm:$0xff]  ;;  %v314_v23 = vld [vmem:[#allocation2 + $0x75] ss:$2 sm:$0xff] }
  0x2c   : > { %v312_v24 = vld [vmem:[#allocation2 + $0x65] ss:$2 sm:$0xff]  ;;  %v222_v57 = vld [vmem:[#allocation2 + $0x10] ss:$2 sm:$0xff]  ;;  %2178 = vst.msk [vmem:[#allocation4 + $0x20] sm:$0x3] %vm1458_vm9, %v9053_v0 }
  0x2d   : > { %467 = vrot.lane.b32.xlu1 %v300_v25, %s9058_s23  ;;  %437 = vrot.lane.b32.xlu0 %v286_v26, %s9057_s22  ;;  %v330_v25 = vld [vmem:[#allocation2 + $0x76] ss:$2 sm:$0xff]  ;;  %v328_v26 = vld [vmem:[#allocation2 + $0x66] ss:$2 sm:$0xff] }
  0x31   : > { %375 = vrot.lane.b32.xlu1 %v256_v27, %s9054_s19  ;;  %345 = vrot.lane.b32.xlu0 %v242_v28, %s9055_s20 }
  0x35   : > { %499 = vrot.lane.b32.xlu1 %v316_v40, %s9059_s5  ;;  %469 = vrot.lane.b32.xlu0 %v302_v41, %s9058_s23 }
  0x39   : > { %407 = vrot.lane.b32.xlu1 %v272_v48, %s9056_s21  ;;  %377 = vrot.lane.b32.xlu0 %v258_v49, %s9054_s19  ;;  %v220_v48 = vld [vmem:[#allocation2] ss:$2 sm:$0xff] }
  0x3d   : > { %409 = vrot.lane.b32.xlu1 %v274_v55, %s9056_s21  ;;  %501 = vrot.lane.b32.xlu0 %v318_v56, %s9059_s5 }
  0x41   : > { %347 = vrot.lane.b32.xlu1 %v244_v59, %s9055_s20  ;;  %439 = vrot.lane.b32.xlu0 %v288_v60, %s9057_s22 }
  0x45   : > { %471 = vrot.lane.b32.xlu1 %v304_v62, %s9058_s23  ;;  %441 = vrot.lane.b32.xlu0 %v290_v63, %s9057_s22 }
  0x49   : > { %379 = vrot.lane.b32.xlu1 %v260_v1, %s9054_s19  ;;  %349 = vrot.lane.b32.xlu0 %v246_v2, %s9055_s20 }
  0x4d   : > { %503 = vrot.lane.b32.xlu1 %v320_v3, %s9059_s5  ;;  %473 = vrot.lane.b32.xlu0 %v306_v4, %s9058_s23 }
  0x51   : > { %411 = vrot.lane.b32.xlu1 %v276_v5, %s9056_s21  ;;  %381 = vrot.lane.b32.xlu0 %v262_v6, %s9054_s19 }
  0x55   : > { %413 = vrot.lane.b32.xlu1 %v278_v7, %s9056_s21  ;;  %505 = vrot.lane.b32.xlu0 %v322_v8, %s9059_s5 }
  0x59   : > { %351 = vrot.lane.b32.xlu1 %v248_v9, %s9055_s20  ;;  %443 = vrot.lane.b32.xlu0 %v292_v10, %s9057_s22 }
  0x5d   : > { %475 = vrot.lane.b32.xlu1 %v308_v11, %s9058_s23  ;;  %445 = vrot.lane.b32.xlu0 %v294_v12, %s9057_s22 }
  0x61   : > { %383 = vrot.lane.b32.xlu1 %v264_v13, %s9054_s19  ;;  %353 = vrot.lane.b32.xlu0 %v250_v14, %s9055_s20 }
  0x65   : > { %507 = vrot.lane.b32.xlu1 %v324_v15, %s9059_s5  ;;  %477 = vrot.lane.b32.xlu0 %v310_v16, %s9058_s23 }
  0x69   : > { %415 = vrot.lane.b32.xlu1 %v280_v17, %s9056_s21  ;;  %385 = vrot.lane.b32.xlu0 %v266_v18, %s9054_s19 }
  0x6d   : > { %417 = vrot.lane.b32.xlu1 %v282_v19, %s9056_s21  ;;  %509 = vrot.lane.b32.xlu0 %v326_v20, %s9059_s5 }
  0x71   : > { %449 = vrot.lane.b32.xlu1 %v298_v21, %s9057_s22  ;;  %447 = vrot.lane.b32.xlu0 %v296_v22, %s9057_s22 }
  0x75   : > { %481 = vrot.lane.b32.xlu1 %v314_v23, %s9058_s23  ;;  %479 = vrot.lane.b32.xlu0 %v312_v24, %s9058_s23  ;;  %v224_v24 = vld [vmem:[#allocation2 + $0x20] ss:$2 sm:$0xff] }
  0x79   : > { %513 = vrot.lane.b32.xlu1 %v330_v25, %s9059_s5  ;;  %511 = vrot.lane.b32.xlu0 %v328_v26, %s9059_s5 }
  0x7d   : > { %1543 = vrot.lane.b32.xlu0 %v9185_v31, %s9060_s6  ;;  %1541 = vrot.lane.b32.xlu1 %v9195_v35, %s9060_s6  ;;  %v9061_v31 = vmov -3.4028235e+38  }
  0x7e   : > { %1451 = vst.msk [vmem:[#allocation3 + $0x8] sm:$0xff] %vm549_vm2, %v9061_v31  ;;  %1452 = vst.msk [vmem:[#allocation3 + $0x10] sm:$0xff] %vm549_vm2, %v9061_v31 }
  0x7f   : > { %1450 = vst.msk [vmem:[#allocation3] sm:$0xff] %vm549_vm2, %v9061_v31  ;;  %1453 = vst.msk [vmem:[#allocation3 + $0x18] sm:$0xff] %vm549_vm2, %v9061_v31 }
  0x80   : > { %1454 = vst.msk [vmem:[#allocation3 + $0x20] sm:$0xff] %vm549_vm2, %v9061_v31  ;;  %1455 = vst.msk [vmem:[#allocation3 + $0x28] sm:$0xff] %vm549_vm2, %v9061_v31 }
  0x81   : > { %1456 = vst.msk [vmem:[#allocation3 + $0x30] sm:$0xff] %vm549_vm2, %v9061_v31  ;;  %1457 = vst.msk [vmem:[#allocation3 + $0x38] sm:$0xff] %vm549_vm2, %v9061_v31 }
  0x82   : > { %1459 = vst.msk [vmem:[#allocation3 + $0x40] sm:$0x3] %vm1458_vm9, %v9061_v31 }
  0x8f   : > { %v372_v27 = vpop.permute.xlu1 %371  ;;  %v340_v28 = vpop.permute.xlu0 %339 }
  0x90   : > { %v523_v52 = vsel %vm169_vm0, %v220_v48, %v340_v28 }
  0x91   : > { %v532_v55 = vsel %vm531_vm4, %v523_v52, %v372_v27 }
  0x93   : > { %v374_v29 = vpop.permute.xlu1 %373  ;;  %v342_v30 = vpop.permute.xlu0 %341 }
  0x94   : > { %v524_v63 = vsel %vm169_vm0, %v222_v57, %v342_v30 }
  0x95   : > { %v533_v5 = vsel %vm531_vm4, %v524_v63, %v374_v29 }
  0x97   : > { %v406_v32 = vpop.permute.xlu1 %405  ;;  %v404_v40 = vpop.permute.xlu0 %403 }
  0x98   : > { %v541_v56 = vsel %vm540_vm5, %v532_v55, %v404_v40  ;;  %v542_v7 = vsel %vm540_vm5, %v533_v5, %v406_v32 }
  0x9b   : > { %v344_v41 = vpop.permute.xlu1 %343  ;;  %v436_v47 = vpop.permute.xlu0 %435 }
  0x9c   : > { %v550_v58 = vsel %vm549_vm2, %v541_v56, %v436_v47  ;;  %v525_v27 = vsel %vm169_vm0, %v224_v24, %v344_v41 }
  0x9f   : > { %v468_v49 = vpop.permute.xlu1 %467  ;;  %v438_v50 = vpop.permute.xlu0 %437 }
  0xa0   : > { %v559_v59 = vsel %vm558_vm6, %v550_v58, %v468_v49  ;;  %v551_v8 = vsel %vm549_vm2, %v542_v7, %v438_v50  ;;  %v226_v49 = vld [vmem:[#allocation2 + $0x30] ss:$2 sm:$0xff] }
  0xa3   : > { %v376_v53 = vpop.permute.xlu1 %375  ;;  %v9285_v54 = vpop.permute.xlu0 %345 }
  0xa4   : > { %v534_v30 = vsel %vm531_vm4, %v525_v27, %v376_v53  ;;  %v526_v53 = vsel %vm169_vm0, %v226_v49, %v9285_v54 }
  0xa7   : > { %v500_v60 = vpop.permute.xlu1 %499  ;;  %v470_v61 = vpop.permute.xlu0 %469 }
  0xa8   : > { %v568_v62 = vsel %vm567_vm7, %v559_v59, %v500_v60  ;;  %v560_v10 = vsel %vm558_vm6, %v551_v8, %v470_v61 }
  0xa9   : > { %v589_v1 = vsel %vm587_vm8, %v568_v62, 0 }
  0xaa   : > { %v9294_v2 = vand.u32 4294901760, %v589_v1 }
  0xab   : > { %v408_v3 = vpop.permute.xlu1 %407  ;;  %v378_v4 = vpop.permute.xlu0 %377 }
  0xac   : > { %v9298_v6 = vsub.f32 %v589_v1, %v9294_v2  ;;  %8149 = vmatprep.mubr.f32.mxu1 %v9294_v2  ;;  %v543_v32 = vsel %vm540_vm5, %v534_v30, %v408_v3  ;;  %v230_v30 = vld [vmem:[#allocation2 + $0x50] ss:$2 sm:$0xff] }
  0xae   : > { %v687_v9 = vand.u32 4294901760, %v9298_v6 }
  0xaf   : > { %v410_v11 = vpop.permute.xlu1 %409  ;;  %v502_v12 = vpop.permute.xlu0 %501 }
  0xb0   : > { %v569_v13 = vsel %vm567_vm7, %v560_v10, %v502_v12  ;;  %v688_v14 = vsub.f32 %v9298_v6, %v687_v9  ;;  %v228_v12 = vld [vmem:[#allocation2 + $0x40] ss:$2 sm:$0xff] }
  0xb1   : > { %v592_v15 = vsel %vm587_vm8, %v569_v13, 0 }
  0xb2   : > { %v9310_v16 = vand.u32 4294901760, %v592_v15  ;;  %v689_v17 = vand.u32 4294901760, %v688_v14 }
  0xb3   : > { %v9312_v18 = vpop.permute.xlu1 %347  ;;  %v440_v19 = vpop.permute.xlu0 %439 }
  0xb4   : > { %v9315_v20 = vsub.f32 %v592_v15, %v9310_v16  ;;  %8129 = vmatprep.mubr.f32.mxu0 %v689_v17  ;;  %8150 = vmatmul.mubr.f32.vlgmr.msra.gmra.mxu1 %v9310_v16  ;;  %v552_v40 = vsel %vm549_vm2, %v543_v32, %v440_v19  ;;  %v527_v15 = vsel %vm169_vm0, %v228_v12, %v9312_v18 }
  0xb5   : > { %8182 = vmatpush3.msra.mxu1 %v9197_v36 }
  0xb6   : > { %v697_v21 = vand.u32 4294901760, %v9315_v20  ;;  %8183 = vmatprep.subr.mxu1 %v9187_v33 }
  0xb7   : > { %v472_v22 = vpop.permute.xlu1 %471  ;;  %v442_v23 = vpop.permute.xlu0 %441  ;;  %8184 = vmatpush3.msra.mxu1 %v9187_v33 }
  0xb8   : > { %v698_v25 = vsub.f32 %v9315_v20, %v697_v21  ;;  %8185 = vmatprep.subr.mxu1 %v9190_v34  ;;  %v561_v41 = vsel %vm558_vm6, %v552_v40, %v472_v22 }
  0xb9   : > { %8186 = vmatpush3.msra.mxu1 %v9190_v34 }
  0xba   : > { %v699_v26 = vand.u32 4294901760, %v698_v25  ;;  %8187 = vmatprep.subr.mxu1 %v9200_v37 }
  0xbb   : > { %v380_v28 = vpop.permute.xlu1 %379  ;;  %v9329_v29 = vpop.permute.xlu0 %349  ;;  %8188 = vmatpush3.msra.mxu1 %v9200_v37 }
  0xbc   : > { %8130 = vmatmul.mubr.f32.vlgmr.msra.gmra.mxu0 %v699_v26  ;;  %8221 = vmatprep.subr.mxu1 %v9197_v36  ;;  %v536_v22 = vsel %vm531_vm4, %v527_v15, %v380_v28  ;;  %v528_v18 = vsel %vm169_vm0, %v230_v30, %v9329_v29 }
  0xbd   : > { %8162 = vmatpush3.msra.mxu0 %v9212_v42 }
  0xbe   : > { %8163 = vmatprep.subr.mxu0 %v9205_v38 }
  0xbf   : > { %v504_v47 = vpop.permute.xlu1 %503  ;;  %v474_v48 = vpop.permute.xlu0 %473  ;;  %8164 = vmatpush3.msra.mxu0 %v9205_v38  ;;  %v535_v38 = vsel %vm531_vm4, %v526_v53, %v378_v4 }
  0xc0   : > { %v570_v50 = vsel %vm567_vm7, %v561_v41, %v504_v47  ;;  %8165 = vmatprep.subr.mxu0 %v9209_v39 }
  0xc1   : > { %v595_v52 = vsel %vm587_vm8, %v570_v50, 0  ;;  %8166 = vmatpush3.msra.mxu0 %v9209_v39  ;;  %v544_v39 = vsel %vm540_vm5, %v535_v38, %v410_v11 }
  0xc2   : > { %v9344_v42 = vand.u32 4294901760, %v595_v52  ;;  %8167 = vmatprep.subr.mxu0 %v9216_v43  ;;  %v553_v58 = vsel %vm549_vm2, %v544_v39, %v442_v23 }
  0xc3   : > { %v412_v55 = vpop.permute.xlu1 %411  ;;  %v382_v56 = vpop.permute.xlu0 %381  ;;  %8168 = vmatpush3.msra.mxu0 %v9216_v43  ;;  %v562_v54 = vsel %vm558_vm6, %v553_v58, %v474_v48 }
  0xc4   : > { %v9352_v57 = vsub.f32 %v595_v52, %v9344_v42  ;;  %8152 = vmatprep.mubr.f32.mxu1 %v9344_v42  ;;  %8201 = vmatprep.subr.mxu0 %v9227_v46  ;;  %v545_v23 = vsel %vm540_vm5, %v536_v22, %v412_v55  ;;  %v537_v48 = vsel %vm531_vm4, %v528_v18, %v382_v56 }
  0xc6   : > { %v707_v59 = vand.u32 4294901760, %v9352_v57 }
  0xc7   : > { %v414_v60 = vpop.permute.xlu1 %413  ;;  %v506_v61 = vpop.permute.xlu0 %505 }
  0xc8   : > { %v571_v43 = vsel %vm567_vm7, %v562_v54, %v506_v61  ;;  %v708_v62 = vsub.f32 %v9352_v57, %v707_v59  ;;  %v546_v50 = vsel %vm540_vm5, %v537_v48, %v414_v60  ;;  %v232_v60 = vld [vmem:[#allocation2 + $0x60] ss:$2 sm:$0xff] }
  0xc9   : > { %v598_v63 = vsel %vm587_vm8, %v571_v43, 0 }
  0xca   : > { %v9365_v1 = vand.u32 4294901760, %v598_v63  ;;  %v709_v3 = vand.u32 4294901760, %v708_v62 }
  0xcb   : > { %v352_v4 = vpop.permute.xlu1 %351  ;;  %v444_v5 = vpop.permute.xlu0 %443 }
  0xcc   : > { %v9368_v7 = vsub.f32 %v598_v63, %v9365_v1  ;;  %8132 = vmatprep.mubr.f32.mxu0 %v709_v3  ;;  %8153 = vmatmul.mubr.f32.gmra.mxu1 %v9365_v1  ;;  %v554_v24 = vsel %vm549_vm2, %v545_v23, %v444_v5  ;;  %v234_v63 = vld [vmem:[#allocation2 + $0x70] ss:$2 sm:$0xff] }
  0xce   : > { %v717_v8 = vand.u32 4294901760, %v9368_v7 }
  0xcf   : > { %v476_v10 = vpop.permute.xlu1 %475  ;;  %v446_v11 = vpop.permute.xlu0 %445 }
  0xd0   : > { %v718_v13 = vsub.f32 %v9368_v7, %v717_v8  ;;  %v563_v25 = vsel %vm558_vm6, %v554_v24, %v476_v10  ;;  %v555_v52 = vsel %vm549_vm2, %v546_v50, %v446_v11  ;;  %v529_v10 = vsel %vm169_vm0, %v232_v60, %v352_v4 }
  0xd2   : > { %v719_v14 = vand.u32 4294901760, %v718_v13 }
  0xd3   : > { %v384_v17 = vpop.permute.xlu1 %383  ;;  %v354_v19 = vpop.permute.xlu0 %353 }
  0xd4   : > { %8133 = vmatmul.mubr.f32.gmra.mxu0 %v719_v14  ;;  %v530_v11 = vsel %vm169_vm0, %v234_v63, %v354_v19  ;;  %v538_v14 = vsel %vm531_vm4, %v529_v10, %v384_v17 }
  0xd7   : > { %v508_v26 = vpop.permute.xlu1 %507  ;;  %v478_v27 = vpop.permute.xlu0 %477 }
  0xd8   : > { %v572_v32 = vsel %vm567_vm7, %v563_v25, %v508_v26  ;;  %v564_v55 = vsel %vm558_vm6, %v555_v52, %v478_v27 }
  0xd9   : > { %v601_v40 = vsel %vm587_vm8, %v572_v32, 0 }
  0xda   : > { %v9383_v41 = vand.u32 4294901760, %v601_v40 }
  0xdb   : > { %v416_v28 = vpop.permute.xlu1 %415  ;;  %v386_v47 = vpop.permute.xlu0 %385 }
  0xdc   : > { %v9389_v49 = vsub.f32 %v601_v40, %v9383_v41  ;;  %8155 = vmatprep.mubr.f32.mxu1 %v9383_v41  ;;  %v539_v15 = vsel %vm531_vm4, %v530_v11, %v386_v47  ;;  %v547_v23 = vsel %vm540_vm5, %v538_v14, %v416_v28 }
  0xde   : > { %v727_v53 = vand.u32 4294901760, %v9389_v49 }
  0xdf   : > { %v418_v38 = vpop.permute.xlu1 %417  ;;  %v510_v39 = vpop.permute.xlu0 %509 }
  0xe0   : > { %v573_v29 = vsel %vm567_vm7, %v564_v55, %v510_v39  ;;  %v728_v58 = vsub.f32 %v9389_v49, %v727_v53  ;;  %v548_v24 = vsel %vm540_vm5, %v539_v15, %v418_v38 }
  0xe1   : > { %v604_v56 = vsel %vm587_vm8, %v573_v29, 0 }
  0xe2   : > { %v9399_v54 = vand.u32 4294901760, %v604_v56  ;;  %v729_v61 = vand.u32 4294901760, %v728_v58 }
  0xe3   : > { %v450_v43 = vpop.permute.xlu1 %449  ;;  %v448_v62 = vpop.permute.xlu0 %447 }
  0xe4   : > { %v9402_v3 = vsub.f32 %v604_v56, %v9399_v54  ;;  %8135 = vmatprep.mubr.f32.mxu0 %v729_v61  ;;  %8156 = vmatmul.mubr.f32.gmra.mxu1 %v9399_v54  ;;  %v557_v25 = vsel %vm549_vm2, %v548_v24, %v450_v43  ;;  %v556_v26 = vsel %vm549_vm2, %v547_v23, %v448_v62 }
  0xe6   : > { %v737_v5 = vand.u32 4294901760, %v9402_v3 }
  0xe7   : > { %v482_v12 = vpop.permute.xlu1 %481  ;;  %v480_v13 = vpop.permute.xlu0 %479 }
  0xe8   : > { %v738_v22 = vsub.f32 %v9402_v3, %v737_v5  ;;  %v566_v4 = vsel %vm558_vm6, %v557_v25, %v482_v12  ;;  %v565_v19 = vsel %vm558_vm6, %v556_v26, %v480_v13 }
  0xea   : > { %v739_v27 = vand.u32 4294901760, %v738_v22 }
  0xeb   : > { %v514_v30 = vpop.permute.xlu1 %513  ;;  %v512_v32 = vpop.permute.xlu0 %511 }
  0xec   : > { %v575_v17 = vsel %vm567_vm7, %v566_v4, %v514_v30  ;;  %v574_v40 = vsel %vm567_vm7, %v565_v19, %v512_v32  ;;  %8136 = vmatmul.mubr.f32.gmra.mxu0 %v739_v27 }
  0xed   : > { %v610_v18 = vsel %vm587_vm8, %v575_v17, 0  ;;  %v607_v28 = vsel %vm587_vm8, %v574_v40, 0 }
  0xee   : > { %v9421_v47 = vand.u32 4294901760, %v610_v18  ;;  %v745_v48 = vand.u32 4294901760, %v607_v28 }
  0xef   : > { %v1542_v35 = vpop.permute.xlu1 %1541 }
  0xf0   : > { %v756_v50 = vsub.f32 %v610_v18, %v9421_v47  ;;  %v746_v52 = vsub.f32 %v607_v28, %v745_v48  ;;  %8158 = vmatprep.mubr.f32.mxu1 %v745_v48 }
  0xf1   : > { %8159 = vmatmul.mubr.f32.gmra.mxu1 %v9421_v47 }
  0xf2   : > { %8189 = vmatprep.mubr.f32.mxu1 %v687_v9  ;;  %v747_v55 = vand.u32 4294901760, %v746_v52  ;;  %v757_v38 = vand.u32 4294901760, %v756_v50 }
  0xf4   : > { %v748_v39 = vsub.f32 %v746_v52, %v747_v55  ;;  %v758_v29 = vsub.f32 %v756_v50, %v757_v38 }
  0xf5   : > { %8190 = vmatmul.mubr.f32.vlgmr.msra.gmra.mxu1 %v697_v21 }
  0xf6   : > { %8192 = vmatprep.mubr.f32.mxu1 %v707_v59  ;;  %v749_v58 = vand.u32 4294901760, %v748_v39  ;;  %v759_v56 = vand.u32 4294901760, %v758_v29  ;;  %8222 = vmatpush3.msra.mxu1 %v9197_v36 }
  0xf7   : > { %8223 = vmatprep.subr.mxu1 %v9187_v33 }
  0xf8   : > { %8138 = vmatprep.mubr.f32.mxu0 %v749_v58  ;;  %8224 = vmatpush3.msra.mxu1 %v9187_v33  ;;  %v9470_v33 = vld [vmem:[%s10746_s2] ss:$0 sm:$0xff] }
  0xf9   : > { %8139 = vmatmul.mubr.f32.gmra.mxu0 %v759_v56  ;;  %8193 = vmatmul.mubr.f32.gmra.mxu1 %v717_v8 }
  0xfa   : > { %8169 = vmatprep.mubr.f32.mxu0 %v9298_v6  ;;  %8195 = vmatprep.mubr.f32.mxu1 %v727_v53 }
  0xfb   : > { %8225 = vmatprep.subr.mxu1 %v9190_v34  ;;  %1547 = vrot.lane.b32.xlu0 %v9470_v33, %s9060_s6 }
  0xfc   : > { %8226 = vmatpush3.msra.mxu1 %v9190_v34  ;;  %v1544_v34 = vpop.permute.xlu0 %1543 }
  0xfd   : > { %8170 = vmatmul.mubr.f32.vlgmr.msra.gmra.mxu0 %v9315_v20  ;;  %8196 = vmatmul.mubr.f32.gmra.mxu1 %v737_v5  ;;  %v9486_v36 = vand.u32 4294901760, %v1544_v34 }
  0xfe   : > { %8202 = vmatpush3.msra.mxu0 %v9227_v46  ;;  %8172 = vmatprep.mubr.f32.mxu0 %v9352_v57 }
  0xff   : > { %8198 = vmatprep.mubr.f32.mxu1 %v747_v55  ;;  %8203 = vmatprep.subr.mxu0 %v9220_v44 }
 0x100   : > { %8204 = vmatpush3.msra.mxu0 %v9220_v44  ;;  %8227 = vmatprep.subr.mxu1 %v9200_v37  ;;  %v9491_v44 = vsub.f32 %v1544_v34, %v9486_v36 }
 0x101   : > { %8173 = vmatmul.mubr.f32.gmra.mxu0 %v9368_v7  ;;  %8199 = vmatmul.mubr.f32.gmra.mxu1 %v757_v38 }
 0x102   : > { %8175 = vmatprep.mubr.f32.mxu0 %v9389_v49  ;;  %8229 = vmatprep.mubr.f32.mxu1 %v9294_v2  ;;  %v9499_v46 = vand.u32 4294901760, %v9491_v44 }
 0x103   : > { %8205 = vmatprep.subr.mxu0 %v9223_v45  ;;  %8228 = vmatpush3.msra.mxu1 %v9200_v37  ;;  %v9488_v37 = vand.u32 4294901760, %v1542_v35 }
 0x104   : > { %8206 = vmatpush3.msra.mxu0 %v9223_v45 }
 0x105   : > { %8176 = vmatmul.mubr.f32.gmra.mxu0 %v9402_v3  ;;  %8230 = vmatmul.mubr.f32.vlgmr.msra.gmra.mxu1 %v9310_v16  ;;  %v9494_v45 = vsub.f32 %v1542_v35, %v9488_v37 }
 0x106   : > { %8178 = vmatprep.mubr.f32.mxu0 %v746_v52  ;;  %8232 = vmatprep.mubr.f32.mxu1 %v9344_v42 }
 0x107   : > { %8207 = vmatprep.subr.mxu0 %v9237_v51 }
 0x108   : > { %8208 = vmatpush3.msra.mxu0 %v9237_v51  ;;  %v9503_v51 = vand.u32 4294901760, %v9494_v45 }
 0x109   : > { %8179 = vmatmul.mubr.f32.gmra.mxu0 %v756_v50  ;;  %8233 = vmatmul.mubr.f32.gmra.mxu1 %v9365_v1 }
 0x10a   : > { %8209 = vmatprep.mubr.f32.mxu0 %v9294_v2  ;;  %8235 = vmatprep.mubr.f32.mxu1 %v9383_v41  ;;  %v1701_v2 = vsub.f32 %v9491_v44, %v9499_v46  ;;  %v1708_v6 = vsub.f32 %v9494_v45, %v9503_v51 }
 0x10b   : > { %8241 = vmatprep.subr.mxu0 %v9486_v36 }
 0x10c   : > { %v1702_v9 = vand.u32 4294901760, %v1701_v2 }
 0x10d   : > { %8210 = vmatmul.mubr.f32.vlgmr.msra.gmra.mxu0 %v9310_v16  ;;  %8236 = vmatmul.mubr.f32.gmra.mxu1 %v9399_v54  ;;  %v1709_v16 = vand.u32 4294901760, %v1708_v6 }
 0x10e   : > { %8212 = vmatprep.mubr.f32.mxu0 %v9344_v42  ;;  %8238 = vmatprep.mubr.f32.mxu1 %v745_v48 }
 0x10f   : > { %8242 = vmatpush3.msra.mxu0 %v9486_v36  ;;  %8251 = vmatprep.subr.mxu1 %v1702_v9 }
 0x110   : > { %8243 = vmatprep.subr.mxu0 %v9488_v37  ;;  %8252 = vmatpush3.msra.mxu1 %v1702_v9 }
 0x111   : > { %8213 = vmatmul.mubr.f32.gmra.mxu0 %v9365_v1  ;;  %8239 = vmatmul.mubr.f32.gmra.mxu1 %v9421_v47 }
 0x112   : > { %8215 = vmatprep.mubr.f32.mxu0 %v9383_v41  ;;  %8244 = vmatpush3.msra.mxu0 %v9488_v37 }
 0x113   : > { %8261 = vmatprep.subr.mxu0 %v9491_v44  ;;  %8253 = vmatprep.subr.mxu1 %v1709_v16 }
 0x114   : > { %8254 = vmatpush3.msra.mxu1 %v1709_v16 }
 0x115   : > { %8216 = vmatmul.mubr.f32.gmra.mxu0 %v9399_v54  ;;  %8271 = vmatprep.subr.mxu1 %v9486_v36 }
 0x116   : > { %8218 = vmatprep.mubr.f32.mxu0 %v745_v48 }
 0x119   : > { %8219 = vmatmul.mubr.f32.gmra.mxu0 %v9421_v47 }
 0x174   : > { %v8151_v20 = vpop.f32.mrf.mxu1 }
 0x176   : > { %v852_v21 = vpop.f32.mrf.mxu1 }
 0x17c   : > { %v8131_v57 = vpop.f32.mrf.mxu0 }
 0x17d   : > { %v702_v23 = vadd.f32 %v8131_v57, %v9470_v33 }
 0x17e   : > { %v691_v1 = vpop.f32.mrf.mxu0 }
 0x17f   : > { %v692_v26 = vadd.f32 %v9470_v33, %v691_v1  ;;  %v859_v30 = vadd.f32 %v8151_v20, %v702_v23 }
 0x181   : > { %v853_v18 = vadd.f32 %v852_v21, %v692_v26 }
 0x18c   : > { %v8154_v42 = vpop.f32.mrf.mxu1 }
 0x18e   : > { %v864_v59 = vpop.f32.mrf.mxu1 }
 0x194   : > { %v8134_v8 = vpop.f32.mrf.mxu0 }
 0x195   : > { %v722_v19 = vadd.f32 %v8134_v8, %v9470_v33 }
 0x196   : > { %v711_v49 = vpop.f32.mrf.mxu0 }
 0x197   : > { %v712_v28 = vadd.f32 %v9470_v33, %v711_v49  ;;  %v871_v52 = vadd.f32 %v8154_v42, %v722_v19 }
 0x199   : > { %v865_v56 = vadd.f32 %v864_v59, %v712_v28 }
 0x1a4   : > { %v8157_v7 = vpop.f32.mrf.mxu1 }
 0x1a6   : > { %v876_v41 = vpop.f32.mrf.mxu1 }
 0x1ac   : > { %v8137_v54 = vpop.f32.mrf.mxu0 }
 0x1ad   : > { %v742_v55 = vadd.f32 %v8137_v54, %v9470_v33 }
 0x1ae   : > { %v731_v62 = vpop.f32.mrf.mxu0 }
 0x1af   : > { %v732_v38 = vadd.f32 %v9470_v33, %v731_v62  ;;  %v883_v20 = vadd.f32 %v8157_v7, %v742_v55 }
 0x1b1   : > { %v8160_v53 = vpop.f32.mrf.mxu1  ;;  %v877_v21 = vadd.f32 %v876_v41, %v732_v38 }
 0x1b3   : > { %v888_v61 = vpop.f32.mrf.mxu1 }
 0x1b5   : > { %v8191_v43 = vpop.f32.mrf.mxu1 }
 0x1b7   : > { %v1100_v60 = vpop.f32.mrf.mxu1 }
 0x1b9   : > { %v8140_v63 = vpop.f32.mrf.mxu0  ;;  %v8194_v3 = vpop.f32.mrf.mxu1 }
 0x1ba   : > { %v762_v35 = vadd.f32 %v8140_v63, %v9470_v33 }
 0x1bb   : > { %v751_v5 = vpop.f32.mrf.mxu0  ;;  %v1116_v10 = vpop.f32.mrf.mxu1 }
 0x1bc   : > { %v752_v9 = vadd.f32 %v9470_v33, %v751_v5  ;;  %v895_v62 = vadd.f32 %v8160_v53, %v762_v35 }
 0x1bd   : > { %v8171_v11 = vpop.f32.mrf.mxu0  ;;  %v8197_v12 = vpop.f32.mrf.mxu1 }
 0x1be   : > { %v982_v40 = vadd.f32 %v8171_v11, %v859_v30 }
 0x1bf   : > { %v974_v13 = vpop.f32.mrf.mxu0  ;;  %v1132_v14 = vpop.f32.mrf.mxu1 }
 0x1c0   : > { %v975_v50 = vadd.f32 %v974_v13, %v853_v18  ;;  %v1109_v58 = vadd.f32 %v8191_v43, %v982_v40 }
 0x1c1   : > { %v8174_v15 = vpop.f32.mrf.mxu0  ;;  %v9512_v22 = vpop.f32.mrf.mxu1 }
 0x1c2   : > { %v996_v29 = vadd.f32 %v8174_v15, %v871_v52  ;;  %v1101_v6 = vadd.f32 %v1100_v60, %v975_v50  ;;  %v889_v60 = vadd.f32 %v888_v61, %v752_v9 }
 0x1c3   : > { %v988_v24 = vpop.f32.mrf.mxu0  ;;  %v9515_v25 = vpop.f32.mrf.mxu1 }
 0x1c4   : > { %v989_v16 = vadd.f32 %v988_v24, %v865_v56  ;;  %v1125_v8 = vadd.f32 %v8194_v3, %v996_v29 }
 0x1c5   : > { %v8177_v27 = vpop.f32.mrf.mxu0  ;;  %v8231_v4 = vpop.f32.mrf.mxu1 }
 0x1c6   : > { %v1010_v49 = vadd.f32 %v8177_v27, %v883_v20  ;;  %v1117_v15 = vadd.f32 %v1116_v10, %v989_v16 }
 0x1c7   : > { %v1002_v32 = vpop.f32.mrf.mxu0  ;;  %v1356_v17 = vpop.f32.mrf.mxu1 }
 0x1c8   : > { %v1003_v54 = vadd.f32 %v1002_v32, %v877_v21 }
 0x1c9   : > { %v8180_v47 = vpop.f32.mrf.mxu0  ;;  %v8234_v48 = vpop.f32.mrf.mxu1 }
 0x1ca   : > { %v1024_v5 = vadd.f32 %v8180_v47, %v895_v62  ;;  %v1133_v27 = vadd.f32 %v1132_v14, %v1003_v54 }
 0x1cb   : > { %v1016_v39 = vpop.f32.mrf.mxu0  ;;  %v1368_v31 = vpop.f32.mrf.mxu1 }
 0x1cc   : > { %v1017_v19 = vadd.f32 %v1016_v39, %v889_v60  ;;  %v1157_v18 = vadd.f32 %v9512_v22, %v1024_v5 }
 0x1cd   : > { %v8211_v34 = vpop.f32.mrf.mxu0  ;;  %v8237_v43 = vpop.f32.mrf.mxu1 }
 0x1ce   : > { %v1246_v2 = vadd.f32 %v8211_v34, %v1109_v58  ;;  %v1149_v14 = vadd.f32 %v9515_v25, %v1017_v19 }
 0x1cf   : > { %v1239_v42 = vpop.f32.mrf.mxu0  ;;  %v1380_v24 = vpop.f32.mrf.mxu1 }
 0x1d0   : > { %v9524_v57 = vadd.f32 %v8231_v4, %v1246_v2  ;;  %v1240_v1 = vadd.f32 %v1239_v42, %v1101_v6  ;;  %v1141_v4 = vadd.f32 %v8197_v12, %v1010_v49 }
 0x1d1   : > { %v8214_v59 = vpop.f32.mrf.mxu0  ;;  %v8240_v28 = vpop.f32.mrf.mxu1 }
 0x1d2   : > { %v1411_v11 = vmin.f32 %v9524_v57, 0.0  ;;  %v1357_v63 = vadd.f32 %v1356_v17, %v1240_v1  ;;  %v1258_v13 = vadd.f32 %v8214_v59, %v1125_v8  ;;  %vm1403_vm10 = vcmp.gt.f32.partialorder %v9524_v57, 0.0 }
 0x1d3   : > { %v1251_v33 = vpop.f32.mrf.mxu0 }
 0x1d4   : > { %v1420_v7 = vmul.f32 1.442695, %v1411_v11  ;;  %v1410_v41 = vmin.f32 %v1357_v63, 0.0  ;;  %v1375_v23 = vadd.f32 %v8234_v48, %v1258_v13  ;;  %v1252_v26 = vadd.f32 %v1251_v33, %v1117_v15 }
 0x1d5   : > { %v8217_v3 = vpop.f32.mrf.mxu0  ;;  %vm1402_vm11 = vcmp.gt.f32.partialorder %v1357_v63, 0.0 }
 0x1d6   : > { %8972 = vpow2.f32 %v1420_v7  ;;  %v1418_v30 = vmul.f32 1.442695, %v1410_v41  ;;  %v1413_v53 = vmin.f32 %v1375_v23, 0.0  ;;  %v1369_v32 = vadd.f32 %v1368_v31, %v1252_v26  ;;  %v1392_v31 = vpop.f32.mrf.mxu1 }
 0x1d7   : > { %v1270_v40 = vadd.f32 %v8217_v3, %v1141_v4  ;;  %v1263_v17 = vpop.f32.mrf.mxu0  ;;  %vm1405_vm12 = vcmp.gt.f32.partialorder %v1375_v23, 0.0 }
 0x1d8   : > { %8974 = vpow2.f32 %v1418_v30  ;;  %v1424_v61 = vmul.f32 1.442695, %v1413_v53  ;;  %v1264_v10 = vadd.f32 %v1263_v17, %v1133_v27  ;;  %v1412_v47 = vmin.f32 %v1369_v32, 0.0 }
 0x1d9   : > { %v1387_v48 = vadd.f32 %v8237_v43, %v1270_v40  ;;  %v8220_v50 = vpop.f32.mrf.mxu0  ;;  %vm1404_vm13 = vcmp.gt.f32.partialorder %v1369_v32, 0.0 }
 0x1da   : > { %8976 = vpow2.f32 %v1424_v61  ;;  %v1381_v12 = vadd.f32 %v1380_v24, %v1264_v10  ;;  %v1282_v52 = vadd.f32 %v8220_v50, %v1157_v18  ;;  %v1422_v55 = vmul.f32 1.442695, %v1412_v47 }
 0x1db   : > { %v1415_v38 = vmin.f32 %v1387_v48, 0.0  ;;  %v1275_v39 = vpop.f32.mrf.mxu0  ;;  %vm1407_vm14 = vcmp.gt.f32.partialorder %v1387_v48, 0.0 }
 0x1dc   : > { %v1414_v29 = vmin.f32 %v1381_v12, 0.0  ;;  %v1399_v58 = vadd.f32 %v8240_v28, %v1282_v52  ;;  %v1276_v56 = vadd.f32 %v1275_v39, %v1149_v14  ;;  %8978 = vpow2.f32 %v1422_v55 }
 0x1dd   : > { %v1428_v34 = vmul.f32 1.442695, %v1415_v38  ;;  %vm1406_vm15 = vcmp.gt.f32.partialorder %v1381_v12, 0.0 }
 0x1de   : > { %v1426_v35 = vmul.f32 1.442695, %v1414_v29  ;;  %v1417_v22 = vmin.f32 %v1399_v58, 0.0  ;;  %v1393_v2 = vadd.f32 %v1392_v31, %v1276_v56  ;;  %vm1409_vm0 = vcmp.gt.f32.partialorder %v1399_v58, 0.0 }
 0x1df   : > { %8980 = vpow2.f32 %v1428_v34 }
 0x1e0   : > { %8982 = vpow2.f32 %v1426_v35  ;;  %v1432_v6 = vmul.f32 1.442695, %v1417_v22  ;;  %v1416_v9 = vmin.f32 %v1393_v2, 0.0  ;;  %vm1408_vm1 = vcmp.gt.f32.partialorder %v1393_v2, 0.0 }
 0x1e2   : > { %8984 = vpow2.f32 %v1432_v6  ;;  %v1430_v16 = vmul.f32 1.442695, %v1416_v9 }
 0x1e3   : > { %v8973_v20 = vpop.eup %8972 }
 0x1e4   : > { %v7606_v25 = vadd.f32 -1.0, %v8973_v20  ;;  %8986 = vpow2.f32 %v1430_v16 }
 0x1e5   : > { %v8975_v21 = vpop.eup %8974 }
 0x1e6   : > { %v1443_v42 = vsel %vm1403_vm10, %v9524_v57, %v7606_v25  ;;  %v7605_v1 = vadd.f32 -1.0, %v8975_v21 }
 0x1e7   : > { %v8977_v8 = vpop.eup %8976  ;;  %1461 = vst.msk [vmem:[#allocation3 + $0x9] sm:$0xff] %vm549_vm2, %v1443_v42 }
 0x1e8   : > { %v1442_v49 = vsel %vm1402_vm11, %v1357_v63, %v7605_v1  ;;  %v7608_v54 = vadd.f32 -1.0, %v8977_v8 }
 0x1e9   : > { %1460 = vst.msk [vmem:[#allocation3 + $0x1] sm:$0xff] %vm549_vm2, %v1442_v49  ;;  %v8979_v43 = vpop.eup %8978 }
 0x1ea   : > { %v1445_v59 = vsel %vm1405_vm12, %v1375_v23, %v7608_v54  ;;  %v7607_v62 = vadd.f32 -1.0, %v8979_v43 }
 0x1eb   : > { %1463 = vst.msk [vmem:[#allocation3 + $0x19] sm:$0xff] %vm549_vm2, %v1445_v59 }
 0x1ec   : > { %v8981_v11 = vpop.eup %8980  ;;  %v1444_v60 = vsel %vm1404_vm13, %v1369_v32, %v7607_v62  ;;  %vm2231_vm13 = vcmask 261120  }
 0x1ed   : > { %v8983_v13 = vpop.eup %8982  ;;  %v7610_v57 = vadd.f32 -1.0, %v8981_v11  ;;  %1462 = vst.msk [vmem:[#allocation3 + $0x11] sm:$0xff] %vm549_vm2, %v1444_v60 }
 0x1ee   : > { %v7609_v15 = vadd.f32 -1.0, %v8983_v13 }
 0x1ef   : > { %v8985_v33 = vpop.eup %8984  ;;  %v1447_v63 = vsel %vm1407_vm14, %v1387_v48, %v7610_v57  ;;  %vm2275_vm14 = vcmask 392192  }
 0x1f0   : > { %v1468_v5 = vld [vmem:[#allocation3] ss:$2 sm:$0xff]  ;;  %v1476_v7 = vld [vmem:[#allocation3 + $0x1] ss:$2 sm:$0xff]  ;;  %1465 = vst.msk [vmem:[#allocation3 + $0x29] sm:$0xff] %vm549_vm2, %v1447_v63  ;;  %v1446_v41 = vsel %vm1406_vm15, %v1381_v12, %v7609_v15  ;;  %v7612_v26 = vadd.f32 -1.0, %v8985_v33 }
 0x1f1   : > { %v8987_v23 = vpop.eup %8986  ;;  %v1483_v24 = vmax.f32 %v1468_v5, %v1476_v7  ;;  %1464 = vst.msk [vmem:[#allocation3 + $0x21] sm:$0xff] %vm549_vm2, %v1446_v41  ;;  %v1488_v4 = vld [vmem:[#allocation3 + $0x2] ss:$2 sm:$0xff]  ;;  %vm2944_vm15 = vcmask 195712  }
 0x1f2   : > { %v7611_v3 = vadd.f32 -1.0, %v8987_v23  ;;  %v1449_v19 = vsel %vm1409_vm0, %v1399_v58, %v7612_v26 }
 0x1f3   : > { %v1495_v27 = vmax.f32 %v1483_v24, %v1488_v4  ;;  %1467 = vst.msk [vmem:[#allocation3 + $0x39] sm:$0xff] %vm549_vm2, %v1449_v19 }
 0x1f4   : > { %v1448_v30 = vsel %vm1408_vm1, %v1393_v2, %v7611_v3  ;;  %v1470_v53 = vld [vmem:[#allocation3 + $0x10] ss:$2 sm:$0xff]  ;;  %v1478_v32 = vld [vmem:[#allocation3 + $0x11] ss:$2 sm:$0xff] }
 0x1f5   : > { %1499 = vst.msk [vmem:[#allocation5] sm:$0xff] %vm549_vm2, %v1495_v27  ;;  %1466 = vst.msk [vmem:[#allocation3 + $0x31] sm:$0xff] %vm549_vm2, %v1448_v30  ;;  %v1484_v40 = vmax.f32 %v1470_v53, %v1478_v32  ;;  %v1490_v17 = vld [vmem:[#allocation3 + $0x12] ss:$2 sm:$0xff] }
 0x1f7   : > { %v1496_v61 = vmax.f32 %v1484_v40, %v1490_v17 }
 0x1f8   : > { %v1472_v10 = vld [vmem:[#allocation3 + $0x20] ss:$2 sm:$0xff]  ;;  %v1480_v18 = vld [vmem:[#allocation3 + $0x21] ss:$2 sm:$0xff] }
 0x1f9   : > { %v1485_v28 = vmax.f32 %v1472_v10, %v1480_v18  ;;  %1500 = vst.msk [vmem:[#allocation5 + $0x8] sm:$0xff] %vm549_vm2, %v1496_v61  ;;  %v1492_v47 = vld [vmem:[#allocation3 + $0x22] ss:$2 sm:$0xff] }
 0x1fb   : > { %v1497_v48 = vmax.f32 %v1485_v28, %v1492_v47 }
 0x1fc   : > { %v1474_v50 = vld [vmem:[#allocation3 + $0x30] ss:$2 sm:$0xff]  ;;  %v1482_v12 = vld [vmem:[#allocation3 + $0x31] ss:$2 sm:$0xff] }
 0x1fd   : > { %1501 = vst.msk [vmem:[#allocation5 + $0x10] sm:$0xff] %vm549_vm2, %v1497_v48  ;;  %v1486_v52 = vmax.f32 %v1474_v50, %v1482_v12  ;;  %v1503_v14 = vld [vmem:[#allocation5] sm:$0xff]  ;;  %v1548_v12 = vpop.permute.xlu0 %1547 }
 0x1fe   : > { %v1494_v55 = vld [vmem:[#allocation3 + $0x32] ss:$2 sm:$0xff]  ;;  %v1511_v38 = vmin.f32 %v1503_v14, 0.0  ;;  %vm1507_vm3 = vcmp.gt.f32.partialorder %v1503_v14, 0.0 }
 0x1ff   : > { %v1498_v39 = vmax.f32 %v1486_v52, %v1494_v55 }
 0x200   : > { %v1515_v29 = vmul.f32 1.442695, %v1511_v38  ;;  %v1504_v58 = vld [vmem:[#allocation5 + $0x8] sm:$0xff] }
 0x201   : > { %1502 = vst.msk [vmem:[#allocation5 + $0x18] sm:$0xff] %vm549_vm2, %v1498_v39  ;;  %v1512_v56 = vmin.f32 %v1504_v58, 0.0  ;;  %vm1508_vm4 = vcmp.gt.f32.partialorder %v1504_v58, 0.0 }
 0x202   : > { %8988 = vpow2.f32 %v1515_v29 }
 0x203   : > { %v1517_v31 = vmul.f32 1.442695, %v1512_v56 }
 0x204   : > { %v1505_v34 = vld [vmem:[#allocation5 + $0x10] sm:$0xff] }
 0x205   : > { %v1513_v35 = vmin.f32 %v1505_v34, 0.0  ;;  %8990 = vpow2.f32 %v1517_v31  ;;  %vm1509_vm5 = vcmp.gt.f32.partialorder %v1505_v34, 0.0 }
 0x207   : > { %v1519_v22 = vmul.f32 1.442695, %v1513_v35 }
 0x208   : > { %v1506_v2 = vld [vmem:[#allocation5 + $0x18] sm:$0xff] }
 0x209   : > { %8992 = vpow2.f32 %v1519_v22  ;;  %v1514_v6 = vmin.f32 %v1506_v2, 0.0  ;;  %vm1510_vm6 = vcmp.gt.f32.partialorder %v1506_v2, 0.0 }
 0x20b   : > { %v1521_v9 = vmul.f32 1.442695, %v1514_v6 }
 0x20d   : > { %8994 = vpow2.f32 %v1521_v9 }
 0x20f   : > { %v8989_v16 = vpop.eup %8988 }
 0x210   : > { %v7613_v20 = vadd.f32 -1.0, %v8989_v16 }
 0x212   : > { %v1527_v25 = vsel %vm1507_vm3, %v1503_v14, %v7613_v20  ;;  %v8991_v21 = vpop.eup %8990 }
 0x213   : > { %v1551_v42 = vsel %vm549_vm2, %v1527_v25, 0  ;;  %v7614_v8 = vadd.f32 -1.0, %v8991_v21 }
 0x214   : > { %v9544_v1 = vand.u32 4294901760, %v1551_v42 }
 0x215   : > { %v1528_v54 = vsel %vm1508_vm4, %v1504_v58, %v7614_v8 }
 0x216   : > { %v8993_v49 = vpop.eup %8992  ;;  %8255 = vmatprep.mubr.f32.mxu1 %v9544_v1  ;;  %v1630_v43 = vsub.f32 %v1551_v42, %v9544_v1  ;;  %v1554_v59 = vsel %vm549_vm2, %v1528_v54, 0 }
 0x217   : > { %v7615_v62 = vadd.f32 -1.0, %v8993_v49  ;;  %v1639_v11 = vand.u32 4294901760, %v1554_v59 }
 0x218   : > { %v1631_v13 = vand.u32 4294901760, %v1630_v43 }
 0x219   : > { %v1529_v60 = vsel %vm1509_vm5, %v1505_v34, %v7615_v62  ;;  %v1640_v15 = vsub.f32 %v1554_v59, %v1639_v11  ;;  %8256 = vmatmul.mubr.f32.vlgmr.msra.gmra.mxu1 %v1639_v11 }
 0x21a   : > { %v8995_v57 = vpop.eup %8994  ;;  %v1632_v33 = vsub.f32 %v1630_v43, %v1631_v13  ;;  %v1557_v63 = vsel %vm549_vm2, %v1529_v60, 0  ;;  %8272 = vmatpush3.msra.mxu1 %v9486_v36 }
 0x21b   : > { %v1649_v5 = vand.u32 4294901760, %v1557_v63  ;;  %v7616_v7 = vadd.f32 -1.0, %v8995_v57  ;;  %8273 = vmatprep.subr.mxu1 %v9488_v37  ;;  %v1641_v23 = vand.u32 4294901760, %v1640_v15 }
 0x21c   : > { %v1633_v41 = vand.u32 4294901760, %v1632_v33  ;;  %8274 = vmatpush3.msra.mxu1 %v9488_v37 }
 0x21d   : > { %8258 = vmatprep.mubr.f32.mxu1 %v1649_v5  ;;  %v1530_v24 = vsel %vm1510_vm6, %v1506_v2, %v7616_v7  ;;  %v1650_v26 = vsub.f32 %v1557_v63, %v1649_v5  ;;  %8291 = vmatprep.subr.mxu1 %v9486_v36  ;;  %v1642_v4 = vsub.f32 %v1640_v15, %v1641_v23 }
 0x21e   : > { %8245 = vmatprep.mubr.f32.mxu0 %v1633_v41  ;;  %v1560_v3 = vsel %vm549_vm2, %v1530_v24, 0 }
 0x21f   : > { %v1659_v27 = vand.u32 4294901760, %v1560_v3  ;;  %v1651_v19 = vand.u32 4294901760, %v1650_v26  ;;  %v1643_v30 = vand.u32 4294901760, %v1642_v4 }
 0x221   : > { %8259 = vmatmul.mubr.f32.gmra.mxu1 %v1659_v27  ;;  %v1652_v53 = vsub.f32 %v1650_v26, %v1651_v19  ;;  %v1660_v32 = vsub.f32 %v1560_v3, %v1659_v27  ;;  %8246 = vmatmul.mubr.f32.vlgmr.msra.gmra.mxu0 %v1643_v30 }
 0x222   : > { %8275 = vmatprep.mubr.f32.mxu1 %v1631_v13  ;;  %8262 = vmatpush3.msra.mxu0 %v9491_v44  ;;  %v9584_v44 = vld [vmem:[%s10745_s1 + $0x18] sm:$0xff] }
 0x223   : > { %v1653_v40 = vand.u32 4294901760, %v1652_v53  ;;  %v1661_v17 = vand.u32 4294901760, %v1660_v32  ;;  %8263 = vmatprep.subr.mxu0 %v9494_v45 }
 0x224   : > { %8264 = vmatpush3.msra.mxu0 %v9494_v45  ;;  %v9589_v45 = vld [vmem:[%s10745_s1 + $0x10] sm:$0xff] }
 0x225   : > { %8248 = vmatprep.mubr.f32.mxu0 %v1653_v40  ;;  %v1662_v61 = vsub.f32 %v1660_v32, %v1661_v17  ;;  %8281 = vmatprep.subr.mxu0 %v9499_v46 }
 0x226   : > { %8276 = vmatmul.mubr.f32.vlgmr.msra.gmra.mxu1 %v1641_v23 }
 0x227   : > { %8292 = vmatpush3.msra.mxu1 %v9486_v36  ;;  %8278 = vmatprep.mubr.f32.mxu1 %v1651_v19  ;;  %v1663_v10 = vand.u32 4294901760, %v1662_v61  ;;  %v9570_v36 = vld [vmem:[%s10745_s1 + $0x28] sm:$0xff] }
 0x228   : > { %8293 = vmatprep.subr.mxu1 %v9488_v37  ;;  %2264 = vrot.lane.b32.xlu1 %v9570_v36, %s9062_s15 }
 0x229   : > { %8294 = vmatpush3.msra.mxu1 %v9488_v37  ;;  %8249 = vmatmul.mubr.f32.gmra.mxu0 %v1663_v10  ;;  %v9575_v37 = vld [vmem:[%s10745_s1 + $0x20] sm:$0xff] }
 0x22a   : > { %8279 = vmatmul.mubr.f32.gmra.mxu1 %v1661_v17  ;;  %8265 = vmatprep.mubr.f32.mxu0 %v1630_v43 }
 0x22b   : > { %8295 = vmatprep.mubr.f32.mxu1 %v9544_v1  ;;  %2262 = vrot.lane.b32.xlu0 %v9575_v37, %s9062_s15 }
 0x22c   : > { %2260 = vrot.lane.b32.xlu1 %v9584_v44, %s9062_s15 }
 0x22d   : > { %8266 = vmatmul.mubr.f32.vlgmr.msra.gmra.mxu0 %v1640_v15 }
 0x22e   : > { %8282 = vmatpush3.msra.mxu0 %v9499_v46  ;;  %8296 = vmatmul.mubr.f32.vlgmr.msra.gmra.mxu1 %v1639_v11  ;;  %v9598_v46 = vld [vmem:[%s10745_s1 + $0x8] sm:$0xff] }
 0x22f   : > { %8268 = vmatprep.mubr.f32.mxu0 %v1650_v26  ;;  %8283 = vmatprep.subr.mxu0 %v9503_v51 }
 0x230   : > { %8298 = vmatprep.mubr.f32.mxu1 %v1649_v5  ;;  %8284 = vmatpush3.msra.mxu0 %v9503_v51 }
 0x231   : > { %8269 = vmatmul.mubr.f32.gmra.mxu0 %v1660_v32  ;;  %2258 = vrot.lane.b32.xlu0 %v9589_v45, %s9062_s15 }
 0x232   : > { %8299 = vmatmul.mubr.f32.gmra.mxu1 %v1659_v27  ;;  %8285 = vmatprep.mubr.f32.mxu0 %v9544_v1 }
 0x235   : > { %8286 = vmatmul.mubr.f32.vlgmr.msra.gmra.mxu0 %v1639_v11  ;;  %2256 = vrot.lane.b32.xlu0 %v9598_v46, %s9062_s15 }
 0x236   : > { %8288 = vmatprep.mubr.f32.mxu0 %v1649_v5 }
 0x239   : > { %8289 = vmatmul.mubr.f32.gmra.mxu0 %v1659_v27 }
 0x29a   : > { %v2265_v40 = vpop.permute.xlu1 %2264 }
 0x29b   : > { %v9613_v10 = vand.u32 4294901760, %v2265_v40 }
 0x29d   : > { %v2263_v17 = vpop.permute.xlu0 %2262  ;;  %8301 = vmatprep.subr.mxu0 %v9613_v10 }
 0x29e   : > { %8302 = vmatpush3.msra.mxu0 %v9613_v10 }
 0x2d9   : > { %v8257_v51 = vpop.f32.mrf.mxu1 }
 0x2db   : > { %v1746_v18 = vpop.f32.mrf.mxu1 }
 0x2e1   : > { %v8260_v28 = vpop.f32.mrf.mxu1  ;;  %v8247_v47 = vpop.f32.mrf.mxu0 }
 0x2e2   : > { %v1646_v38 = vadd.f32 %v8247_v47, %v1548_v12 }
 0x2e3   : > { %v1758_v48 = vpop.f32.mrf.mxu1  ;;  %v1635_v52 = vpop.f32.mrf.mxu0 }
 0x2e4   : > { %v1636_v58 = vadd.f32 %v1635_v52, %v1548_v12  ;;  %v1753_v35 = vadd.f32 %v8257_v51, %v1646_v38  ;;  %v9615_v51 = vand.u32 4294901760, %v2263_v17 }
 0x2e6   : > { %v8277_v50 = vpop.f32.mrf.mxu1  ;;  %v1747_v6 = vadd.f32 %v1746_v18, %v1636_v58  ;;  %v9622_v47 = vsub.f32 %v2263_v17, %v9615_v51  ;;  %8303 = vmatprep.subr.mxu0 %v9615_v51 }
 0x2e7   : > { %8304 = vmatpush3.msra.mxu0 %v9615_v51 }
 0x2e8   : > { %v1936_v14 = vpop.f32.mrf.mxu1  ;;  %v9645_v58 = vand.u32 4294901760, %v9622_v47 }
 0x2e9   : > { %v8250_v55 = vpop.f32.mrf.mxu0 }
 0x2ea   : > { %v8280_v39 = vpop.f32.mrf.mxu1  ;;  %v1666_v31 = vadd.f32 %v8250_v55, %v1548_v12 }
 0x2eb   : > { %v1655_v29 = vpop.f32.mrf.mxu0 }
 0x2ec   : > { %v1952_v34 = vpop.f32.mrf.mxu1  ;;  %v1656_v9 = vadd.f32 %v1655_v29, %v1548_v12  ;;  %v1765_v21 = vadd.f32 %v8260_v28, %v1666_v31  ;;  %v9619_v28 = vsub.f32 %v2265_v40, %v9613_v10  ;;  %v2259_v12 = vpop.permute.xlu0 %2258  ;;  %v9714_v40 = vld [vmem:[%s10746_s2] ss:$0 sm:$0xff] }
 0x2ed   : > { %v8267_v56 = vpop.f32.mrf.mxu0 }
 0x2ee   : > { %v1848_v2 = vadd.f32 %v8267_v56, %v1753_v35  ;;  %v8297_v20 = vpop.f32.mrf.mxu1  ;;  %v1759_v49 = vadd.f32 %v1758_v48, %v1656_v9  ;;  %v9632_v55 = vand.u32 4294901760, %v9619_v28  ;;  %v2430_v35 = vsub.f32 %v9622_v47, %v9645_v58 }
 0x2ef   : > { %v1840_v22 = vpop.f32.mrf.mxu0 }
 0x2f0   : > { %v1841_v25 = vadd.f32 %v1840_v22, %v1747_v6  ;;  %v1945_v8 = vadd.f32 %v8277_v50, %v1848_v2  ;;  %v2128_v43 = vpop.f32.mrf.mxu1  ;;  %v2261_v50 = vpop.permute.xlu1 %2260  ;;  %v2423_v29 = vsub.f32 %v9619_v28, %v9632_v55  ;;  %v2431_v6 = vand.u32 4294901760, %v2430_v35 }
 0x2f1   : > { %v8270_v16 = vpop.f32.mrf.mxu0  ;;  %v9626_v52 = vand.u32 4294901760, %v2261_v50  ;;  %v2257_v56 = vpop.permute.xlu0 %2256 }
 0x2f2   : > { %v1862_v1 = vadd.f32 %v8270_v16, %v1765_v21  ;;  %v1937_v62 = vadd.f32 %v1936_v14, %v1841_v25  ;;  %v8300_v63 = vpop.f32.mrf.mxu1  ;;  %v9628_v14 = vand.u32 4294901760, %v2259_v12  ;;  %v9648_v31 = vand.u32 4294901760, %v2257_v56 }
 0x2f3   : > { %v1854_v42 = vpop.f32.mrf.mxu0  ;;  %v9636_v38 = vsub.f32 %v2261_v50, %v9626_v52  ;;  %8305 = vmatprep.subr.mxu0 %v9626_v52 }
 0x2f4   : > { %v1855_v11 = vadd.f32 %v1854_v42, %v1759_v49  ;;  %v1961_v15 = vadd.f32 %v8280_v39, %v1862_v1  ;;  %v2140_v19 = vpop.f32.mrf.mxu1  ;;  %v9639_v39 = vsub.f32 %v2259_v12, %v9628_v14  ;;  %8306 = vmatpush3.msra.mxu0 %v9626_v52  ;;  %v9658_v2 = vsub.f32 %v2257_v56, %v9648_v31 }
 0x2f5   : > { %v8287_v54 = vpop.f32.mrf.mxu0  ;;  %8307 = vmatprep.subr.mxu0 %v9628_v14  ;;  %v9654_v22 = vand.u32 4294901760, %v9636_v38 }
 0x2f6   : > { %v2044_v59 = vadd.f32 %v8287_v54, %v1945_v8  ;;  %v1953_v23 = vadd.f32 %v1952_v34, %v1855_v11  ;;  %v2424_v34 = vand.u32 4294901760, %v2423_v29  ;;  %8308 = vmatpush3.msra.mxu0 %v9628_v14  ;;  %v9664_v16 = vand.u32 4294901760, %v9639_v39 }
 0x2f7   : > { %v2037_v13 = vpop.f32.mrf.mxu0  ;;  %v2437_v9 = vsub.f32 %v9636_v38, %v9654_v22  ;;  %8309 = vmatprep.subr.mxu0 %v9648_v31 }
 0x2f8   : > { %v9602_v60 = vadd.f32 %v8297_v20, %v2044_v59  ;;  %v2038_v57 = vadd.f32 %v2037_v13, %v1937_v62  ;;  %8319 = vmatprep.subr.mxu1 %v2424_v34  ;;  %8310 = vmatpush3.msra.mxu0 %v9648_v31  ;;  %v2444_v42 = vsub.f32 %v9639_v39, %v9664_v16 }
 0x2f9   : > { %v8290_v33 = vpop.f32.mrf.mxu0  ;;  %8320 = vmatpush3.msra.mxu1 %v2424_v34  ;;  %v2438_v21 = vand.u32 4294901760, %v2437_v9 }
 0x2fa   : > { %v2155_v5 = vmin.f32 %v9602_v60, 0.0  ;;  %v9605_v7 = vadd.f32 %v2128_v43, %v2038_v57  ;;  %v2056_v41 = vadd.f32 %v8290_v33, %v1961_v15  ;;  %8321 = vmatprep.subr.mxu1 %v2431_v6  ;;  %vm2151_vm8 = vcmp.gt.f32.partialorder %v9602_v60, 0.0 }
 0x2fb   : > { %v2049_v24 = vpop.f32.mrf.mxu0  ;;  %8322 = vmatpush3.msra.mxu1 %v2431_v6  ;;  %v2445_v54 = vand.u32 4294901760, %v2444_v42  ;;  %v9672_v43 = vand.u32 4294901760, %v9658_v2 }
 0x2fc   : > { %v2160_v26 = vmul.f32 1.442695, %v2155_v5  ;;  %v2154_v4 = vmin.f32 %v9605_v7, 0.0  ;;  %v9608_v3 = vadd.f32 %v8300_v63, %v2056_v41  ;;  %v2050_v27 = vadd.f32 %v2049_v24, %v1953_v23  ;;  %8323 = vmatprep.subr.mxu1 %v2438_v21  ;;  %v9690_v41 = vld [vmem:[%s10745_s1] sm:$0xff] }
 0x2fd   : > { %vm2150_vm10 = vcmp.gt.f32.partialorder %v9605_v7, 0.0  ;;  %8324 = vmatpush3.msra.mxu1 %v2438_v21  ;;  %v2451_v13 = vsub.f32 %v9658_v2, %v9672_v43 }
 0x2fe   : > { %8996 = vpow2.f32 %v2160_v26  ;;  %v2158_v30 = vmul.f32 1.442695, %v2154_v4  ;;  %v2157_v53 = vmin.f32 %v9608_v3, 0.0  ;;  %v9611_v32 = vadd.f32 %v2140_v19, %v2050_v27  ;;  %8325 = vmatprep.subr.mxu1 %v2445_v54 }
 0x2ff   : > { %vm2153_vm11 = vcmp.gt.f32.partialorder %v9608_v3, 0.0  ;;  %8326 = vmatpush3.msra.mxu1 %v2445_v54  ;;  %v2452_v33 = vand.u32 4294901760, %v2451_v13 }
 0x300   : > { %8998 = vpow2.f32 %v2158_v30  ;;  %v2164_v61 = vmul.f32 1.442695, %v2157_v53  ;;  %v2156_v18 = vmin.f32 %v9611_v32, 0.0  ;;  %vm2152_vm12 = vcmp.gt.f32.partialorder %v9611_v32, 0.0 }
 0x301   : > { %8327 = vmatprep.subr.mxu1 %v2452_v33 }
 0x302   : > { %9000 = vpow2.f32 %v2164_v61  ;;  %v2162_v48 = vmul.f32 1.442695, %v2156_v18  ;;  %8328 = vmatpush3.msra.mxu1 %v2452_v33 }
 0x304   : > { %9002 = vpow2.f32 %v2162_v48 }
 0x30b   : > { %v8997_v20 = vpop.eup %8996 }
 0x30c   : > { %v7619_v25 = vadd.f32 -1.0, %v8997_v20 }
 0x30d   : > { %v8999_v1 = vpop.eup %8998 }
 0x30e   : > { %v2171_v8 = vsel %vm2151_vm8, %v9602_v60, %v7619_v25  ;;  %v7618_v49 = vadd.f32 -1.0, %v8999_v1 }
 0x30f   : > { %v9001_v59 = vpop.eup %9000  ;;  %2180 = vst.msk [vmem:[#allocation4 + $0x9] sm:$0xff] %vm549_vm2, %v2171_v8 }
 0x310   : > { %v2170_v62 = vsel %vm2150_vm10, %v9605_v7, %v7618_v49  ;;  %v7621_v11 = vadd.f32 -1.0, %v9001_v59 }
 0x311   : > { %2179 = vst.msk [vmem:[#allocation4 + $0x1] sm:$0xff] %vm549_vm2, %v2170_v62  ;;  %v9003_v60 = vpop.eup %9002 }
 0x312   : > { %v2173_v57 = vsel %vm2153_vm11, %v9608_v3, %v7621_v11  ;;  %v7620_v15 = vadd.f32 -1.0, %v9003_v60  ;;  %vm4406_vm11 = vcmask 261312  }
 0x313   : > { %2182 = vst.msk [vmem:[#allocation4 + $0x19] sm:$0xff] %vm549_vm2, %v2173_v57 }
 0x314   : > { %v2172_v63 = vsel %vm2152_vm12, %v9611_v32, %v7620_v15 }
 0x315   : > { %2181 = vst.msk [vmem:[#allocation4 + $0x11] sm:$0xff] %vm549_vm2, %v2172_v63 }
 0x316   : > { %v2188_v5 = vld [vmem:[#allocation4 + $0x9] sm:$0xff] }
 0x317   : > { %2201 = vrot.lane.b32.xlu0 %v2188_v5, %s9057_s22 }
 0x318   : > { %v2187_v7 = vld [vmem:[#allocation4 + $0x1] sm:$0xff] }
 0x319   : > { %2199 = vrot.lane.b32.xlu1 %v2187_v7, %s9057_s22  ;;  %v2191_v23 = vld [vmem:[#allocation4 + $0x2] sm:$0xff] }
 0x31a   : > { %v2183_v24 = vld [vmem:[#allocation4] sm:$0xff]  ;;  %v2184_v19 = vld [vmem:[#allocation4 + $0x8] sm:$0xff] }
 0x31b   : > { %v2190_v26 = vld [vmem:[#allocation4 + $0x19] sm:$0xff]  ;;  %3638 = vst.msk [vmem:[#allocation4] sm:$0xff] %vm549_vm2, %v9053_v0  ;;  %2254 = vrot.lane.b32.xlu0 %v9690_v41, %s9062_s15 }
 0x31c   : > { %v2194_v4 = vld [vmem:[#allocation4 + $0x1a] sm:$0xff]  ;;  %v2192_v3 = vld [vmem:[#allocation4 + $0xa] sm:$0xff]  ;;  %v2193_v30 = vld [vmem:[#allocation4 + $0x12] sm:$0xff] }
 0x31d   : > { %3642 = vst.msk [vmem:[#allocation4 + $0x20] sm:$0x3] %vm1458_vm9, %v9053_v0  ;;  %2215 = vrot.lane.b32.xlu1 %v2191_v23, %s9063_s26  ;;  %v2189_v27 = vld [vmem:[#allocation4 + $0x11] sm:$0xff] }
 0x31e   : > { %3639 = vst.msk [vmem:[#allocation4 + $0x8] sm:$0xff] %vm549_vm2, %v9053_v0  ;;  %v2186_v53 = vld [vmem:[#allocation4 + $0x18] sm:$0xff]  ;;  %v2185_v32 = vld [vmem:[#allocation4 + $0x10] sm:$0xff] }
 0x31f   : > { %2205 = vrot.lane.b32.xlu0 %v2190_v26, %s9057_s22  ;;  %3641 = vst.msk [vmem:[#allocation4 + $0x18] sm:$0xff] %vm549_vm2, %v9053_v0  ;;  %3640 = vst.msk [vmem:[#allocation4 + $0x10] sm:$0xff] %vm549_vm2, %v9053_v0 }
 0x321   : > { %2217 = vrot.lane.b32.xlu1 %v2192_v3, %s9063_s26 }
 0x323   : > { %2221 = vrot.lane.b32.xlu0 %v2194_v4, %s9063_s26 }
 0x325   : > { %2203 = vrot.lane.b32.xlu1 %v2189_v27, %s9057_s22 }
 0x329   : > { %2219 = vrot.lane.b32.xlu1 %v2193_v30, %s9063_s26 }
 0x32d   : > { %2272 = vrot.lane.b32.xlu1 %v9714_v40, %s9062_s15 }
 0x389   : > { %v2202_v17 = vpop.permute.xlu0 %2201 }
 0x38a   : > { %v2228_v20 = vsel %vm549_vm2, %v2184_v19, %v2202_v17 }
 0x38b   : > { %v2200_v61 = vpop.permute.xlu1 %2199 }
 0x38c   : > { %v2227_v50 = vsel %vm549_vm2, %v2183_v24, %v2200_v61 }
 0x38d   : > { %v2255_v18 = vpop.permute.xlu0 %2254 }
 0x38e   : > { %v9718_v48 = vand.u32 4294901760, %v2255_v18 }
 0x38f   : > { %v2216_v12 = vpop.permute.xlu1 %2215 }
 0x390   : > { %v9722_v29 = vsub.f32 %v2255_v18, %v9718_v48  ;;  %v2232_v56 = vsel %vm2231_vm13, %v2227_v50, %v2216_v12  ;;  %8311 = vmatprep.subr.mxu0 %v9718_v48 }
 0x391   : > { %v2277_v34 = vsel %vm2275_vm14, %v2232_v56, 0  ;;  %8312 = vmatpush3.msra.mxu0 %v9718_v48  ;;  %v2206_v35 = vpop.permute.xlu0 %2205 }
 0x392   : > { %v9728_v6 = vand.u32 4294901760, %v2277_v34  ;;  %8337 = vmatprep.subr.mxu0 %v9619_v28  ;;  %v9732_v9 = vand.u32 4294901760, %v9722_v29  ;;  %v2230_v8 = vsel %vm549_vm2, %v2186_v53, %v2206_v35 }
 0x393   : > { %v2218_v25 = vpop.permute.xlu1 %2217 }
 0x394   : > { %v9736_v21 = vsub.f32 %v2277_v34, %v9728_v6  ;;  %v2233_v42 = vsel %vm2231_vm13, %v2228_v20, %v2218_v25  ;;  %8331 = vmatprep.mubr.f32.mxu1 %v9728_v6  ;;  %v2458_v1 = vsub.f32 %v9722_v29, %v9732_v9 }
 0x395   : > { %v2280_v49 = vsel %vm2275_vm14, %v2233_v42, 0  ;;  %v2222_v54 = vpop.permute.xlu0 %2221 }
 0x396   : > { %v9744_v59 = vand.u32 4294901760, %v2280_v49  ;;  %v2235_v62 = vsel %vm2231_vm13, %v2230_v8, %v2222_v54  ;;  %v2459_v11 = vand.u32 4294901760, %v2458_v1  ;;  %v2361_v13 = vand.u32 4294901760, %v9736_v21 }
 0x397   : > { %v2286_v60 = vsel %vm2275_vm14, %v2235_v62, 0  ;;  %v2204_v57 = vpop.permute.xlu1 %2203 }
 0x398   : > { %v9750_v15 = vsub.f32 %v2280_v49, %v9744_v59  ;;  %8329 = vmatprep.subr.mxu1 %v2459_v11  ;;  %v2362_v33 = vsub.f32 %v9736_v21, %v2361_v13  ;;  %v9754_v5 = vand.u32 4294901760, %v2286_v60  ;;  %v2229_v23 = vsel %vm549_vm2, %v2185_v32, %v2204_v57 }
 0x399   : > { %8330 = vmatpush3.msra.mxu1 %v2459_v11 }
 0x39a   : > { %v2371_v63 = vand.u32 4294901760, %v9750_v15  ;;  %8332 = vmatmul.mubr.f32.vlgmr.msra.gmra.mxu1 %v9744_v59  ;;  %8355 = vmatprep.subr.mxu1 %v9613_v10  ;;  %v2363_v7 = vand.u32 4294901760, %v2362_v33  ;;  %v2390_v19 = vsub.f32 %v2286_v60, %v9754_v5 }
 0x39b   : > { %v2220_v24 = vpop.permute.xlu1 %2219  ;;  %8356 = vmatpush3.msra.mxu1 %v9613_v10 }
 0x39c   : > { %v2372_v26 = vsub.f32 %v9750_v15, %v2371_v63  ;;  %v2234_v4 = vsel %vm2231_vm13, %v2229_v23, %v2220_v24  ;;  %8313 = vmatprep.mubr.f32.mxu0 %v2363_v7  ;;  %8357 = vmatprep.subr.mxu1 %v9615_v51  ;;  %v2391_v17 = vand.u32 4294901760, %v2390_v19 }
 0x39d   : > { %v2283_v3 = vsel %vm2275_vm14, %v2234_v4, 0  ;;  %8358 = vmatpush3.msra.mxu1 %v9615_v51 }
 0x39e   : > { %v2373_v27 = vand.u32 4294901760, %v2372_v26  ;;  %v9766_v30 = vand.u32 4294901760, %v2283_v3  ;;  %8359 = vmatprep.subr.mxu1 %v9626_v52 }
 0x39f   : > { %8360 = vmatpush3.msra.mxu1 %v9626_v52 }
 0x3a0   : > { %v2380_v53 = vsub.f32 %v2283_v3, %v9766_v30  ;;  %8314 = vmatmul.mubr.f32.vlgmr.msra.gmra.mxu0 %v2373_v27  ;;  %8334 = vmatprep.mubr.f32.mxu1 %v9766_v30 }
 0x3a1   : > { %8338 = vmatpush3.msra.mxu0 %v9619_v28  ;;  %8361 = vmatprep.subr.mxu1 %v9628_v14  ;;  %v2392_v28 = vsub.f32 %v2390_v19, %v2391_v17 }
 0x3a2   : > { %8335 = vmatmul.mubr.f32.gmra.mxu1 %v9754_v5  ;;  %8339 = vmatprep.subr.mxu0 %v9622_v47  ;;  %v2381_v32 = vand.u32 4294901760, %v2380_v53 }
 0x3a3   : > { %8362 = vmatpush3.msra.mxu1 %v9628_v14  ;;  %8340 = vmatpush3.msra.mxu0 %v9622_v47  ;;  %v2393_v47 = vand.u32 4294901760, %v2392_v28 }
 0x3a4   : > { %8363 = vmatprep.subr.mxu1 %v9648_v31  ;;  %8367 = vmatprep.mubr.f32.mxu1 %v2361_v13  ;;  %v2382_v61 = vsub.f32 %v2380_v53, %v2381_v32 }
 0x3a5   : > { %8341 = vmatprep.subr.mxu0 %v9636_v38  ;;  %8364 = vmatpush3.msra.mxu1 %v9648_v31 }
 0x3a6   : > { %8342 = vmatpush3.msra.mxu0 %v9636_v38  ;;  %8365 = vmatprep.subr.mxu1 %v9718_v48  ;;  %v2383_v18 = vand.u32 4294901760, %v2382_v61 }
 0x3a7   : > { %8343 = vmatprep.subr.mxu0 %v9639_v39  ;;  %8366 = vmatpush3.msra.mxu1 %v9718_v48 }
 0x3a8   : > { %8344 = vmatpush3.msra.mxu0 %v9639_v39  ;;  %8368 = vmatmul.mubr.f32.vlgmr.msra.gmra.mxu1 %v2371_v63 }
 0x3a9   : > { %8391 = vmatprep.subr.mxu1 %v9613_v10  ;;  %8345 = vmatprep.subr.mxu0 %v9658_v2 }
 0x3aa   : > { %8370 = vmatprep.mubr.f32.mxu1 %v2381_v32  ;;  %8392 = vmatpush3.msra.mxu1 %v9613_v10 }
 0x3ab   : > { %8316 = vmatprep.mubr.f32.mxu0 %v2383_v18  ;;  %8346 = vmatpush3.msra.mxu0 %v9658_v2 }
 0x3ac   : > { %8393 = vmatprep.subr.mxu1 %v9615_v51  ;;  %8317 = vmatmul.mubr.f32.gmra.mxu0 %v2393_v47 }
 0x3ad   : > { %8347 = vmatprep.subr.mxu0 %v9722_v29  ;;  %8394 = vmatpush3.msra.mxu1 %v9615_v51 }
 0x3ae   : > { %8348 = vmatpush3.msra.mxu0 %v9722_v29  ;;  %8349 = vmatprep.mubr.f32.mxu0 %v9736_v21 }
 0x3af   : > { %8371 = vmatmul.mubr.f32.gmra.mxu1 %v2391_v17  ;;  %8395 = vmatprep.subr.mxu1 %v9626_v52 }
 0x3b0   : > { %8373 = vmatprep.subr.mxu0 %v9632_v55  ;;  %8396 = vmatpush3.msra.mxu1 %v9626_v52 }
 0x3b1   : > { %8403 = vmatprep.mubr.f32.mxu1 %v9728_v6  ;;  %8397 = vmatprep.subr.mxu1 %v9628_v14 }
 0x3b2   : > { %8350 = vmatmul.mubr.f32.vlgmr.msra.gmra.mxu0 %v9750_v15  ;;  %8398 = vmatpush3.msra.mxu1 %v9628_v14 }
 0x3b3   : > { %8374 = vmatpush3.msra.mxu0 %v9632_v55  ;;  %8352 = vmatprep.mubr.f32.mxu0 %v2380_v53 }
 0x3b4   : > { %8375 = vmatprep.subr.mxu0 %v9645_v58  ;;  %8399 = vmatprep.subr.mxu1 %v9648_v31 }
 0x3b5   : > { %8376 = vmatpush3.msra.mxu0 %v9645_v58  ;;  %8400 = vmatpush3.msra.mxu1 %v9648_v31 }
 0x3b6   : > { %8377 = vmatprep.subr.mxu0 %v9654_v22  ;;  %8401 = vmatprep.subr.mxu1 %v9718_v48 }
 0x3b7   : > { %8353 = vmatmul.mubr.f32.gmra.mxu0 %v2390_v19  ;;  %8402 = vmatpush3.msra.mxu1 %v9718_v48 }
 0x3b8   : > { %8378 = vmatpush3.msra.mxu0 %v9654_v22  ;;  %8385 = vmatprep.mubr.f32.mxu0 %v9728_v6  ;;  %v2273_v22 = vpop.permute.xlu1 %2272 }
 0x3b9   : > { %8379 = vmatprep.subr.mxu0 %v9664_v16  ;;  %8404 = vmatmul.mubr.f32.vlgmr.msra.gmra.mxu1 %v9744_v59 }
 0x3ba   : > { %8380 = vmatpush3.msra.mxu0 %v9664_v16  ;;  %8406 = vmatprep.mubr.f32.mxu1 %v9766_v30 }
 0x3bb   : > { %8381 = vmatprep.subr.mxu0 %v9672_v43 }
 0x3bc   : > { %8382 = vmatpush3.msra.mxu0 %v9672_v43 }
 0x3bd   : > { %8383 = vmatprep.subr.mxu0 %v9732_v9  ;;  %8407 = vmatmul.mubr.f32.gmra.mxu1 %v9754_v5 }
 0x3be   : > { %8384 = vmatpush3.msra.mxu0 %v9732_v9 }
 0x3bf   : > { %8386 = vmatmul.mubr.f32.vlgmr.msra.gmra.mxu0 %v9744_v59 }
 0x3c0   : > { %8388 = vmatprep.mubr.f32.mxu0 %v9766_v30 }
 0x3c3   : > { %8389 = vmatmul.mubr.f32.gmra.mxu0 %v9754_v5 }
 0x45a   : > { %v8333_v10 = vpop.f32.mrf.mxu1 }
 0x45c   : > { %v2496_v51 = vpop.f32.mrf.mxu1 }
 0x460   : > { %v8315_v14 = vpop.f32.mrf.mxu0 }
 0x461   : > { %v2376_v43 = vadd.f32 %v8315_v14, %v2273_v22 }
 0x462   : > { %v8336_v52 = vpop.f32.mrf.mxu1  ;;  %v2365_v38 = vpop.f32.mrf.mxu0 }
 0x463   : > { %v2366_v12 = vadd.f32 %v2365_v38, %v2273_v22  ;;  %v2503_v56 = vadd.f32 %v8333_v10, %v2376_v43 }
 0x464   : > { %v2508_v55 = vpop.f32.mrf.mxu1 }
 0x465   : > { %v2497_v20 = vadd.f32 %v2496_v51, %v2366_v12 }
 0x468   : > { %v8369_v58 = vpop.f32.mrf.mxu1 }
 0x46a   : > { %v2698_v2 = vpop.f32.mrf.mxu1 }
 0x46c   : > { %v8318_v39 = vpop.f32.mrf.mxu0 }
 0x46d   : > { %v2396_v29 = vadd.f32 %v8318_v39, %v2273_v22 }
 0x46e   : > { %v2385_v31 = vpop.f32.mrf.mxu0 }
 0x46f   : > { %v8372_v48 = vpop.f32.mrf.mxu1  ;;  %v2386_v6 = vadd.f32 %v2385_v31, %v2273_v22  ;;  %v2515_v42 = vadd.f32 %v8336_v52, %v2396_v29 }
 0x471   : > { %v2714_v34 = vpop.f32.mrf.mxu1  ;;  %v2509_v49 = vadd.f32 %v2508_v55, %v2386_v6 }
 0x472   : > { %v8351_v16 = vpop.f32.mrf.mxu0 }
 0x473   : > { %v2606_v9 = vadd.f32 %v8351_v16, %v2503_v56 }
 0x474   : > { %v2598_v50 = vpop.f32.mrf.mxu0 }
 0x475   : > { %v2599_v21 = vadd.f32 %v2598_v50, %v2497_v20  ;;  %v2707_v54 = vadd.f32 %v8369_v58, %v2606_v9 }
 0x477   : > { %v8354_v35 = vpop.f32.mrf.mxu0  ;;  %v2699_v60 = vadd.f32 %v2698_v2, %v2599_v21 }
 0x478   : > { %v2620_v8 = vadd.f32 %v8354_v35, %v2515_v42 }
 0x479   : > { %v8405_v25 = vpop.f32.mrf.mxu1  ;;  %v2612_v1 = vpop.f32.mrf.mxu0 }
 0x47a   : > { %v2613_v11 = vadd.f32 %v2612_v1, %v2509_v49  ;;  %v2723_v63 = vadd.f32 %v8372_v48, %v2620_v8 }
 0x47b   : > { %v2906_v59 = vpop.f32.mrf.mxu1 }
 0x47c   : > { %v2715_v26 = vadd.f32 %v2714_v34, %v2613_v11 }
 0x47d   : > { %v8408_v5 = vpop.f32.mrf.mxu1 }
 0x47f   : > { %v8387_v62 = vpop.f32.mrf.mxu0  ;;  %v2918_v19 = vpop.f32.mrf.mxu1 }
 0x480   : > { %v2818_v13 = vadd.f32 %v8387_v62, %v2707_v54 }
 0x481   : > { %v2811_v57 = vpop.f32.mrf.mxu0 }
 0x482   : > { %v2913_v15 = vadd.f32 %v8405_v25, %v2818_v13  ;;  %v2812_v33 = vadd.f32 %v2811_v57, %v2699_v60 }
 0x483   : > { %v8390_v7 = vpop.f32.mrf.mxu0 }
 0x484   : > { %v2907_v23 = vadd.f32 %v2906_v59, %v2812_v33  ;;  %v2830_v24 = vadd.f32 %v8390_v7, %v2723_v63  ;;  %2934 = vrot.lane.b32.xlu1 %v2913_v15, %s9057_s22 }
 0x485   : > { %v2823_v4 = vpop.f32.mrf.mxu0 }
 0x486   : > { %v2925_v3 = vadd.f32 %v8408_v5, %v2830_v24  ;;  %v2824_v27 = vadd.f32 %v2823_v4, %v2715_v26  ;;  %2932 = vrot.lane.b32.xlu0 %v2907_v23, %s9057_s22 }
 0x488   : > { %v2919_v30 = vadd.f32 %v2918_v19, %v2824_v27  ;;  %2938 = vrot.lane.b32.xlu1 %v2925_v3, %s9057_s22 }
 0x48a   : > { %2936 = vrot.lane.b32.xlu0 %v2919_v30, %s9057_s22 }
 0x48c   : > { %2991 = vrot.lane.b32.xlu1 %v9598_v46, %s9064_s29 }
 0x48e   : > { %2993 = vrot.lane.b32.xlu0 %v9589_v45, %s9064_s29 }
 0x490   : > { %2998 = vrot.lane.b32.xlu1 %v9714_v40, %s9064_s29 }
 0x492   : > { %2989 = vrot.lane.b32.xlu0 %v9690_v41, %s9064_s29 }
 0x494   : > { %3725 = vrot.lane.b32.xlu1 %v9575_v37, %s9065_s30 }
 0x496   : > { %3727 = vrot.lane.b32.xlu0 %v9570_v36, %s9065_s30 }
 0x498   : > { %3721 = vrot.lane.b32.xlu1 %v9589_v45, %s9065_s30 }
 0x49a   : > { %3723 = vrot.lane.b32.xlu0 %v9584_v44, %s9065_s30 }
 0x49c   : > { %3719 = vrot.lane.b32.xlu1 %v9598_v46, %s9065_s30 }
 0x4f6   : > { %v2935_v53 = vpop.permute.xlu1 %2934 }
 0x4f7   : > { %2946 = vst.msk [vmem:[#allocation5 + $0x8] sm:$0xff] %vm2944_vm15, %v2935_v53 }
 0x4f8   : > { %v2933_v32 = vpop.permute.xlu0 %2932 }
 0x4f9   : > { %2945 = vst.msk [vmem:[#allocation5] sm:$0xff] %vm2944_vm15, %v2933_v32 }
 0x4fa   : > { %v2939_v17 = vpop.permute.xlu1 %2938 }
 0x4fb   : > { %2948 = vst.msk [vmem:[#allocation5 + $0x18] sm:$0xff] %vm2944_vm15, %v2939_v17 }
 0x4fc   : > { %v2937_v61 = vpop.permute.xlu0 %2936 }
 0x4fd   : > { %2947 = vst.msk [vmem:[#allocation5 + $0x10] sm:$0xff] %vm2944_vm15, %v2937_v61 }
 0x4fe   : > { %v2992_v28 = vpop.permute.xlu1 %2991  ;;  %v2950_v18 = vld [vmem:[#allocation5 + $0x8] sm:$0xff] }
 0x4ff   : > { %v9836_v47 = vand.u32 4294901760, %v2992_v28  ;;  %v2958_v10 = vmin.f32 %v2950_v18, 0.0  ;;  %vm2954_vm0 = vcmp.gt.f32.partialorder %v2950_v18, 0.0 }
 0x500   : > { %v2994_v51 = vpop.permute.xlu0 %2993  ;;  %v2949_v52 = vld [vmem:[#allocation5] sm:$0xff] }
 0x501   : > { %v9838_v14 = vand.u32 4294901760, %v2994_v51  ;;  %v9841_v55 = vsub.f32 %v2992_v28, %v9836_v47  ;;  %v2957_v38 = vmin.f32 %v2949_v52, 0.0  ;;  %v2963_v39 = vmul.f32 1.442695, %v2958_v10 }
 0x502   : > { %v2952_v58 = vld [vmem:[#allocation5 + $0x18] sm:$0xff]  ;;  %vm2953_vm1 = vcmp.gt.f32.partialorder %v2949_v52, 0.0 }
 0x503   : > { %v9844_v31 = vsub.f32 %v2994_v51, %v9838_v14  ;;  %8409 = vmatprep.subr.mxu0 %v9838_v14  ;;  %v9848_v22 = vand.u32 4294901760, %v9841_v55  ;;  %v2961_v2 = vmul.f32 1.442695, %v2957_v38  ;;  %9004 = vpow2.f32 %v2963_v39 }
 0x504   : > { %v2990_v16 = vpop.permute.xlu0 %2989  ;;  %8410 = vmatpush3.msra.mxu0 %v9838_v14  ;;  %v2951_v43 = vld [vmem:[#allocation5 + $0x10] sm:$0xff]  ;;  %v2960_v48 = vmin.f32 %v2952_v58, 0.0  ;;  %vm2956_vm3 = vcmp.gt.f32.partialorder %v2952_v58, 0.0 }
 0x505   : > { %v9851_v50 = vand.u32 4294901760, %v2990_v16  ;;  %v9854_v12 = vand.u32 4294901760, %v9844_v31  ;;  %8411 = vmatprep.subr.mxu0 %v9836_v47  ;;  %v3158_v29 = vsub.f32 %v9841_v55, %v9848_v22  ;;  %9006 = vpow2.f32 %v2961_v2 }
 0x506   : > { %8412 = vmatpush3.msra.mxu0 %v9836_v47  ;;  %v2959_v56 = vmin.f32 %v2951_v43, 0.0  ;;  %v2967_v34 = vmul.f32 1.442695, %v2960_v48  ;;  %vm2955_vm4 = vcmp.gt.f32.partialorder %v2951_v43, 0.0 }
 0x507   : > { %v9861_v35 = vsub.f32 %v2990_v16, %v9851_v50  ;;  %v3151_v6 = vsub.f32 %v9844_v31, %v9854_v12  ;;  %8413 = vmatprep.subr.mxu0 %v9851_v50  ;;  %v3159_v25 = vand.u32 4294901760, %v3158_v29 }
 0x508   : > { %8414 = vmatpush3.msra.mxu0 %v9851_v50  ;;  %v2965_v9 = vmul.f32 1.442695, %v2959_v56  ;;  %9008 = vpow2.f32 %v2967_v34 }
 0x509   : > { %v3152_v20 = vand.u32 4294901760, %v3151_v6  ;;  %v9868_v21 = vand.u32 4294901760, %v9861_v35  ;;  %8433 = vmatprep.subr.mxu0 %v9844_v31 }
 0x50a   : > { %9010 = vpow2.f32 %v2965_v9 }
 0x50b   : > { %8421 = vmatprep.subr.mxu1 %v3152_v20  ;;  %v3165_v42 = vsub.f32 %v9861_v35, %v9868_v21 }
 0x50c   : > { %8422 = vmatpush3.msra.mxu1 %v3152_v20 }
 0x50d   : > { %8423 = vmatprep.subr.mxu1 %v3159_v25  ;;  %v3166_v1 = vand.u32 4294901760, %v3165_v42 }
 0x50e   : > { %8424 = vmatpush3.msra.mxu1 %v3159_v25 }
 0x50f   : > { %8425 = vmatprep.subr.mxu1 %v3166_v1 }
 0x510   : > { %8426 = vmatpush3.msra.mxu1 %v3166_v1  ;;  %v9005_v8 = vpop.eup %9004 }
 0x511   : > { %8445 = vmatprep.subr.mxu1 %v9838_v14  ;;  %v7624_v54 = vadd.f32 -1.0, %v9005_v8 }
 0x512   : > { %v9007_v49 = vpop.eup %9006 }
 0x513   : > { %v7623_v59 = vadd.f32 -1.0, %v9007_v49  ;;  %v2974_v62 = vsel %vm2954_vm0, %v2950_v18, %v7624_v54 }
 0x514   : > { %v3005_v60 = vsel %vm567_vm7, %v2974_v62, 0 }
 0x515   : > { %v9009_v11 = vpop.eup %9008  ;;  %v2973_v13 = vsel %vm2953_vm1, %v2949_v52, %v7623_v59  ;;  %v9876_v15 = vand.u32 4294901760, %v3005_v60 }
 0x516   : > { %v3002_v57 = vsel %vm567_vm7, %v2973_v13, 0  ;;  %v7626_v33 = vadd.f32 -1.0, %v9009_v11 }
 0x517   : > { %v9011_v63 = vpop.eup %9010  ;;  %v9878_v5 = vand.u32 4294901760, %v3002_v57  ;;  %v3092_v7 = vsub.f32 %v3005_v60, %v9876_v15 }
 0x518   : > { %v7625_v23 = vadd.f32 -1.0, %v9011_v63  ;;  %v2976_v24 = vsel %vm2956_vm3, %v2952_v58, %v7626_v33 }
 0x519   : > { %8427 = vmatprep.mubr.f32.mxu1 %v9878_v5  ;;  %v3011_v26 = vsel %vm567_vm7, %v2976_v24, 0  ;;  %v3082_v4 = vsub.f32 %v3002_v57, %v9878_v5  ;;  %v3093_v19 = vand.u32 4294901760, %v3092_v7 }
 0x51a   : > { %8428 = vmatmul.mubr.f32.vlgmr.msra.gmra.mxu1 %v9876_v15  ;;  %v2975_v3 = vsel %vm2955_vm4, %v2951_v43, %v7625_v23  ;;  %v3111_v27 = vand.u32 4294901760, %v3011_v26 }
 0x51b   : > { %8446 = vmatpush3.msra.mxu1 %v9838_v14  ;;  %v3008_v30 = vsel %vm567_vm7, %v2975_v3, 0  ;;  %v3083_v53 = vand.u32 4294901760, %v3082_v4  ;;  %v3094_v17 = vsub.f32 %v3092_v7, %v3093_v19 }
 0x51c   : > { %8447 = vmatprep.subr.mxu1 %v9836_v47  ;;  %v3101_v32 = vand.u32 4294901760, %v3008_v30  ;;  %v3112_v61 = vsub.f32 %v3011_v26, %v3111_v27 }
 0x51d   : > { %8448 = vmatpush3.msra.mxu1 %v9836_v47  ;;  %v3084_v28 = vsub.f32 %v3082_v4, %v3083_v53  ;;  %v3095_v52 = vand.u32 4294901760, %v3094_v17 }
 0x51e   : > { %8430 = vmatprep.mubr.f32.mxu1 %v3101_v32  ;;  %8449 = vmatprep.subr.mxu1 %v9851_v50  ;;  %v3102_v18 = vsub.f32 %v3008_v30, %v3101_v32  ;;  %v3113_v10 = vand.u32 4294901760, %v3112_v61 }
 0x51f   : > { %8431 = vmatmul.mubr.f32.gmra.mxu1 %v3111_v27  ;;  %v3085_v51 = vand.u32 4294901760, %v3084_v28 }
 0x520   : > { %8450 = vmatpush3.msra.mxu1 %v9851_v50  ;;  %8451 = vmatprep.mubr.f32.mxu1 %v3083_v53  ;;  %v3103_v38 = vand.u32 4294901760, %v3102_v18  ;;  %v3114_v58 = vsub.f32 %v3112_v61, %v3113_v10 }
 0x521   : > { %8469 = vmatprep.subr.mxu1 %v9838_v14  ;;  %8415 = vmatprep.mubr.f32.mxu0 %v3085_v51 }
 0x522   : > { %8416 = vmatmul.mubr.f32.vlgmr.msra.gmra.mxu0 %v3095_v52  ;;  %v3104_v39 = vsub.f32 %v3102_v18, %v3103_v38  ;;  %v3115_v16 = vand.u32 4294901760, %v3114_v58  ;;  %v3728_v52 = vpop.permute.xlu0 %3727 }
 0x523   : > { %8434 = vmatpush3.msra.mxu0 %v9844_v31  ;;  %8452 = vmatmul.mubr.f32.vlgmr.msra.gmra.mxu1 %v3093_v19  ;;  %v9935_v58 = vand.u32 4294901760, %v3728_v52 }
 0x524   : > { %8470 = vmatpush3.msra.mxu1 %v9838_v14  ;;  %8435 = vmatprep.subr.mxu0 %v9841_v55  ;;  %v3105_v2 = vand.u32 4294901760, %v3104_v39 }
 0x525   : > { %8454 = vmatprep.mubr.f32.mxu1 %v3103_v38  ;;  %8471 = vmatprep.subr.mxu1 %v9836_v47 }
 0x526   : > { %8436 = vmatpush3.msra.mxu0 %v9841_v55  ;;  %8472 = vmatpush3.msra.mxu1 %v9836_v47 }
 0x527   : > { %8418 = vmatprep.mubr.f32.mxu0 %v3105_v2  ;;  %8437 = vmatprep.subr.mxu0 %v9861_v35 }
 0x528   : > { %8473 = vmatprep.subr.mxu1 %v9851_v50  ;;  %8419 = vmatmul.mubr.f32.gmra.mxu0 %v3115_v16 }
 0x529   : > { %8438 = vmatpush3.msra.mxu0 %v9861_v35  ;;  %8455 = vmatmul.mubr.f32.gmra.mxu1 %v3113_v10 }
 0x52a   : > { %8474 = vmatpush3.msra.mxu1 %v9851_v50  ;;  %8439 = vmatprep.mubr.f32.mxu0 %v3082_v4  ;;  %v2999_v50 = vpop.permute.xlu1 %2998 }
 0x52b   : > { %8457 = vmatprep.subr.mxu0 %v9854_v12  ;;  %8475 = vmatprep.mubr.f32.mxu1 %v9878_v5 }
 0x52c   : > { %8440 = vmatmul.mubr.f32.vlgmr.msra.gmra.mxu0 %v3092_v7 }
 0x52d   : > { %8458 = vmatpush3.msra.mxu0 %v9854_v12  ;;  %8476 = vmatmul.mubr.f32.vlgmr.msra.gmra.mxu1 %v9876_v15 }
 0x52e   : > { %8442 = vmatprep.mubr.f32.mxu0 %v3102_v18  ;;  %8459 = vmatprep.subr.mxu0 %v9848_v22  ;;  %v3726_v51 = vpop.permute.xlu1 %3725 }
 0x52f   : > { %8478 = vmatprep.mubr.f32.mxu1 %v3101_v32  ;;  %8460 = vmatpush3.msra.mxu0 %v9848_v22  ;;  %v9933_v39 = vand.u32 4294901760, %v3726_v51 }
 0x530   : > { %8461 = vmatprep.subr.mxu0 %v9868_v21  ;;  %8443 = vmatmul.mubr.f32.gmra.mxu0 %v3112_v61 }
 0x531   : > { %8462 = vmatpush3.msra.mxu0 %v9868_v21  ;;  %8479 = vmatmul.mubr.f32.gmra.mxu1 %v3111_v27  ;;  %v9939_v16 = vsub.f32 %v3726_v51, %v9933_v39 }
 0x532   : > { %8463 = vmatprep.mubr.f32.mxu0 %v9878_v5  ;;  %8481 = vmatprep.subr.mxu0 %v9935_v58 }
 0x534   : > { %8464 = vmatmul.mubr.f32.vlgmr.msra.gmra.mxu0 %v9876_v15 }
 0x535   : > { %8466 = vmatprep.mubr.f32.mxu0 %v3101_v32  ;;  %8482 = vmatpush3.msra.mxu0 %v9935_v58 }
 0x536   : > { %8483 = vmatprep.subr.mxu0 %v9933_v39 }
 0x537   : > { %8484 = vmatpush3.msra.mxu0 %v9933_v39 }
 0x538   : > { %8467 = vmatmul.mubr.f32.gmra.mxu0 %v3111_v27 }
 0x5da   : > { %v8429_v47 = vpop.f32.mrf.mxu1 }
 0x5dc   : > { %v3203_v14 = vpop.f32.mrf.mxu1 }
 0x5df   : > { %v8432_v55 = vpop.f32.mrf.mxu1 }
 0x5e1   : > { %v3215_v31 = vpop.f32.mrf.mxu1 }
 0x5e2   : > { %v8417_v22 = vpop.f32.mrf.mxu0 }
 0x5e3   : > { %v8453_v43 = vpop.f32.mrf.mxu1  ;;  %v3098_v36 = vadd.f32 %v8417_v22, %v2999_v50 }
 0x5e4   : > { %v3087_v48 = vpop.f32.mrf.mxu0 }
 0x5e5   : > { %v3396_v37 = vpop.f32.mrf.mxu1  ;;  %v3088_v45 = vadd.f32 %v3087_v48, %v2999_v50  ;;  %v3210_v6 = vadd.f32 %v8429_v47, %v3098_v36  ;;  %v9942_v47 = vsub.f32 %v3728_v52, %v9935_v58  ;;  %v9965_v36 = vand.u32 4294901760, %v9939_v16 }
 0x5e7   : > { %v3204_v20 = vadd.f32 %v3203_v14, %v3088_v45  ;;  %v9952_v48 = vand.u32 4294901760, %v9942_v47 }
 0x5e8   : > { %v8420_v12 = vpop.f32.mrf.mxu0 }
 0x5e9   : > { %v8456_v29 = vpop.f32.mrf.mxu1  ;;  %v3118_v35 = vadd.f32 %v8420_v12, %v2999_v50  ;;  %v3885_v12 = vsub.f32 %v9942_v47, %v9952_v48 }
 0x5ea   : > { %v3107_v56 = vpop.f32.mrf.mxu0 }
 0x5eb   : > { %v3412_v44 = vpop.f32.mrf.mxu1  ;;  %v3108_v25 = vadd.f32 %v3107_v56, %v2999_v50  ;;  %v3222_v8 = vadd.f32 %v8432_v55, %v3118_v35  ;;  %v3722_v55 = vpop.permute.xlu1 %3721  ;;  %v3886_v45 = vand.u32 4294901760, %v3885_v12 }
 0x5ec   : > { %v8441_v34 = vpop.f32.mrf.mxu0  ;;  %v9946_v22 = vand.u32 4294901760, %v3722_v55 }
 0x5ed   : > { %v3307_v46 = vadd.f32 %v8441_v34, %v3210_v6  ;;  %v8477_v42 = vpop.f32.mrf.mxu1  ;;  %v3216_v62 = vadd.f32 %v3215_v31, %v3108_v25  ;;  %v3724_v31 = vpop.permute.xlu0 %3723  ;;  %v3892_v34 = vsub.f32 %v9939_v16, %v9965_v36  ;;  %8499 = vmatprep.subr.mxu1 %v3886_v45 }
 0x5ee   : > { %v3299_v9 = vpop.f32.mrf.mxu0  ;;  %8500 = vmatpush3.msra.mxu1 %v3886_v45 }
 0x5ef   : > { %v3300_v1 = vadd.f32 %v3299_v9, %v3204_v20  ;;  %v3405_v59 = vadd.f32 %v8453_v43, %v3307_v46  ;;  %v3592_v13 = vpop.f32.mrf.mxu1  ;;  %v9948_v43 = vand.u32 4294901760, %v3724_v31  ;;  %v3893_v6 = vand.u32 4294901760, %v3892_v34 }
 0x5f0   : > { %v8444_v21 = vpop.f32.mrf.mxu0 }
 0x5f1   : > { %v3321_v54 = vadd.f32 %v8444_v21, %v3222_v8  ;;  %v3397_v57 = vadd.f32 %v3396_v37, %v3300_v1  ;;  %v8480_v24 = vpop.f32.mrf.mxu1  ;;  %v9956_v37 = vsub.f32 %v3722_v55, %v9946_v22  ;;  %v9959_v50 = vsub.f32 %v3724_v31, %v9948_v43  ;;  %8485 = vmatprep.subr.mxu0 %v9948_v43 }
 0x5f2   : > { %v3313_v49 = vpop.f32.mrf.mxu0  ;;  %8486 = vmatpush3.msra.mxu0 %v9948_v43  ;;  %8501 = vmatprep.subr.mxu1 %v3893_v6 }
 0x5f3   : > { %v3314_v15 = vadd.f32 %v3313_v49, %v3216_v62  ;;  %v3421_v7 = vadd.f32 %v8456_v29, %v3321_v54  ;;  %v3604_v61 = vpop.f32.mrf.mxu1  ;;  %v3720_v29 = vpop.permute.xlu1 %3719  ;;  %8487 = vmatprep.subr.mxu0 %v9946_v22  ;;  %v9974_v35 = vand.u32 4294901760, %v9959_v50  ;;  %v9984_v46 = vand.u32 4294901760, %v9956_v37  ;;  %8502 = vmatpush3.msra.mxu1 %v3893_v6 }
 0x5f4   : > { %v8465_v11 = vpop.f32.mrf.mxu0  ;;  %v9968_v56 = vand.u32 4294901760, %v3720_v29  ;;  %8488 = vmatpush3.msra.mxu0 %v9946_v22 }
 0x5f5   : > { %v3507_v60 = vadd.f32 %v8465_v11, %v3405_v59  ;;  %v3413_v27 = vadd.f32 %v3412_v44, %v3314_v15  ;;  %v3899_v9 = vsub.f32 %v9959_v50, %v9974_v35 }
 0x5f6   : > { %v3500_v33 = vpop.f32.mrf.mxu0  ;;  %v9978_v44 = vsub.f32 %v3720_v29, %v9968_v56  ;;  %8489 = vmatprep.subr.mxu0 %v9968_v56 }
 0x5f7   : > { %v9922_v63 = vadd.f32 %v8477_v42, %v3507_v60  ;;  %v3501_v5 = vadd.f32 %v3500_v33, %v3397_v57  ;;  %8490 = vmatpush3.msra.mxu0 %v9968_v56  ;;  %v3900_v21 = vand.u32 4294901760, %v3899_v9  ;;  %v3906_v42 = vsub.f32 %v9956_v37, %v9984_v46 }
 0x5f8   : > { %v8468_v23 = vpop.f32.mrf.mxu0  ;;  %v9992_v59 = vand.u32 4294901760, %v9978_v44 }
 0x5f9   : > { %v3619_v26 = vmin.f32 %v9922_v63, 0.0  ;;  %v9925_v4 = vadd.f32 %v3592_v13, %v3501_v5  ;;  %v3519_v3 = vadd.f32 %v8468_v23, %v3421_v7  ;;  %vm3615_vm5 = vcmp.gt.f32.partialorder %v9922_v63, 0.0  ;;  %8503 = vmatprep.subr.mxu1 %v3900_v21 }
 0x5fa   : > { %v3512_v19 = vpop.f32.mrf.mxu0  ;;  %v3907_v54 = vand.u32 4294901760, %v3906_v42  ;;  %8504 = vmatpush3.msra.mxu1 %v3900_v21  ;;  %v3913_v60 = vsub.f32 %v9978_v44, %v9992_v59 }
 0x5fb   : > { %v3624_v30 = vmul.f32 1.442695, %v3619_v26  ;;  %v3618_v53 = vmin.f32 %v9925_v4, 0.0  ;;  %v9928_v32 = vadd.f32 %v8480_v24, %v3519_v3  ;;  %v3513_v17 = vadd.f32 %v3512_v19, %v3413_v27 }
 0x5fc   : > { %vm3614_vm6 = vcmp.gt.f32.partialorder %v9925_v4, 0.0  ;;  %8505 = vmatprep.subr.mxu1 %v3907_v54  ;;  %v3914_v33 = vand.u32 4294901760, %v3913_v60 }
 0x5fd   : > { %9012 = vpow2.f32 %v3624_v30  ;;  %v3622_v28 = vmul.f32 1.442695, %v3618_v53  ;;  %v3621_v18 = vmin.f32 %v9928_v32, 0.0  ;;  %v9931_v10 = vadd.f32 %v3604_v61, %v3513_v17  ;;  %8506 = vmatpush3.msra.mxu1 %v3907_v54 }
 0x5fe   : > { %vm3617_vm8 = vcmp.gt.f32.partialorder %v9928_v32, 0.0  ;;  %8507 = vmatprep.subr.mxu1 %v3914_v33 }
 0x5ff   : > { %9014 = vpow2.f32 %v3622_v28  ;;  %v3628_v38 = vmul.f32 1.442695, %v3621_v18  ;;  %v3620_v2 = vmin.f32 %v9931_v10, 0.0  ;;  %vm3616_vm10 = vcmp.gt.f32.partialorder %v9931_v10, 0.0  ;;  %8508 = vmatpush3.msra.mxu1 %v3914_v33 }
 0x601   : > { %9016 = vpow2.f32 %v3628_v38  ;;  %v3626_v14 = vmul.f32 1.442695, %v3620_v2 }
 0x603   : > { %9018 = vpow2.f32 %v3626_v14 }
 0x60a   : > { %v9013_v20 = vpop.eup %9012 }
 0x60b   : > { %v7629_v25 = vadd.f32 -1.0, %v9013_v20 }
 0x60c   : > { %v9015_v1 = vpop.eup %9014 }
 0x60d   : > { %v3635_v8 = vsel %vm3615_vm5, %v9922_v63, %v7629_v25  ;;  %v7628_v49 = vadd.f32 -1.0, %v9015_v1 }
 0x60e   : > { %v9017_v62 = vpop.eup %9016  ;;  %3644 = vst.msk [vmem:[#allocation4 + $0x9] sm:$0xff] %vm549_vm2, %v3635_v8 }
 0x60f   : > { %v3634_v11 = vsel %vm3614_vm6, %v9925_v4, %v7628_v49  ;;  %v7631_v13 = vadd.f32 -1.0, %v9017_v62 }
 0x610   : > { %3643 = vst.msk [vmem:[#allocation4 + $0x1] sm:$0xff] %vm549_vm2, %v3634_v11  ;;  %v9019_v57 = vpop.eup %9018 }
 0x611   : > { %v3637_v15 = vsel %vm3617_vm8, %v9928_v32, %v7631_v13  ;;  %v7630_v63 = vadd.f32 -1.0, %v9019_v57 }
 0x612   : > { %3646 = vst.msk [vmem:[#allocation4 + $0x19] sm:$0xff] %vm549_vm2, %v3637_v15 }
 0x613   : > { %v3636_v5 = vsel %vm3616_vm10, %v9931_v10, %v7630_v63 }
 0x614   : > { %3645 = vst.msk [vmem:[#allocation4 + $0x11] sm:$0xff] %vm549_vm2, %v3636_v5 }
 0x615   : > { %v3652_v7 = vld [vmem:[#allocation4 + $0x9] sm:$0xff] }
 0x616   : > { %3665 = vrot.lane.b32.xlu1 %v3652_v7, %s9057_s22 }
 0x617   : > { %v3651_v23 = vld [vmem:[#allocation4 + $0x1] sm:$0xff] }
 0x618   : > { %3663 = vrot.lane.b32.xlu0 %v3651_v23, %s9057_s22  ;;  %v3655_v24 = vld [vmem:[#allocation4 + $0x2] sm:$0xff] }
 0x619   : > { %v3647_v26 = vld [vmem:[#allocation4] sm:$0xff]  ;;  %v3648_v3 = vld [vmem:[#allocation4 + $0x8] sm:$0xff] }
 0x61a   : > { %5664 = vst.msk [vmem:[#allocation4] sm:$0xff] %vm549_vm2, %v9053_v0  ;;  %3717 = vrot.lane.b32.xlu1 %v9690_v41, %s9065_s30  ;;  %v3654_v27 = vld [vmem:[#allocation4 + $0x19] sm:$0xff] }
 0x61b   : > { %v3656_v4 = vld [vmem:[#allocation4 + $0xa] sm:$0xff]  ;;  %v3658_v53 = vld [vmem:[#allocation4 + $0x1a] sm:$0xff]  ;;  %v3657_v41 = vld [vmem:[#allocation4 + $0x12] sm:$0xff] }
 0x61c   : > { %3679 = vrot.lane.b32.xlu0 %v3655_v24, %s9063_s26  ;;  %v3653_v19 = vld [vmem:[#allocation4 + $0x11] sm:$0xff]  ;;  %5665 = vst.msk [vmem:[#allocation4 + $0x8] sm:$0xff] %vm549_vm2, %v9053_v0 }
 0x61d   : > { %v3649_v30 = vld [vmem:[#allocation4 + $0x10] sm:$0xff]  ;;  %v3650_v29 = vld [vmem:[#allocation4 + $0x18] sm:$0xff] }
 0x61e   : > { %3669 = vrot.lane.b32.xlu1 %v3654_v27, %s9057_s22  ;;  %5666 = vst.msk [vmem:[#allocation4 + $0x10] sm:$0x3] %vm1458_vm9, %v9053_v0 }
 0x620   : > { %3681 = vrot.lane.b32.xlu0 %v3656_v4, %s9063_s26 }
 0x622   : > { %3685 = vrot.lane.b32.xlu1 %v3658_v53, %s9063_s26 }
 0x624   : > { %3667 = vrot.lane.b32.xlu0 %v3653_v19, %s9057_s22 }
 0x628   : > { %3683 = vrot.lane.b32.xlu0 %v3657_v41, %s9063_s26 }
 0x62c   : > { %3735 = vrot.lane.b32.xlu0 %v9714_v40, %s9065_s30 }
 0x688   : > { %v3666_v32 = vpop.permute.xlu1 %3665 }
 0x689   : > { %v3692_v55 = vsel %vm549_vm2, %v3648_v3, %v3666_v32 }
 0x68a   : > { %v3664_v17 = vpop.permute.xlu0 %3663 }
 0x68b   : > { %v3691_v18 = vsel %vm549_vm2, %v3647_v26, %v3664_v17 }
 0x68c   : > { %v3718_v61 = vpop.permute.xlu1 %3717 }
 0x68d   : > { %v10024_v28 = vand.u32 4294901760, %v3718_v61 }
 0x68e   : > { %v3680_v10 = vpop.permute.xlu0 %3679 }
 0x68f   : > { %v10028_v51 = vsub.f32 %v3718_v61, %v10024_v28  ;;  %v3695_v52 = vsel %vm2231_vm13, %v3691_v18, %v3680_v10  ;;  %8491 = vmatprep.subr.mxu0 %v10024_v28 }
 0x690   : > { %v3739_v38 = vsel %vm2275_vm14, %v3695_v52, 0  ;;  %v3670_v2 = vpop.permute.xlu1 %3669  ;;  %8492 = vmatpush3.msra.mxu0 %v10024_v28 }
 0x691   : > { %v10034_v40 = vand.u32 4294901760, %v3739_v38  ;;  %8517 = vmatprep.subr.mxu0 %v9942_v47  ;;  %v10038_v14 = vand.u32 4294901760, %v10028_v51  ;;  %v3694_v6 = vsel %vm549_vm2, %v3650_v29, %v3670_v2 }
 0x692   : > { %v3682_v31 = vpop.permute.xlu0 %3681 }
 0x693   : > { %v10042_v12 = vsub.f32 %v3739_v38, %v10034_v40  ;;  %v3696_v45 = vsel %vm2231_vm13, %v3692_v55, %v3682_v31  ;;  %8511 = vmatprep.mubr.f32.mxu1 %v10034_v40  ;;  %v3920_v34 = vsub.f32 %v10028_v51, %v10038_v14 }
 0x694   : > { %v3742_v9 = vsel %vm2275_vm14, %v3696_v45, 0  ;;  %v3686_v20 = vpop.permute.xlu1 %3685 }
 0x695   : > { %v10050_v25 = vand.u32 4294901760, %v3742_v9  ;;  %v3698_v21 = vsel %vm2231_vm13, %v3694_v6, %v3686_v20  ;;  %v3921_v42 = vand.u32 4294901760, %v3920_v34  ;;  %v3823_v1 = vand.u32 4294901760, %v10042_v12 }
 0x696   : > { %v3748_v8 = vsel %vm2275_vm14, %v3698_v21, 0  ;;  %v3668_v49 = vpop.permute.xlu0 %3667 }
 0x697   : > { %v10056_v54 = vsub.f32 %v3742_v9, %v10050_v25  ;;  %8509 = vmatprep.subr.mxu1 %v3921_v42  ;;  %v3824_v62 = vsub.f32 %v10042_v12, %v3823_v1  ;;  %v10060_v13 = vand.u32 4294901760, %v3748_v8  ;;  %v3693_v57 = vsel %vm549_vm2, %v3649_v30, %v3668_v49 }
 0x698   : > { %8510 = vmatpush3.msra.mxu1 %v3921_v42 }
 0x699   : > { %v3833_v11 = vand.u32 4294901760, %v10056_v54  ;;  %8512 = vmatmul.mubr.f32.vlgmr.msra.gmra.mxu1 %v10050_v25  ;;  %8535 = vmatprep.subr.mxu1 %v9935_v58  ;;  %v3825_v60 = vand.u32 4294901760, %v3824_v62  ;;  %v3852_v23 = vsub.f32 %v3748_v8, %v10060_v13 }
 0x69a   : > { %8536 = vmatpush3.msra.mxu1 %v9935_v58  ;;  %v3684_v15 = vpop.permute.xlu0 %3683 }
 0x69b   : > { %v3834_v33 = vsub.f32 %v10056_v54, %v3833_v11  ;;  %v3697_v63 = vsel %vm2231_vm13, %v3693_v57, %v3684_v15  ;;  %8493 = vmatprep.mubr.f32.mxu0 %v3825_v60  ;;  %8537 = vmatprep.subr.mxu1 %v9933_v39  ;;  %v3853_v3 = vand.u32 4294901760, %v3852_v23  ;;  %v10136_v15 = vld [vmem:[%s10745_s1 + $0x10] sm:$0xff] }
 0x69c   : > { %v3745_v5 = vsel %vm2275_vm14, %v3697_v63, 0  ;;  %8538 = vmatpush3.msra.mxu1 %v9933_v39  ;;  %v10148_v63 = vld [vmem:[%s10745_s1] sm:$0xff] }
 0x69d   : > { %v3835_v7 = vand.u32 4294901760, %v3834_v33  ;;  %v10072_v24 = vand.u32 4294901760, %v3745_v5  ;;  %8539 = vmatprep.subr.mxu1 %v9948_v43  ;;  %v10142_v33 = vld [vmem:[%s10745_s1 + $0x18] sm:$0xff] }
 0x69e   : > { %8540 = vmatpush3.msra.mxu1 %v9948_v43 }
 0x69f   : > { %v3842_v26 = vsub.f32 %v3745_v5, %v10072_v24  ;;  %8494 = vmatmul.mubr.f32.vlgmr.msra.gmra.mxu0 %v3835_v7  ;;  %8514 = vmatprep.mubr.f32.mxu1 %v10072_v24  ;;  %v10154_v5 = vld [vmem:[%s10745_s1 + $0x8] sm:$0xff]  ;;  %v10161_v7 = vld [vmem:[%s10746_s2] ss:$0 sm:$0xff] }
 0x6a0   : > { %8518 = vmatpush3.msra.mxu0 %v9942_v47  ;;  %8541 = vmatprep.subr.mxu1 %v9946_v22  ;;  %v3854_v47 = vsub.f32 %v3852_v23, %v3853_v3 }
 0x6a1   : > { %8515 = vmatmul.mubr.f32.gmra.mxu1 %v10060_v13  ;;  %8519 = vmatprep.subr.mxu0 %v9939_v16  ;;  %v3843_v4 = vand.u32 4294901760, %v3842_v26 }
 0x6a2   : > { %8542 = vmatpush3.msra.mxu1 %v9946_v22  ;;  %8520 = vmatpush3.msra.mxu0 %v9939_v16  ;;  %v3855_v16 = vand.u32 4294901760, %v3854_v47 }
 0x6a3   : > { %8543 = vmatprep.subr.mxu1 %v9968_v56  ;;  %8547 = vmatprep.mubr.f32.mxu1 %v3823_v1  ;;  %v3844_v27 = vsub.f32 %v3842_v26, %v3843_v4 }
 0x6a4   : > { %8521 = vmatprep.subr.mxu0 %v9959_v50  ;;  %8544 = vmatpush3.msra.mxu1 %v9968_v56 }
 0x6a5   : > { %8522 = vmatpush3.msra.mxu0 %v9959_v50  ;;  %8545 = vmatprep.subr.mxu1 %v10024_v28  ;;  %v3845_v19 = vand.u32 4294901760, %v3844_v27 }
 0x6a6   : > { %8523 = vmatprep.subr.mxu0 %v9956_v37  ;;  %8546 = vmatpush3.msra.mxu1 %v10024_v28 }
 0x6a7   : > { %8524 = vmatpush3.msra.mxu0 %v9956_v37  ;;  %8548 = vmatmul.mubr.f32.vlgmr.msra.gmra.mxu1 %v3833_v11 }
 0x6a8   : > { %8571 = vmatprep.subr.mxu1 %v9935_v58  ;;  %8525 = vmatprep.subr.mxu0 %v9978_v44 }
 0x6a9   : > { %8550 = vmatprep.mubr.f32.mxu1 %v3843_v4  ;;  %8572 = vmatpush3.msra.mxu1 %v9935_v58 }
 0x6aa   : > { %8496 = vmatprep.mubr.f32.mxu0 %v3845_v19  ;;  %8526 = vmatpush3.msra.mxu0 %v9978_v44 }
 0x6ab   : > { %8573 = vmatprep.subr.mxu1 %v9933_v39  ;;  %8497 = vmatmul.mubr.f32.gmra.mxu0 %v3855_v16 }
 0x6ac   : > { %8527 = vmatprep.subr.mxu0 %v10028_v51  ;;  %8574 = vmatpush3.msra.mxu1 %v9933_v39 }
 0x6ad   : > { %8528 = vmatpush3.msra.mxu0 %v10028_v51  ;;  %8529 = vmatprep.mubr.f32.mxu0 %v10042_v12 }
 0x6ae   : > { %8551 = vmatmul.mubr.f32.gmra.mxu1 %v3853_v3  ;;  %8575 = vmatprep.subr.mxu1 %v9948_v43 }
 0x6af   : > { %8553 = vmatprep.subr.mxu0 %v9952_v48  ;;  %8576 = vmatpush3.msra.mxu1 %v9948_v43 }
 0x6b0   : > { %8583 = vmatprep.mubr.f32.mxu1 %v10034_v40  ;;  %8577 = vmatprep.subr.mxu1 %v9946_v22 }
 0x6b1   : > { %8530 = vmatmul.mubr.f32.vlgmr.msra.gmra.mxu0 %v10056_v54  ;;  %8578 = vmatpush3.msra.mxu1 %v9946_v22 }
 0x6b2   : > { %8554 = vmatpush3.msra.mxu0 %v9952_v48  ;;  %8532 = vmatprep.mubr.f32.mxu0 %v3842_v26 }
 0x6b3   : > { %8555 = vmatprep.subr.mxu0 %v9965_v36  ;;  %8579 = vmatprep.subr.mxu1 %v9968_v56 }
 0x6b4   : > { %8556 = vmatpush3.msra.mxu0 %v9965_v36  ;;  %8580 = vmatpush3.msra.mxu1 %v9968_v56 }
 0x6b5   : > { %8557 = vmatprep.subr.mxu0 %v9974_v35  ;;  %8581 = vmatprep.subr.mxu1 %v10024_v28 }
 0x6b6   : > { %8533 = vmatmul.mubr.f32.gmra.mxu0 %v3852_v23  ;;  %8582 = vmatpush3.msra.mxu1 %v10024_v28 }
 0x6b7   : > { %8558 = vmatpush3.msra.mxu0 %v9974_v35  ;;  %8565 = vmatprep.mubr.f32.mxu0 %v10034_v40  ;;  %v3736_v35 = vpop.permute.xlu0 %3735 }
 0x6b8   : > { %8559 = vmatprep.subr.mxu0 %v9984_v46  ;;  %8584 = vmatmul.mubr.f32.vlgmr.msra.gmra.mxu1 %v10050_v25 }
 0x6b9   : > { %8560 = vmatpush3.msra.mxu0 %v9984_v46  ;;  %8586 = vmatprep.mubr.f32.mxu1 %v10072_v24 }
 0x6ba   : > { %8561 = vmatprep.subr.mxu0 %v9992_v59 }
 0x6bb   : > { %8562 = vmatpush3.msra.mxu0 %v9992_v59 }
 0x6bc   : > { %8563 = vmatprep.subr.mxu0 %v10038_v14  ;;  %8587 = vmatmul.mubr.f32.gmra.mxu1 %v10060_v13 }
 0x6bd   : > { %8564 = vmatpush3.msra.mxu0 %v10038_v14 }
 0x6be   : > { %8566 = vmatmul.mubr.f32.vlgmr.msra.gmra.mxu0 %v10050_v25 }
 0x6bf   : > { %8568 = vmatprep.mubr.f32.mxu0 %v10072_v24 }
 0x6c2   : > { %8569 = vmatmul.mubr.f32.gmra.mxu0 %v10060_v13 }
 0x759   : > { %v8513_v39 = vpop.f32.mrf.mxu1 }
 0x75b   : > { %v3958_v58 = vpop.f32.mrf.mxu1 }
 0x75f   : > { %v8495_v43 = vpop.f32.mrf.mxu0 }
 0x760   : > { %v3838_v59 = vadd.f32 %v8495_v43, %v3736_v35 }
 0x761   : > { %v8516_v22 = vpop.f32.mrf.mxu1  ;;  %v3827_v37 = vpop.f32.mrf.mxu0 }
 0x762   : > { %v3828_v41 = vadd.f32 %v3827_v37, %v3736_v35  ;;  %v3965_v17 = vadd.f32 %v8513_v39, %v3838_v59 }
 0x763   : > { %v3970_v48 = vpop.f32.mrf.mxu1 }
 0x764   : > { %v3959_v51 = vadd.f32 %v3958_v58, %v3828_v41 }
 0x767   : > { %v8549_v36 = vpop.f32.mrf.mxu1 }
 0x769   : > { %v4160_v44 = vpop.f32.mrf.mxu1 }
 0x76b   : > { %v8498_v50 = vpop.f32.mrf.mxu0 }
 0x76c   : > { %v3858_v32 = vadd.f32 %v8498_v50, %v3736_v35 }
 0x76d   : > { %v3847_v56 = vpop.f32.mrf.mxu0 }
 0x76e   : > { %v8552_v30 = vpop.f32.mrf.mxu1  ;;  %v3848_v18 = vadd.f32 %v3847_v56, %v3736_v35  ;;  %v3977_v2 = vadd.f32 %v8516_v22, %v3858_v32 }
 0x770   : > { %v4176_v61 = vpop.f32.mrf.mxu1  ;;  %v3971_v55 = vadd.f32 %v3970_v48, %v3848_v18 }
 0x771   : > { %v8531_v46 = vpop.f32.mrf.mxu0 }
 0x772   : > { %v4068_v10 = vadd.f32 %v8531_v46, %v3965_v17 }
 0x773   : > { %v4060_v53 = vpop.f32.mrf.mxu0 }
 0x774   : > { %v4061_v38 = vadd.f32 %v4060_v53, %v3959_v51  ;;  %v4169_v31 = vadd.f32 %v8549_v36, %v4068_v10 }
 0x776   : > { %v8534_v28 = vpop.f32.mrf.mxu0  ;;  %v4161_v6 = vadd.f32 %v4160_v44, %v4061_v38 }
 0x777   : > { %v4082_v14 = vadd.f32 %v8534_v28, %v3977_v2 }
 0x778   : > { %v8585_v52 = vpop.f32.mrf.mxu1  ;;  %v4074_v40 = vpop.f32.mrf.mxu0 }
 0x779   : > { %v4075_v45 = vadd.f32 %v4074_v40, %v3971_v55  ;;  %v4185_v21 = vadd.f32 %v8552_v30, %v4082_v14 }
 0x77a   : > { %v4368_v12 = vpop.f32.mrf.mxu1 }
 0x77b   : > { %v4177_v54 = vadd.f32 %v4176_v61, %v4075_v45 }
 0x77c   : > { %v8588_v42 = vpop.f32.mrf.mxu1 }
 0x77e   : > { %v8567_v29 = vpop.f32.mrf.mxu0  ;;  %v4380_v60 = vpop.f32.mrf.mxu1 }
 0x77f   : > { %v4280_v34 = vadd.f32 %v8567_v29, %v4169_v31 }
 0x780   : > { %v4273_v9 = vpop.f32.mrf.mxu0 }
 0x781   : > { %v4375_v20 = vadd.f32 %v8585_v52, %v4280_v34  ;;  %v4274_v25 = vadd.f32 %v4273_v9, %v4161_v6 }
 0x782   : > { %v8570_v1 = vpop.f32.mrf.mxu0 }
 0x783   : > { %v4369_v8 = vadd.f32 %v4368_v12, %v4274_v25  ;;  %v4292_v49 = vadd.f32 %v8570_v1, %v4185_v21  ;;  %4396 = vrot.lane.b32.xlu0 %v4375_v20, %s9059_s5 }
 0x784   : > { %v4285_v62 = vpop.f32.mrf.mxu0 }
 0x785   : > { %v4387_v11 = vadd.f32 %v8588_v42, %v4292_v49  ;;  %v4286_v13 = vadd.f32 %v4285_v62, %v4177_v54  ;;  %4394 = vrot.lane.b32.xlu1 %v4369_v8, %s9059_s5 }
 0x787   : > { %v4381_v57 = vadd.f32 %v4380_v60, %v4286_v13  ;;  %4400 = vrot.lane.b32.xlu0 %v4387_v11, %s9059_s5 }
 0x789   : > { %4398 = vrot.lane.b32.xlu1 %v4381_v57, %s9059_s5 }
 0x78b   : > { %4457 = vrot.lane.b32.xlu0 %v10136_v15, %s9066_s9 }
 0x78d   : > { %4459 = vrot.lane.b32.xlu1 %v10142_v33, %s9066_s9 }
 0x78f   : > { %4453 = vrot.lane.b32.xlu0 %v10148_v63, %s9066_s9 }
 0x791   : > { %4455 = vrot.lane.b32.xlu1 %v10154_v5, %s9066_s9 }
 0x793   : > { %5137 = vrot.lane.b32.xlu0 %v10154_v5, %s9067_s18 }
 0x795   : > { %4465 = vrot.lane.b32.xlu1 %v10161_v7, %s9066_s9 }
 0x797   : > { %5141 = vrot.lane.b32.xlu0 %v10161_v7, %s9067_s18 }
 0x799   : > { %5135 = vrot.lane.b32.xlu1 %v10148_v63, %s9067_s18 }
 0x7f5   : > { %v4397_v23 = vpop.permute.xlu0 %4396 }
 0x7f6   : > { %4408 = vst.msk [vmem:[#allocation5 + $0x8] sm:$0xff] %vm4406_vm11, %v4397_v23 }
 0x7f7   : > { %v4395_v24 = vpop.permute.xlu1 %4394 }
 0x7f8   : > { %4407 = vst.msk [vmem:[#allocation5] sm:$0xff] %vm4406_vm11, %v4395_v24 }
 0x7f9   : > { %v4401_v26 = vpop.permute.xlu0 %4400 }
 0x7fa   : > { %4410 = vst.msk [vmem:[#allocation5 + $0x18] sm:$0xff] %vm4406_vm11, %v4401_v26 }
 0x7fb   : > { %v4399_v4 = vpop.permute.xlu1 %4398 }
 0x7fc   : > { %4409 = vst.msk [vmem:[#allocation5 + $0x10] sm:$0xff] %vm4406_vm11, %v4399_v4 }
 0x7fd   : > { %v4458_v3 = vpop.permute.xlu0 %4457  ;;  %v10171_v27 = vld [vmem:[#allocation5 + $0x8] sm:$0xff] }
 0x7fe   : > { %v10173_v47 = vand.u32 4294901760, %v4458_v3  ;;  %v4420_v19 = vmin.f32 %v10171_v27, 0.0  ;;  %vm4416_vm12 = vcmp.gt.f32.partialorder %v10171_v27, 0.0 }
 0x7ff   : > { %v4460_v16 = vpop.permute.xlu1 %4459  ;;  %v10176_v39 = vld [vmem:[#allocation5] sm:$0xff] }
 0x800   : > { %v10178_v58 = vand.u32 4294901760, %v4460_v16  ;;  %v10181_v22 = vsub.f32 %v4458_v3, %v10173_v47  ;;  %v4419_v43 = vmin.f32 %v10176_v39, 0.0  ;;  %v4425_v37 = vmul.f32 1.442695, %v4420_v19 }
 0x801   : > { %v4454_v48 = vpop.permute.xlu0 %4453  ;;  %v10184_v50 = vld [vmem:[#allocation5 + $0x18] sm:$0xff]  ;;  %vm4415_vm0 = vcmp.gt.f32.partialorder %v10176_v39, 0.0 }
 0x802   : > { %v10187_v36 = vsub.f32 %v4460_v16, %v10178_v58  ;;  %v10189_v56 = vand.u32 4294901760, %v4454_v48  ;;  %8589 = vmatprep.subr.mxu0 %v10178_v58  ;;  %v10193_v35 = vand.u32 4294901760, %v10181_v22  ;;  %v4423_v44 = vmul.f32 1.442695, %v4419_v43 }
 0x803   : > { %v4456_v46 = vpop.permute.xlu1 %4455  ;;  %8590 = vmatpush3.msra.mxu0 %v10178_v58  ;;  %9020 = vpow2.f32 %v4425_v37  ;;  %v4413_v59 = vld [vmem:[#allocation5 + $0x10] sm:$0xff]  ;;  %v4422_v30 = vmin.f32 %v10184_v50, 0.0  ;;  %vm4418_vm1 = vcmp.gt.f32.partialorder %v10184_v50, 0.0 }
 0x804   : > { %v10197_v53 = vand.u32 4294901760, %v4456_v46  ;;  %v10200_v41 = vsub.f32 %v4454_v48, %v10189_v56  ;;  %v10203_v32 = vand.u32 4294901760, %v10187_v36  ;;  %8591 = vmatprep.subr.mxu0 %v10173_v47  ;;  %v4624_v17 = vsub.f32 %v10181_v22, %v10193_v35 }
 0x805   : > { %8592 = vmatpush3.msra.mxu0 %v10173_v47  ;;  %9022 = vpow2.f32 %v4423_v44  ;;  %v4421_v61 = vmin.f32 %v4413_v59, 0.0  ;;  %v4429_v28 = vmul.f32 1.442695, %v4422_v30  ;;  %vm4417_vm3 = vcmp.gt.f32.partialorder %v4413_v59, 0.0 }
 0x806   : > { %v10210_v18 = vsub.f32 %v4456_v46, %v10197_v53  ;;  %v4617_v10 = vsub.f32 %v10187_v36, %v10203_v32  ;;  %8593 = vmatprep.subr.mxu0 %v10197_v53  ;;  %v10216_v51 = vand.u32 4294901760, %v10200_v41  ;;  %v4625_v2 = vand.u32 4294901760, %v4624_v17 }
 0x807   : > { %8594 = vmatpush3.msra.mxu0 %v10197_v53  ;;  %v4427_v52 = vmul.f32 1.442695, %v4421_v61  ;;  %9024 = vpow2.f32 %v4429_v28 }
 0x808   : > { %v4618_v38 = vand.u32 4294901760, %v4617_v10  ;;  %v10220_v40 = vand.u32 4294901760, %v10210_v18  ;;  %8595 = vmatprep.subr.mxu0 %v10189_v56  ;;  %v4638_v14 = vsub.f32 %v10200_v41, %v10216_v51 }
 0x809   : > { %8596 = vmatpush3.msra.mxu0 %v10189_v56  ;;  %9026 = vpow2.f32 %v4427_v52 }
 0x80a   : > { %8603 = vmatprep.subr.mxu1 %v4618_v38  ;;  %v4631_v55 = vsub.f32 %v10210_v18, %v10220_v40  ;;  %8617 = vmatprep.subr.mxu0 %v10187_v36  ;;  %v4639_v12 = vand.u32 4294901760, %v4638_v14 }
 0x80b   : > { %8604 = vmatpush3.msra.mxu1 %v4618_v38 }
 0x80c   : > { %8605 = vmatprep.subr.mxu1 %v4625_v2  ;;  %v4632_v31 = vand.u32 4294901760, %v4631_v55 }
 0x80d   : > { %8606 = vmatpush3.msra.mxu1 %v4625_v2 }
 0x80e   : > { %8607 = vmatprep.subr.mxu1 %v4632_v31 }
 0x80f   : > { %8608 = vmatpush3.msra.mxu1 %v4632_v31 }
 0x810   : > { %v9021_v29 = vpop.eup %9020  ;;  %8609 = vmatprep.subr.mxu1 %v4639_v12 }
 0x811   : > { %8610 = vmatpush3.msra.mxu1 %v4639_v12  ;;  %v7634_v45 = vadd.f32 -1.0, %v9021_v29 }
 0x812   : > { %v9023_v34 = vpop.eup %9022  ;;  %8631 = vmatprep.subr.mxu1 %v10178_v58 }
 0x813   : > { %v7633_v6 = vadd.f32 -1.0, %v9023_v34  ;;  %v4436_v9 = vsel %vm4416_vm12, %v10171_v27, %v7634_v45 }
 0x814   : > { %v9025_v20 = vpop.eup %9024  ;;  %v4472_v25 = vsel %vm2231_vm13, %v4436_v9, 0 }
 0x815   : > { %v4435_v21 = vsel %vm4415_vm0, %v10176_v39, %v7633_v6  ;;  %v10235_v42 = vand.u32 4294901760, %v4472_v25  ;;  %v7636_v1 = vadd.f32 -1.0, %v9025_v20 }
 0x816   : > { %v9027_v8 = vpop.eup %9026  ;;  %v4469_v49 = vsel %vm2231_vm13, %v4435_v21, 0 }
 0x817   : > { %v10239_v54 = vand.u32 4294901760, %v4469_v49  ;;  %v4560_v62 = vsub.f32 %v4472_v25, %v10235_v42  ;;  %v7635_v11 = vadd.f32 -1.0, %v9027_v8  ;;  %v4438_v13 = vsel %vm4418_vm1, %v10184_v50, %v7636_v1 }
 0x818   : > { %v4478_v60 = vsel %vm2231_vm13, %v4438_v13, 0 }
 0x819   : > { %8611 = vmatprep.mubr.f32.mxu1 %v10239_v54  ;;  %v4437_v57 = vsel %vm4417_vm3, %v4413_v59, %v7635_v11  ;;  %v10245_v23 = vand.u32 4294901760, %v4478_v60  ;;  %v4550_v24 = vsub.f32 %v4469_v49, %v10239_v54  ;;  %v4561_v26 = vand.u32 4294901760, %v4560_v62 }
 0x81a   : > { %8612 = vmatmul.mubr.f32.vlgmr.msra.gmra.mxu1 %v10235_v42  ;;  %v4475_v4 = vsel %vm2231_vm13, %v4437_v57, 0 }
 0x81b   : > { %8632 = vmatpush3.msra.mxu1 %v10178_v58  ;;  %v4569_v3 = vand.u32 4294901760, %v4475_v4  ;;  %v4551_v27 = vand.u32 4294901760, %v4550_v24  ;;  %v4580_v19 = vsub.f32 %v4478_v60, %v10245_v23  ;;  %v4562_v16 = vsub.f32 %v4560_v62, %v4561_v26 }
 0x81c   : > { %8633 = vmatprep.subr.mxu1 %v10173_v47 }
 0x81d   : > { %8634 = vmatpush3.msra.mxu1 %v10173_v47  ;;  %8614 = vmatprep.mubr.f32.mxu1 %v4569_v3  ;;  %v4552_v39 = vsub.f32 %v4550_v24, %v4551_v27  ;;  %v4570_v43 = vsub.f32 %v4475_v4, %v4569_v3  ;;  %v4581_v48 = vand.u32 4294901760, %v4580_v19  ;;  %v4563_v44 = vand.u32 4294901760, %v4562_v16 }
 0x81e   : > { %8635 = vmatprep.subr.mxu1 %v10197_v53  ;;  %8615 = vmatmul.mubr.f32.gmra.mxu1 %v10245_v23 }
 0x81f   : > { %8636 = vmatpush3.msra.mxu1 %v10197_v53  ;;  %8639 = vmatprep.mubr.f32.mxu1 %v4551_v27  ;;  %v4553_v37 = vand.u32 4294901760, %v4552_v39  ;;  %v4571_v50 = vand.u32 4294901760, %v4570_v43  ;;  %v4582_v59 = vsub.f32 %v4580_v19, %v4581_v48 }
 0x820   : > { %8637 = vmatprep.subr.mxu1 %v10189_v56 }
 0x821   : > { %8638 = vmatpush3.msra.mxu1 %v10189_v56  ;;  %8597 = vmatprep.mubr.f32.mxu0 %v4553_v37  ;;  %v4572_v46 = vsub.f32 %v4570_v43, %v4571_v50  ;;  %v4583_v17 = vand.u32 4294901760, %v4582_v59 }
 0x822   : > { %8659 = vmatprep.subr.mxu1 %v10178_v58  ;;  %8598 = vmatmul.mubr.f32.vlgmr.msra.gmra.mxu0 %v4563_v44 }
 0x823   : > { %8618 = vmatpush3.msra.mxu0 %v10187_v36  ;;  %8640 = vmatmul.mubr.f32.vlgmr.msra.gmra.mxu1 %v4561_v26  ;;  %v4573_v30 = vand.u32 4294901760, %v4572_v46 }
 0x824   : > { %8660 = vmatpush3.msra.mxu1 %v10178_v58  ;;  %8619 = vmatprep.subr.mxu0 %v10181_v22  ;;  %v5138_v58 = vpop.permute.xlu0 %5137 }
 0x825   : > { %8642 = vmatprep.mubr.f32.mxu1 %v4571_v50  ;;  %8661 = vmatprep.subr.mxu1 %v10173_v47  ;;  %v10288_v36 = vand.u32 4294901760, %v5138_v58 }
 0x826   : > { %8620 = vmatpush3.msra.mxu0 %v10181_v22  ;;  %8662 = vmatpush3.msra.mxu1 %v10173_v47  ;;  %v4466_v47 = vpop.permute.xlu1 %4465 }
 0x827   : > { %8600 = vmatprep.mubr.f32.mxu0 %v4573_v30  ;;  %8621 = vmatprep.subr.mxu0 %v10210_v18 }
 0x828   : > { %8663 = vmatprep.subr.mxu1 %v10197_v53  ;;  %8601 = vmatmul.mubr.f32.gmra.mxu0 %v4583_v17 }
 0x829   : > { %8622 = vmatpush3.msra.mxu0 %v10210_v18  ;;  %8643 = vmatmul.mubr.f32.gmra.mxu1 %v4581_v48 }
 0x82a   : > { %8664 = vmatpush3.msra.mxu1 %v10197_v53  ;;  %8623 = vmatprep.subr.mxu0 %v10200_v41  ;;  %v5136_v22 = vpop.permute.xlu1 %5135 }
 0x82b   : > { %8625 = vmatprep.mubr.f32.mxu0 %v4550_v24  ;;  %8665 = vmatprep.subr.mxu1 %v10189_v56 }
 0x82c   : > { %8667 = vmatprep.mubr.f32.mxu1 %v10239_v54  ;;  %8624 = vmatpush3.msra.mxu0 %v10200_v41 }
 0x82d   : > { %8666 = vmatpush3.msra.mxu1 %v10189_v56  ;;  %8645 = vmatprep.subr.mxu0 %v10203_v32  ;;  %v10290_v56 = vand.u32 4294901760, %v5136_v22 }
 0x82e   : > { %8626 = vmatmul.mubr.f32.vlgmr.msra.gmra.mxu0 %v4560_v62  ;;  %8668 = vmatmul.mubr.f32.vlgmr.msra.gmra.mxu1 %v10235_v42 }
 0x82f   : > { %8646 = vmatpush3.msra.mxu0 %v10203_v32  ;;  %8628 = vmatprep.mubr.f32.mxu0 %v4570_v43  ;;  %v10296_v53 = vsub.f32 %v5136_v22, %v10290_v56 }
 0x830   : > { %8647 = vmatprep.subr.mxu0 %v10193_v35  ;;  %8670 = vmatprep.mubr.f32.mxu1 %v4569_v3 }
 0x831   : > { %8648 = vmatpush3.msra.mxu0 %v10193_v35  ;;  %v10293_v35 = vsub.f32 %v5138_v58, %v10288_v36  ;;  %v10305_v32 = vand.u32 4294901760, %v10296_v53 }
 0x832   : > { %8649 = vmatprep.subr.mxu0 %v10220_v40  ;;  %8629 = vmatmul.mubr.f32.gmra.mxu0 %v4580_v19 }
 0x833   : > { %8650 = vmatpush3.msra.mxu0 %v10220_v40  ;;  %8671 = vmatmul.mubr.f32.gmra.mxu1 %v10245_v23  ;;  %v10301_v41 = vand.u32 4294901760, %v10293_v35  ;;  %v5276_v28 = vsub.f32 %v10296_v53, %v10305_v32 }
 0x834   : > { %8651 = vmatprep.subr.mxu0 %v10216_v51  ;;  %8653 = vmatprep.mubr.f32.mxu0 %v10239_v54 }
 0x835   : > { %8652 = vmatpush3.msra.mxu0 %v10216_v51  ;;  %v5269_v61 = vsub.f32 %v10293_v35, %v10301_v41  ;;  %v5277_v10 = vand.u32 4294901760, %v5276_v28 }
 0x836   : > { %8654 = vmatmul.mubr.f32.vlgmr.msra.gmra.mxu0 %v10235_v42  ;;  %8673 = vmatprep.subr.mxu0 %v10288_v36 }
 0x837   : > { %8656 = vmatprep.mubr.f32.mxu0 %v4569_v3  ;;  %8674 = vmatpush3.msra.mxu0 %v10288_v36  ;;  %v5270_v18 = vand.u32 4294901760, %v5269_v61 }
 0x838   : > { %8675 = vmatprep.subr.mxu0 %v10290_v56 }
 0x839   : > { %8676 = vmatpush3.msra.mxu0 %v10290_v56  ;;  %8680 = vmatprep.subr.mxu1 %v5270_v18 }
 0x83a   : > { %8657 = vmatmul.mubr.f32.gmra.mxu0 %v10245_v23  ;;  %8687 = vmatprep.subr.mxu0 %v10293_v35 }
 0x83b   : > { %8681 = vmatpush3.msra.mxu1 %v5270_v18 }
 0x83c   : > { %8682 = vmatprep.subr.mxu1 %v5277_v10 }
 0x83d   : > { %8683 = vmatpush3.msra.mxu1 %v5277_v10 }
 0x83e   : > { %8694 = vmatprep.subr.mxu1 %v10288_v36 }
 0x8da   : > { %v8613_v51 = vpop.f32.mrf.mxu1 }
 0x8dc   : > { %v4676_v52 = vpop.f32.mrf.mxu1 }
 0x8de   : > { %v8616_v38 = vpop.f32.mrf.mxu1 }
 0x8e0   : > { %v4688_v2 = vpop.f32.mrf.mxu1 }
 0x8e2   : > { %v8599_v40 = vpop.f32.mrf.mxu0 }
 0x8e3   : > { %v8641_v14 = vpop.f32.mrf.mxu1  ;;  %v4566_v34 = vadd.f32 %v8599_v40, %v4466_v47 }
 0x8e4   : > { %v4555_v55 = vpop.f32.mrf.mxu0 }
 0x8e5   : > { %v4872_v31 = vpop.f32.mrf.mxu1  ;;  %v4556_v6 = vadd.f32 %v4555_v55, %v4466_v47  ;;  %v4683_v21 = vadd.f32 %v8613_v51, %v4566_v34 }
 0x8e7   : > { %v4677_v49 = vadd.f32 %v4676_v52, %v4556_v6 }
 0x8e8   : > { %v8602_v12 = vpop.f32.mrf.mxu0 }
 0x8e9   : > { %v8644_v29 = vpop.f32.mrf.mxu1  ;;  %v4586_v25 = vadd.f32 %v8602_v12, %v4466_v47 }
 0x8ea   : > { %v4575_v45 = vpop.f32.mrf.mxu0 }
 0x8eb   : > { %v4888_v9 = vpop.f32.mrf.mxu1  ;;  %v4576_v1 = vadd.f32 %v4575_v45, %v4466_v47  ;;  %v4695_v13 = vadd.f32 %v8616_v38, %v4586_v25 }
 0x8ed   : > { %v4689_v23 = vadd.f32 %v4688_v2, %v4576_v1 }
 0x8ee   : > { %v8627_v20 = vpop.f32.mrf.mxu0  ;;  %v8669_v54 = vpop.f32.mrf.mxu1 }
 0x8ef   : > { %v4782_v8 = vadd.f32 %v8627_v20, %v4683_v21 }
 0x8f0   : > { %v4774_v42 = vpop.f32.mrf.mxu0  ;;  %v5072_v26 = vpop.f32.mrf.mxu1 }
 0x8f1   : > { %v4775_v11 = vadd.f32 %v4774_v42, %v4677_v49  ;;  %v4881_v24 = vadd.f32 %v8641_v14, %v4782_v8 }
 0x8f2   : > { %v8630_v62 = vpop.f32.mrf.mxu0 }
 0x8f3   : > { %v4796_v57 = vadd.f32 %v8630_v62, %v4695_v13  ;;  %v4873_v19 = vadd.f32 %v4872_v31, %v4775_v11  ;;  %v8672_v37 = vpop.f32.mrf.mxu1 }
 0x8f4   : > { %v4788_v60 = vpop.f32.mrf.mxu0 }
 0x8f5   : > { %v4789_v3 = vadd.f32 %v4788_v60, %v4689_v23  ;;  %v4897_v48 = vadd.f32 %v8644_v29, %v4796_v57  ;;  %v5084_v58 = vpop.f32.mrf.mxu1 }
 0x8f6   : > { %v8655_v4 = vpop.f32.mrf.mxu0 }
 0x8f7   : > { %v4986_v27 = vadd.f32 %v8655_v4, %v4881_v24  ;;  %v4889_v59 = vadd.f32 %v4888_v9, %v4789_v3 }
 0x8f8   : > { %v4979_v16 = vpop.f32.mrf.mxu0 }
 0x8f9   : > { %v5079_v39 = vadd.f32 %v8669_v54, %v4986_v27  ;;  %v4980_v43 = vadd.f32 %v4979_v16, %v4873_v19 }
 0x8fa   : > { %v8658_v50 = vpop.f32.mrf.mxu0 }
 0x8fb   : > { %5095 = vst.msk [vmem:[#allocation7 + $0x8] sm:$0xff] %vm549_vm2, %v5079_v39  ;;  %v5073_v44 = vadd.f32 %v5072_v26, %v4980_v43  ;;  %v4998_v46 = vadd.f32 %v8658_v50, %v4897_v48 }
 0x8fc   : > { %v4991_v30 = vpop.f32.mrf.mxu0 }
 0x8fd   : > { %5094 = vst.msk [vmem:[#allocation7] sm:$0xff] %vm549_vm2, %v5073_v44  ;;  %v5091_v17 = vadd.f32 %v8672_v37, %v4998_v46  ;;  %v4992_v47 = vadd.f32 %v4991_v30, %v4889_v59 }
 0x8ff   : > { %5097 = vst.msk [vmem:[#allocation7 + $0x18] sm:$0xff] %vm549_vm2, %v5091_v17  ;;  %v5085_v22 = vadd.f32 %v5084_v58, %v4992_v47 }
 0x901   : > { %5096 = vst.msk [vmem:[#allocation7 + $0x10] sm:$0xff] %vm549_vm2, %v5085_v22 }
 0x904   : > { %v5098_v61 = vld [vmem:[#allocation7] ss:$2 sm:$0xff]  ;;  %v5102_v28 = vld [vmem:[#allocation7 + $0x1] ss:$2 sm:$0xff] }
 0x905   : > { %v5105_v18 = vadd.f32 %v5102_v28, %v5098_v61 }
 0x907   : > { %v5107_v10 = vmul.f32 0.5, %v5105_v18 }
 0x908   : > { %v5100_v51 = vld [vmem:[#allocation7 + $0x10] ss:$2 sm:$0xff]  ;;  %v5104_v52 = vld [vmem:[#allocation7 + $0x11] ss:$2 sm:$0xff] }
 0x909   : > { %5109 = vst.msk [vmem:[#allocation6] sm:$0xff] %vm549_vm2, %v5107_v10  ;;  %v5106_v38 = vadd.f32 %v5104_v52, %v5100_v51 }
 0x90b   : > { %v5108_v2 = vmul.f32 0.5, %v5106_v38 }
 0x90d   : > { %5110 = vst.msk [vmem:[#allocation6 + $0x8] sm:$0xff] %vm549_vm2, %v5108_v2 }
 0x910   : > { %v5111_v40 = vld [vmem:[#allocation6] sm:$0xff] }
 0x911   : > { %v5115_v14 = vmin.f32 %v5111_v40, 0.0  ;;  %vm5113_vm4 = vcmp.gt.f32.partialorder %v5111_v40, 0.0 }
 0x913   : > { %v5117_v55 = vmul.f32 1.442695, %v5115_v14 }
 0x914   : > { %v5112_v31 = vld [vmem:[#allocation6 + $0x8] sm:$0xff] }
 0x915   : > { %9028 = vpow2.f32 %v5117_v55  ;;  %v5116_v12 = vmin.f32 %v5112_v31, 0.0  ;;  %vm5114_vm5 = vcmp.gt.f32.partialorder %v5112_v31, 0.0 }
 0x917   : > { %v5119_v29 = vmul.f32 1.442695, %v5116_v12 }
 0x919   : > { %9030 = vpow2.f32 %v5119_v29 }
 0x922   : > { %v9029_v45 = vpop.eup %9028 }
 0x923   : > { %v7638_v34 = vadd.f32 -1.0, %v9029_v45 }
 0x925   : > { %v5123_v6 = vsel %vm5113_vm4, %v5111_v40, %v7638_v34 }
 0x926   : > { %v9031_v9 = vpop.eup %9030  ;;  %v5145_v20 = vsel %vm549_vm2, %v5123_v6, 0 }
 0x927   : > { %v5217_v25 = vand.u32 4294901760, %v5145_v20  ;;  %v7639_v21 = vadd.f32 -1.0, %v9031_v9 }
 0x929   : > { %8684 = vmatprep.mubr.f32.mxu1 %v5217_v25  ;;  %v5124_v42 = vsel %vm5114_vm5, %v5112_v31, %v7639_v21  ;;  %v5218_v1 = vsub.f32 %v5145_v20, %v5217_v25 }
 0x92a   : > { %v5148_v8 = vsel %vm549_vm2, %v5124_v42, 0 }
 0x92b   : > { %v5227_v49 = vand.u32 4294901760, %v5148_v8  ;;  %v5219_v54 = vand.u32 4294901760, %v5218_v1 }
 0x92d   : > { %8685 = vmatmul.mubr.f32.vlgmr.msra.gmra.mxu1 %v5227_v49  ;;  %v5220_v62 = vsub.f32 %v5218_v1, %v5219_v54  ;;  %v5228_v11 = vsub.f32 %v5148_v8, %v5227_v49 }
 0x92e   : > { %8695 = vmatpush3.msra.mxu1 %v10288_v36  ;;  %8698 = vmatprep.mubr.f32.mxu1 %v5219_v54 }
 0x92f   : > { %8696 = vmatprep.subr.mxu1 %v10290_v56  ;;  %v5221_v13 = vand.u32 4294901760, %v5220_v62  ;;  %v5229_v60 = vand.u32 4294901760, %v5228_v11 }
 0x930   : > { %8697 = vmatpush3.msra.mxu1 %v10290_v56 }
 0x931   : > { %8708 = vmatprep.subr.mxu1 %v10288_v36  ;;  %8677 = vmatprep.mubr.f32.mxu0 %v5221_v13  ;;  %v5230_v57 = vsub.f32 %v5228_v11, %v5229_v60 }
 0x932   : > { %8699 = vmatmul.mubr.f32.vlgmr.msra.gmra.mxu1 %v5229_v60 }
 0x933   : > { %v5231_v23 = vand.u32 4294901760, %v5230_v57  ;;  %8709 = vmatpush3.msra.mxu1 %v10288_v36  ;;  %8712 = vmatprep.mubr.f32.mxu1 %v5217_v25  ;;  %v10339_v36 = vld [vmem:[%s10745_s1 + $0x20] sm:$0xff] }
 0x934   : > { %8710 = vmatprep.subr.mxu1 %v10290_v56  ;;  %5721 = vrot.lane.b32.xlu0 %v10339_v36, %s9063_s26 }
 0x935   : > { %8711 = vmatpush3.msra.mxu1 %v10290_v56  ;;  %8678 = vmatmul.mubr.f32.vlgmr.msra.gmra.mxu0 %v5231_v23  ;;  %v10344_v56 = vld [vmem:[%s10745_s1 + $0x28] sm:$0xff] }
 0x936   : > { %8688 = vmatpush3.msra.mxu0 %v10293_v35  ;;  %8713 = vmatmul.mubr.f32.vlgmr.msra.gmra.mxu1 %v5227_v49 }
 0x937   : > { %8689 = vmatprep.subr.mxu0 %v10296_v53  ;;  %8691 = vmatprep.mubr.f32.mxu0 %v5218_v1 }
 0x938   : > { %8690 = vmatpush3.msra.mxu0 %v10296_v53  ;;  %5723 = vrot.lane.b32.xlu1 %v10344_v56, %s9063_s26 }
 0x939   : > { %8701 = vmatprep.subr.mxu0 %v10301_v41  ;;  %8692 = vmatmul.mubr.f32.vlgmr.msra.gmra.mxu0 %v5228_v11 }
 0x93a   : > { %8702 = vmatpush3.msra.mxu0 %v10301_v41  ;;  %8705 = vmatprep.mubr.f32.mxu0 %v5217_v25  ;;  %v5142_v41 = vpop.permute.xlu0 %5141 }
 0x93b   : > { %8703 = vmatprep.subr.mxu0 %v10305_v32  ;;  %5717 = vrot.lane.b32.xlu0 %v10136_v15, %s9063_s26 }
 0x93c   : > { %8704 = vmatpush3.msra.mxu0 %v10305_v32  ;;  %5719 = vrot.lane.b32.xlu1 %v10142_v33, %s9063_s26 }
 0x93d   : > { %8706 = vmatmul.mubr.f32.vlgmr.msra.gmra.mxu0 %v5227_v49 }
 0x93f   : > { %5715 = vrot.lane.b32.xlu0 %v10154_v5, %s9063_s26 }
 0x9a6   : > { %v5722_v18 = vpop.permute.xlu0 %5721 }
 0x9a7   : > { %v10356_v51 = vand.u32 4294901760, %v5722_v18 }
 0x9a9   : > { %v10361_v38 = vsub.f32 %v5722_v18, %v10356_v51 }
 0x9aa   : > { %v5724_v10 = vpop.permute.xlu1 %5723 }
 0x9ab   : > { %v10358_v52 = vand.u32 4294901760, %v5724_v10  ;;  %v10387_v6 = vand.u32 4294901760, %v10361_v38 }
 0x9ad   : > { %v10364_v2 = vsub.f32 %v5724_v10, %v10358_v52  ;;  %8715 = vmatprep.subr.mxu0 %v10358_v52  ;;  %v5718_v40 = vpop.permute.xlu0 %5717  ;;  %v5862_v21 = vsub.f32 %v10361_v38, %v10387_v6 }
 0x9ae   : > { %v5720_v14 = vpop.permute.xlu1 %5719  ;;  %8716 = vmatpush3.msra.mxu0 %v10358_v52  ;;  %v10368_v55 = vand.u32 4294901760, %v5718_v40 }
 0x9af   : > { %v10370_v31 = vand.u32 4294901760, %v5720_v14  ;;  %8717 = vmatprep.subr.mxu0 %v10356_v51  ;;  %v10374_v12 = vand.u32 4294901760, %v10364_v2  ;;  %v5863_v8 = vand.u32 4294901760, %v5862_v21 }
 0x9b0   : > { %8718 = vmatpush3.msra.mxu0 %v10356_v51  ;;  %v10378_v29 = vsub.f32 %v5718_v40, %v10368_v55 }
 0x9b1   : > { %v10381_v45 = vsub.f32 %v5720_v14, %v10370_v31  ;;  %8719 = vmatprep.subr.mxu0 %v10370_v31  ;;  %v5855_v34 = vsub.f32 %v10364_v2, %v10374_v12  ;;  %v5716_v9 = vpop.permute.xlu0 %5715 }
 0x9b2   : > { %8720 = vmatpush3.msra.mxu0 %v10370_v31  ;;  %v10390_v20 = vand.u32 4294901760, %v5716_v9  ;;  %v10406_v54 = vand.u32 4294901760, %v10378_v29 }
 0x9b3   : > { %v5856_v25 = vand.u32 4294901760, %v5855_v34  ;;  %8721 = vmatprep.subr.mxu0 %v10368_v55  ;;  %v10396_v42 = vand.u32 4294901760, %v10381_v45 }
 0x9b4   : > { %8722 = vmatpush3.msra.mxu0 %v10368_v55  ;;  %v10400_v1 = vsub.f32 %v5716_v9, %v10390_v20  ;;  %v5876_v60 = vsub.f32 %v10378_v29, %v10406_v54 }
 0x9b5   : > { %8730 = vmatprep.subr.mxu1 %v5856_v25  ;;  %v5869_v49 = vsub.f32 %v10381_v45, %v10396_v42  ;;  %8723 = vmatprep.subr.mxu0 %v10390_v20 }
 0x9b6   : > { %8731 = vmatpush3.msra.mxu1 %v5856_v25  ;;  %8724 = vmatpush3.msra.mxu0 %v10390_v20 }
 0x9b7   : > { %8732 = vmatprep.subr.mxu1 %v5863_v8  ;;  %v5870_v13 = vand.u32 4294901760, %v5869_v49 }
 0x9b8   : > { %8733 = vmatpush3.msra.mxu1 %v5863_v8 }
 0x9b9   : > { %8734 = vmatprep.subr.mxu1 %v5870_v13 }
 0x9ba   : > { %8735 = vmatpush3.msra.mxu1 %v5870_v13 }
 0x9ed   : > { %v8686_v35 = vpop.f32.mrf.mxu1 }
 0x9ef   : > { %v5314_v53 = vpop.f32.mrf.mxu1 }
 0x9f2   : > { %v8700_v32 = vpop.f32.mrf.mxu1 }
 0x9f4   : > { %v5478_v19 = vpop.f32.mrf.mxu1 }
 0x9f5   : > { %v8679_v24 = vpop.f32.mrf.mxu0 }
 0x9f6   : > { %v5234_v26 = vadd.f32 %v8679_v24, %v5142_v41  ;;  %v8714_v33 = vpop.f32.mrf.mxu1 }
 0x9f7   : > { %v5223_v4 = vpop.f32.mrf.mxu0 }
 0x9f8   : > { %v5224_v3 = vadd.f32 %v5223_v4, %v5142_v41  ;;  %v5321_v27 = vadd.f32 %v8686_v35, %v5234_v26  ;;  %v5642_v17 = vpop.f32.mrf.mxu1  ;;  %v10412_v41 = vand.u32 4294901760, %v10400_v1 }
 0x9f9   : > { %v8693_v16 = vpop.f32.mrf.mxu0 }
 0x9fa   : > { %v5404_v39 = vadd.f32 %v8693_v16, %v5321_v27  ;;  %v5315_v43 = vadd.f32 %v5314_v53, %v5224_v3  ;;  %v5877_v53 = vand.u32 4294901760, %v5876_v60  ;;  %v5883_v24 = vsub.f32 %v10400_v1, %v10412_v41 }
 0x9fb   : > { %v5396_v15 = vpop.f32.mrf.mxu0 }
 0x9fc   : > { %v5397_v48 = vadd.f32 %v5396_v15, %v5315_v43  ;;  %v5487_v37 = vadd.f32 %v8700_v32, %v5404_v39  ;;  %8736 = vmatprep.subr.mxu1 %v5877_v53  ;;  %v5884_v26 = vand.u32 4294901760, %v5883_v24  ;;  %v9044_v24 = vld [vmem:[%s10746_s2] ss:$0 sm:$0xff] }
 0x9fd   : > { %v8707_v50 = vpop.f32.mrf.mxu0  ;;  %8737 = vmatpush3.msra.mxu1 %v5877_v53  ;;  %v6319_v53 = vld [vmem:[%s10745_s1 + $0x8] sm:$0xff] }
 0x9fe   : > { %v5570_v44 = vadd.f32 %v8707_v50, %v5487_v37  ;;  %v5479_v5 = vadd.f32 %v5478_v19, %v5397_v48  ;;  %8738 = vmatprep.subr.mxu1 %v5884_v26 }
 0x9ff   : > { %v5563_v46 = vpop.f32.mrf.mxu0  ;;  %8739 = vmatpush3.msra.mxu1 %v5884_v26 }
 0xa00   : > { %v5649_v59 = vadd.f32 %v8714_v33, %v5570_v44  ;;  %v5564_v30 = vadd.f32 %v5563_v46, %v5479_v5 }
 0xa02   : > { %v5655_v47 = vmin.f32 %v5649_v59, 0.0  ;;  %v5643_v58 = vadd.f32 %v5642_v17, %v5564_v30  ;;  %vm5653_vm6 = vcmp.gt.f32.partialorder %v5649_v59, 0.0 }
 0xa04   : > { %v5658_v22 = vmul.f32 1.442695, %v5655_v47  ;;  %v5654_v61 = vmin.f32 %v5643_v58, 0.0  ;;  %vm5652_vm8 = vcmp.gt.f32.partialorder %v5643_v58, 0.0 }
 0xa06   : > { %9032 = vpow2.f32 %v5658_v22  ;;  %v5656_v28 = vmul.f32 1.442695, %v5654_v61 }
 0xa08   : > { %9034 = vpow2.f32 %v5656_v28 }
 0xa13   : > { %v9033_v62 = vpop.eup %9032 }
 0xa14   : > { %v7642_v11 = vadd.f32 -1.0, %v9033_v62 }
 0xa15   : > { %v9035_v57 = vpop.eup %9034 }
 0xa16   : > { %v5663_v23 = vsel %vm5653_vm6, %v5649_v59, %v7642_v11  ;;  %v7641_v35 = vadd.f32 -1.0, %v9035_v57 }
 0xa17   : > { %5668 = vst.msk [vmem:[#allocation4 + $0x9] sm:$0xff] %vm549_vm2, %v5663_v23 }
 0xa18   : > { %v5662_v32 = vsel %vm5652_vm8, %v5643_v58, %v7641_v35 }
 0xa19   : > { %5667 = vst.msk [vmem:[#allocation4 + $0x1] sm:$0xff] %vm549_vm2, %v5662_v32  ;;  %v10511_v32 = vld [vmem:[%s10745_s1] sm:$0xff] }
 0xa1e   : > { %v5672_v4 = vld [vmem:[#allocation4 + $0x9] sm:$0xff] }
 0xa1f   : > { %v5674_v3 = vld [vmem:[#allocation4 + $0xa] sm:$0xff]  ;;  %5679 = vrot.lane.b32.xlu0 %v5672_v4, %s9057_s22 }
 0xa20   : > { %6877 = vst.msk [vmem:[#allocation4 + $0x10] sm:$0x3] %vm1458_vm9, %v9053_v0  ;;  %v5671_v27 = vld [vmem:[#allocation4 + $0x1] sm:$0xff] }
 0xa21   : > { %v5673_v19 = vld [vmem:[#allocation4 + $0x2] sm:$0xff]  ;;  %5677 = vrot.lane.b32.xlu1 %v5671_v27, %s9057_s22 }
 0xa22   : > { %v5670_v16 = vld [vmem:[#allocation4 + $0x8] sm:$0xff]  ;;  %v5669_v39 = vld [vmem:[#allocation4] sm:$0xff] }
 0xa23   : > { %6876 = vst.msk [vmem:[#allocation4 + $0x8] sm:$0xff] %vm549_vm2, %v9053_v0  ;;  %6875 = vst.msk [vmem:[#allocation4] sm:$0xff] %vm549_vm2, %v9053_v0  ;;  %5713 = vrot.lane.b32.xlu0 %v10148_v63, %s9063_s26 }
 0xa25   : > { %5685 = vrot.lane.b32.xlu1 %v5673_v19, %s9063_s26 }
 0xa29   : > { %5687 = vrot.lane.b32.xlu1 %v5674_v3, %s9063_s26 }
 0xa2d   : > { %5731 = vrot.lane.b32.xlu1 %v10161_v7, %s9063_s26 }
 0xa91   : > { %v5680_v43 = vpop.permute.xlu0 %5679 }
 0xa92   : > { %v5692_v46 = vsel %vm549_vm2, %v5670_v16, %v5680_v43 }
 0xa93   : > { %v5678_v15 = vpop.permute.xlu1 %5677 }
 0xa94   : > { %v5691_v33 = vsel %vm549_vm2, %v5669_v39, %v5678_v15 }
 0xa95   : > { %v5714_v48 = vpop.permute.xlu0 %5713 }
 0xa96   : > { %v10432_v37 = vand.u32 4294901760, %v5714_v48 }
 0xa97   : > { %v5686_v50 = vpop.permute.xlu1 %5685 }
 0xa98   : > { %v5888_v0 = vsub.f32 %v5714_v48, %v10432_v37  ;;  %v5693_v44 = vsel %vm2231_vm13, %v5691_v33, %v5686_v50  ;;  %8725 = vmatprep.subr.mxu0 %v10432_v37 }
 0xa99   : > { %v5735_v63 = vsel %vm2275_vm14, %v5693_v44, 0  ;;  %8726 = vmatpush3.msra.mxu0 %v10432_v37 }
 0xa9a   : > { %v5811_v5 = vand.u32 4294901760, %v5735_v63  ;;  %8745 = vmatprep.subr.mxu0 %v10364_v2  ;;  %v10441_v7 = vand.u32 4294901760, %v5888_v0 }
 0xa9b   : > { %v5688_v59 = vpop.permute.xlu1 %5687 }
 0xa9c   : > { %v5812_v30 = vsub.f32 %v5735_v63, %v5811_v5  ;;  %v5694_v17 = vsel %vm2231_vm13, %v5692_v46, %v5688_v59  ;;  %8742 = vmatprep.mubr.f32.mxu1 %v5811_v5  ;;  %v5890_v47 = vsub.f32 %v5888_v0, %v10441_v7 }
 0xa9d   : > { %v5738_v58 = vsel %vm2275_vm14, %v5694_v17, 0 }
 0xa9e   : > { %v10447_v22 = vand.u32 4294901760, %v5738_v58  ;;  %v5891_v61 = vand.u32 4294901760, %v5890_v47  ;;  %v5813_v28 = vand.u32 4294901760, %v5812_v30 }
 0xaa0   : > { %v5822_v18 = vsub.f32 %v5738_v58, %v10447_v22  ;;  %8740 = vmatprep.subr.mxu1 %v5891_v61  ;;  %v5814_v10 = vsub.f32 %v5812_v30, %v5813_v28 }
 0xaa1   : > { %8741 = vmatpush3.msra.mxu1 %v5891_v61 }
 0xaa2   : > { %v5823_v40 = vand.u32 4294901760, %v5822_v18  ;;  %8743 = vmatmul.mubr.f32.vlgmr.msra.gmra.mxu1 %v10447_v22  ;;  %8760 = vmatprep.subr.mxu1 %v10358_v52  ;;  %v5815_v14 = vand.u32 4294901760, %v5814_v10 }
 0xaa3   : > { %8761 = vmatpush3.msra.mxu1 %v10358_v52  ;;  %8772 = vmatprep.mubr.f32.mxu1 %v5813_v28 }
 0xaa4   : > { %8727 = vmatprep.mubr.f32.mxu0 %v5815_v14  ;;  %8762 = vmatprep.subr.mxu1 %v10356_v51  ;;  %v5824_v34 = vsub.f32 %v5822_v18, %v5823_v40 }
 0xaa5   : > { %8763 = vmatpush3.msra.mxu1 %v10356_v51 }
 0xaa6   : > { %8764 = vmatprep.subr.mxu1 %v10370_v31  ;;  %v5825_v9 = vand.u32 4294901760, %v5824_v34 }
 0xaa7   : > { %8765 = vmatpush3.msra.mxu1 %v10370_v31 }
 0xaa8   : > { %8728 = vmatmul.mubr.f32.vlgmr.msra.gmra.mxu0 %v5825_v9  ;;  %8766 = vmatprep.subr.mxu1 %v10368_v55 }
 0xaa9   : > { %8746 = vmatpush3.msra.mxu0 %v10364_v2  ;;  %8757 = vmatprep.mubr.f32.mxu0 %v5812_v30 }
 0xaaa   : > { %8747 = vmatprep.subr.mxu0 %v10361_v38  ;;  %8767 = vmatpush3.msra.mxu1 %v10368_v55 }
 0xaab   : > { %8748 = vmatpush3.msra.mxu0 %v10361_v38  ;;  %8768 = vmatprep.subr.mxu1 %v10390_v20 }
 0xaac   : > { %8749 = vmatprep.subr.mxu0 %v10381_v45  ;;  %8769 = vmatpush3.msra.mxu1 %v10390_v20 }
 0xaad   : > { %8750 = vmatpush3.msra.mxu0 %v10381_v45  ;;  %8770 = vmatprep.subr.mxu1 %v10432_v37 }
 0xaae   : > { %8751 = vmatprep.subr.mxu0 %v10378_v29  ;;  %8771 = vmatpush3.msra.mxu1 %v10432_v37 }
 0xaaf   : > { %8752 = vmatpush3.msra.mxu0 %v10378_v29  ;;  %8773 = vmatmul.mubr.f32.vlgmr.msra.gmra.mxu1 %v5823_v40 }
 0xab0   : > { %8790 = vmatprep.subr.mxu1 %v10358_v52  ;;  %8753 = vmatprep.subr.mxu0 %v10400_v1 }
 0xab1   : > { %8791 = vmatpush3.msra.mxu1 %v10358_v52  ;;  %8802 = vmatprep.mubr.f32.mxu1 %v5811_v5  ;;  %v5732_v52 = vpop.permute.xlu1 %5731 }
 0xab2   : > { %8754 = vmatpush3.msra.mxu0 %v10400_v1  ;;  %8792 = vmatprep.subr.mxu1 %v10356_v51 }
 0xab3   : > { %8755 = vmatprep.subr.mxu0 %v5888_v0  ;;  %8793 = vmatpush3.msra.mxu1 %v10356_v51 }
 0xab4   : > { %8756 = vmatpush3.msra.mxu0 %v5888_v0  ;;  %8794 = vmatprep.subr.mxu1 %v10370_v31 }
 0xab5   : > { %8758 = vmatmul.mubr.f32.vlgmr.msra.gmra.mxu0 %v5822_v18  ;;  %8775 = vmatprep.subr.mxu0 %v10374_v12 }
 0xab6   : > { %8795 = vmatpush3.msra.mxu1 %v10370_v31  ;;  %8776 = vmatpush3.msra.mxu0 %v10374_v12 }
 0xab7   : > { %8787 = vmatprep.mubr.f32.mxu0 %v5811_v5  ;;  %8796 = vmatprep.subr.mxu1 %v10368_v55 }
 0xab8   : > { %8777 = vmatprep.subr.mxu0 %v10387_v6  ;;  %8797 = vmatpush3.msra.mxu1 %v10368_v55 }
 0xab9   : > { %8778 = vmatpush3.msra.mxu0 %v10387_v6  ;;  %8798 = vmatprep.subr.mxu1 %v10390_v20 }
 0xaba   : > { %8779 = vmatprep.subr.mxu0 %v10396_v42  ;;  %8799 = vmatpush3.msra.mxu1 %v10390_v20 }
 0xabb   : > { %8780 = vmatpush3.msra.mxu0 %v10396_v42  ;;  %8800 = vmatprep.subr.mxu1 %v10432_v37 }
 0xabc   : > { %8781 = vmatprep.subr.mxu0 %v10406_v54  ;;  %8801 = vmatpush3.msra.mxu1 %v10432_v37 }
 0xabd   : > { %8782 = vmatpush3.msra.mxu0 %v10406_v54  ;;  %8803 = vmatmul.mubr.f32.vlgmr.msra.gmra.mxu1 %v10447_v22 }
 0xabe   : > { %8783 = vmatprep.subr.mxu0 %v10412_v41 }
 0xabf   : > { %8784 = vmatpush3.msra.mxu0 %v10412_v41  ;;  %v6320_v41 = vld [vmem:[%s10745_s1 + $0x10] sm:$0xff] }
 0xac0   : > { %8785 = vmatprep.subr.mxu0 %v10441_v7 }
 0xac1   : > { %8786 = vmatpush3.msra.mxu0 %v10441_v7 }
 0xac2   : > { %8788 = vmatmul.mubr.f32.vlgmr.msra.gmra.mxu0 %v10447_v22 }
 0xb62   : > { %v8744_v38 = vpop.f32.mrf.mxu1 }
 0xb64   : > { %v5928_v29 = vpop.f32.mrf.mxu1 }
 0xb68   : > { %v8729_v51 = vpop.f32.mrf.mxu0 }
 0xb69   : > { %v5828_v55 = vadd.f32 %v8729_v51, %v5732_v52 }
 0xb6a   : > { %v5817_v2 = vpop.f32.mrf.mxu0 }
 0xb6b   : > { %v5818_v12 = vadd.f32 %v5817_v2, %v5732_v52  ;;  %v5935_v45 = vadd.f32 %v8744_v38, %v5828_v55 }
 0xb6d   : > { %v5929_v21 = vadd.f32 %v5928_v29, %v5818_v12 }
 0xb6f   : > { %v8774_v6 = vpop.f32.mrf.mxu1 }
 0xb71   : > { %v6104_v1 = vpop.f32.mrf.mxu1 }
 0xb75   : > { %v8759_v31 = vpop.f32.mrf.mxu0 }
 0xb76   : > { %v6026_v25 = vadd.f32 %v8759_v31, %v5935_v45 }
 0xb77   : > { %v6018_v20 = vpop.f32.mrf.mxu0 }
 0xb78   : > { %v6019_v42 = vadd.f32 %v6018_v20, %v5929_v21  ;;  %v6113_v8 = vadd.f32 %v8774_v6, %v6026_v25  ;;  %v6909_v6 = vld [vmem:[%s10745_s1 + $0x18] sm:$0xff] }
 0xb7a   : > { %v6105_v11 = vadd.f32 %v6104_v1, %v6019_v42 }
 0xb7d   : > { %v8804_v49 = vpop.f32.mrf.mxu1 }
 0xb7f   : > { %v6284_v23 = vpop.f32.mrf.mxu1 }
 0xb82   : > { %v8789_v54 = vpop.f32.mrf.mxu0 }
 0xb83   : > { %v6208_v62 = vadd.f32 %v8789_v54, %v6113_v8 }
 0xb84   : > { %v6201_v13 = vpop.f32.mrf.mxu0 }
 0xb85   : > { %v6291_v60 = vadd.f32 %v8804_v49, %v6208_v62  ;;  %v6202_v57 = vadd.f32 %v6201_v13, %v6105_v11 }
 0xb87   : > { %v6285_v35 = vadd.f32 %v6284_v23, %v6202_v57  ;;  %6298 = vrot.lane.b32.xlu1 %v6291_v60, %s9057_s22 }
 0xb89   : > { %6296 = vrot.lane.b32.xlu0 %v6285_v35, %s9057_s22 }
 0xb8b   : > { %6332 = vrot.lane.b32.xlu1 %v6319_v53, %s9059_s5 }
 0xb8d   : > { %6334 = vrot.lane.b32.xlu0 %v6320_v41, %s9059_s5 }
 0xb8f   : > { %6339 = vrot.lane.b32.xlu1 %v9044_v24, %s9059_s5 }
 0xb91   : > { %6330 = vrot.lane.b32.xlu0 %v10511_v32, %s9059_s5 }
 0xb93   : > { %6932 = vrot.lane.b32.xlu1 %v10339_v36, %s9054_s19 }
 0xb95   : > { %6934 = vrot.lane.b32.xlu0 %v10344_v56, %s9054_s19 }
 0xb97   : > { %6928 = vrot.lane.b32.xlu1 %v6320_v41, %s9054_s19 }
 0xb99   : > { %6930 = vrot.lane.b32.xlu0 %v6909_v6, %s9054_s19 }
 0xb9b   : > { %6926 = vrot.lane.b32.xlu1 %v6319_v53, %s9054_s19 }
 0xbf9   : > { %v6299_v26 = vpop.permute.xlu1 %6298 }
 0xbfa   : > { %6303 = vst.msk [vmem:[#allocation6 + $0x8] sm:$0xff] %vm2944_vm15, %v6299_v26 }
 0xbfb   : > { %v6297_v4 = vpop.permute.xlu0 %6296 }
 0xbfc   : > { %6302 = vst.msk [vmem:[#allocation6] sm:$0xff] %vm2944_vm15, %v6297_v4 }
 0xbfd   : > { %v6333_v3 = vpop.permute.xlu1 %6332 }
 0xbfe   : > { %v10527_v27 = vand.u32 4294901760, %v6333_v3 }
 0xbff   : > { %v6335_v19 = vpop.permute.xlu0 %6334 }
 0xc00   : > { %v10529_v16 = vand.u32 4294901760, %v6335_v19  ;;  %v10532_v36 = vsub.f32 %v6333_v3, %v10527_v27 }
 0xc01   : > { %v6305_v56 = vld [vmem:[#allocation6 + $0x8] sm:$0xff]  ;;  %v6340_v20 = vpop.permute.xlu1 %6339 }
 0xc02   : > { %v10535_v39 = vsub.f32 %v6335_v19, %v10529_v16  ;;  %8805 = vmatprep.subr.mxu0 %v10529_v16  ;;  %v10539_v43 = vand.u32 4294901760, %v10532_v36  ;;  %v6309_v15 = vmin.f32 %v6305_v56, 0.0  ;;  %vm6307_vm9 = vcmp.gt.f32.partialorder %v6305_v56, 0.0 }
 0xc03   : > { %v6331_v48 = vpop.permute.xlu0 %6330  ;;  %8806 = vmatpush3.msra.mxu0 %v10529_v16  ;;  %v6304_v37 = vld [vmem:[#allocation6] sm:$0xff] }
 0xc04   : > { %v10542_v33 = vand.u32 4294901760, %v6331_v48  ;;  %v10545_v50 = vand.u32 4294901760, %v10535_v39  ;;  %8807 = vmatprep.subr.mxu0 %v10527_v27  ;;  %v6473_v0 = vsub.f32 %v10532_v36, %v10539_v43  ;;  %v6308_v44 = vmin.f32 %v6304_v37, 0.0 }
 0xc05   : > { %8808 = vmatpush3.msra.mxu0 %v10527_v27  ;;  %v6312_v63 = vmul.f32 1.442695, %v6309_v15  ;;  %vm6306_vm15 = vcmp.gt.f32.partialorder %v6304_v37, 0.0  ;;  %v6933_v42 = vpop.permute.xlu1 %6932 }
 0xc06   : > { %v10552_v5 = vsub.f32 %v6331_v48, %v10542_v33  ;;  %v6466_v7 = vsub.f32 %v10535_v39, %v10545_v50  ;;  %8809 = vmatprep.subr.mxu0 %v10542_v33  ;;  %v6310_v46 = vmul.f32 1.442695, %v6308_v44  ;;  %v6474_v30 = vand.u32 4294901760, %v6473_v0 }
 0xc07   : > { %8810 = vmatpush3.msra.mxu0 %v10542_v33  ;;  %9036 = vpow2.f32 %v6312_v63  ;;  %v6935_v25 = vpop.permute.xlu0 %6934  ;;  %v10595_v1 = vand.u32 4294901760, %v6933_v42 }
 0xc08   : > { %v6467_v59 = vand.u32 4294901760, %v6466_v7  ;;  %v10559_v17 = vand.u32 4294901760, %v10552_v5  ;;  %8823 = vmatprep.subr.mxu0 %v10535_v39  ;;  %9038 = vpow2.f32 %v6310_v46  ;;  %v10593_v21 = vand.u32 4294901760, %v6935_v25 }
 0xc09   : > { %v6929_v7 = vpop.permute.xlu1 %6928  ;;  %v10610_v46 = vsub.f32 %v6933_v42, %v10595_v1 }
 0xc0a   : > { %8814 = vmatprep.subr.mxu1 %v6467_v59  ;;  %v6480_v47 = vsub.f32 %v10552_v5, %v10559_v17  ;;  %v10598_v8 = vsub.f32 %v6935_v25, %v10593_v21 }
 0xc0b   : > { %8815 = vmatpush3.msra.mxu1 %v6467_v59  ;;  %v10612_v59 = vand.u32 4294901760, %v6929_v7 }
 0xc0c   : > { %8816 = vmatprep.subr.mxu1 %v6474_v30  ;;  %v6481_v58 = vand.u32 4294901760, %v6480_v47  ;;  %v10604_v49 = vand.u32 4294901760, %v10598_v8 }
 0xc0d   : > { %8817 = vmatpush3.msra.mxu1 %v6474_v30  ;;  %v6931_v30 = vpop.permute.xlu0 %6930 }
 0xc0e   : > { %8818 = vmatprep.subr.mxu1 %v6481_v58  ;;  %v7066_v54 = vsub.f32 %v10598_v8, %v10604_v49 }
 0xc0f   : > { %8819 = vmatpush3.msra.mxu1 %v6481_v58  ;;  %v6927_v58 = vpop.permute.xlu1 %6926 }
 0xc10   : > { %8832 = vmatprep.subr.mxu1 %v10529_v16  ;;  %v7067_v62 = vand.u32 4294901760, %v7066_v54 }
 0xc14   : > { %v9037_v22 = vpop.eup %9036 }
 0xc15   : > { %v7645_v61 = vadd.f32 -1.0, %v9037_v22  ;;  %v9039_v28 = vpop.eup %9038  ;;  %v10621_v22 = vand.u32 4294901760, %v10610_v46 }
 0xc16   : > { %v7644_v18 = vadd.f32 -1.0, %v9039_v28  ;;  %v10626_v28 = vand.u32 4294901760, %v6927_v58 }
 0xc17   : > { %v6317_v10 = vsel %vm6307_vm9, %v6305_v56, %v7645_v61  ;;  %v10624_v61 = vsub.f32 %v6929_v7, %v10612_v59 }
 0xc18   : > { %v6346_v40 = vsel %vm567_vm7, %v6317_v10, 0  ;;  %v6316_v14 = vsel %vm6306_vm15, %v6304_v37, %v7644_v18  ;;  %v7073_v18 = vsub.f32 %v10610_v46, %v10621_v22 }
 0xc19   : > { %v6426_v34 = vand.u32 4294901760, %v6346_v40  ;;  %v6343_v9 = vsel %vm567_vm7, %v6316_v14, 0  ;;  %v10638_v14 = vsub.f32 %v6927_v58, %v10626_v28 }
 0xc1a   : > { %v6416_v51 = vand.u32 4294901760, %v6343_v9 }
 0xc1b   : > { %v6427_v52 = vsub.f32 %v6346_v40, %v6426_v34  ;;  %v7074_v40 = vand.u32 4294901760, %v7073_v18 }
 0xc1c   : > { %8820 = vmatprep.mubr.f32.mxu1 %v6416_v51  ;;  %v6417_v38 = vsub.f32 %v6343_v9, %v6416_v51  ;;  %v10643_v9 = vand.u32 4294901760, %v10624_v61 }
 0xc1d   : > { %v6428_v2 = vand.u32 4294901760, %v6427_v52  ;;  %8821 = vmatmul.mubr.f32.vlgmr.msra.gmra.mxu1 %v6426_v34 }
 0xc1e   : > { %8833 = vmatpush3.msra.mxu1 %v10529_v16  ;;  %v6418_v55 = vand.u32 4294901760, %v6417_v38 }
 0xc1f   : > { %8834 = vmatprep.subr.mxu1 %v10527_v27  ;;  %v6429_v12 = vsub.f32 %v6427_v52, %v6428_v2 }
 0xc20   : > { %8835 = vmatpush3.msra.mxu1 %v10527_v27  ;;  %8838 = vmatprep.mubr.f32.mxu1 %v6418_v55  ;;  %v6419_v31 = vsub.f32 %v6417_v38, %v6418_v55 }
 0xc21   : > { %8836 = vmatprep.subr.mxu1 %v10542_v33  ;;  %v6430_v45 = vand.u32 4294901760, %v6429_v12  ;;  %v10649_v12 = vand.u32 4294901760, %v10638_v14 }
 0xc22   : > { %8837 = vmatpush3.msra.mxu1 %v10542_v33  ;;  %v6420_v29 = vand.u32 4294901760, %v6419_v31 }
 0xc23   : > { %8839 = vmatmul.mubr.f32.vlgmr.msra.gmra.mxu1 %v6428_v2  ;;  %8850 = vmatprep.subr.mxu1 %v10529_v16  ;;  %v7094_v6 = vsub.f32 %v10638_v14, %v10649_v12 }
 0xc24   : > { %8851 = vmatpush3.msra.mxu1 %v10529_v16  ;;  %8856 = vmatprep.mubr.f32.mxu1 %v6416_v51 }
 0xc25   : > { %8811 = vmatprep.mubr.f32.mxu0 %v6420_v29  ;;  %8852 = vmatprep.subr.mxu1 %v10527_v27  ;;  %v7095_v25 = vand.u32 4294901760, %v7094_v6 }
 0xc26   : > { %8812 = vmatmul.mubr.f32.vlgmr.msra.gmra.mxu0 %v6430_v45  ;;  %8853 = vmatpush3.msra.mxu1 %v10527_v27 }
 0xc27   : > { %8824 = vmatpush3.msra.mxu0 %v10535_v39  ;;  %8829 = vmatprep.mubr.f32.mxu0 %v6417_v38  ;;  %v7087_v38 = vsub.f32 %v10624_v61, %v10643_v9 }
 0xc28   : > { %8825 = vmatprep.subr.mxu0 %v10532_v36  ;;  %8854 = vmatprep.subr.mxu1 %v10542_v33 }
 0xc29   : > { %8826 = vmatpush3.msra.mxu0 %v10532_v36  ;;  %8855 = vmatpush3.msra.mxu1 %v10542_v33  ;;  %v7088_v31 = vand.u32 4294901760, %v7087_v38 }
 0xc2a   : > { %8827 = vmatprep.subr.mxu0 %v10552_v5  ;;  %8857 = vmatmul.mubr.f32.vlgmr.msra.gmra.mxu1 %v6426_v34 }
 0xc2b   : > { %8828 = vmatpush3.msra.mxu0 %v10552_v5  ;;  %8874 = vmatprep.subr.mxu1 %v7067_v62 }
 0xc2c   : > { %8830 = vmatmul.mubr.f32.vlgmr.msra.gmra.mxu0 %v6427_v52  ;;  %8841 = vmatprep.subr.mxu0 %v10545_v50 }
 0xc2d   : > { %8842 = vmatpush3.msra.mxu0 %v10545_v50  ;;  %8847 = vmatprep.mubr.f32.mxu0 %v6416_v51 }
 0xc2e   : > { %8843 = vmatprep.subr.mxu0 %v10539_v43  ;;  %8875 = vmatpush3.msra.mxu1 %v7067_v62 }
 0xc2f   : > { %8844 = vmatpush3.msra.mxu0 %v10539_v43  ;;  %8876 = vmatprep.subr.mxu1 %v7074_v40 }
 0xc30   : > { %8845 = vmatprep.subr.mxu0 %v10559_v17  ;;  %8877 = vmatpush3.msra.mxu1 %v7074_v40 }
 0xc31   : > { %8846 = vmatpush3.msra.mxu0 %v10559_v17  ;;  %v10614_v17 = vand.u32 4294901760, %v6931_v30 }
 0xc32   : > { %8848 = vmatmul.mubr.f32.vlgmr.msra.gmra.mxu0 %v6426_v34  ;;  %8859 = vmatprep.subr.mxu0 %v10593_v21 }
 0xc33   : > { %8860 = vmatpush3.msra.mxu0 %v10593_v21  ;;  %v10617_v47 = vsub.f32 %v6931_v30, %v10614_v17 }
 0xc34   : > { %8861 = vmatprep.subr.mxu0 %v10595_v1 }
 0xc35   : > { %8862 = vmatpush3.msra.mxu0 %v10595_v1  ;;  %v10634_v10 = vand.u32 4294901760, %v10617_v47 }
 0xc36   : > { %8863 = vmatprep.subr.mxu0 %v10614_v17 }
 0xc37   : > { %8864 = vmatpush3.msra.mxu0 %v10614_v17  ;;  %v7080_v34 = vsub.f32 %v10617_v47, %v10634_v10 }
 0xc38   : > { %8865 = vmatprep.subr.mxu0 %v10612_v59 }
 0xc39   : > { %8866 = vmatpush3.msra.mxu0 %v10612_v59  ;;  %v7081_v52 = vand.u32 4294901760, %v7080_v34 }
 0xc3a   : > { %8867 = vmatprep.subr.mxu0 %v10626_v28 }
 0xc3b   : > { %8868 = vmatpush3.msra.mxu0 %v10626_v28  ;;  %8878 = vmatprep.subr.mxu1 %v7081_v52 }
 0xc3c   : > { %8879 = vmatpush3.msra.mxu1 %v7081_v52 }
 0xc3d   : > { %8880 = vmatprep.subr.mxu1 %v7088_v31 }
 0xc3e   : > { %8881 = vmatpush3.msra.mxu1 %v7088_v31 }
 0xc3f   : > { %8882 = vmatprep.subr.mxu1 %v7095_v25 }
 0xc40   : > { %8883 = vmatpush3.msra.mxu1 %v7095_v25 }
 0xcdd   : > { %v8822_v11 = vpop.f32.mrf.mxu1 }
 0xcdf   : > { %v6518_v57 = vpop.f32.mrf.mxu1 }
 0xce3   : > { %v8840_v24 = vpop.f32.mrf.mxu1 }
 0xce5   : > { %v6685_v19 = vpop.f32.mrf.mxu1 }
 0xce6   : > { %v8813_v13 = vpop.f32.mrf.mxu0 }
 0xce7   : > { %v6433_v60 = vadd.f32 %v8813_v13, %v6340_v20  ;;  %v7649_v13 = vld [vmem:[%s10746_s2] ss:$0 sm:$0xff] }
 0xce8   : > { %v6422_v23 = vpop.f32.mrf.mxu0 }
 0xce9   : > { %v6423_v35 = vadd.f32 %v6422_v23, %v6340_v20  ;;  %v6525_v53 = vadd.f32 %v8822_v11, %v6433_v60 }
 0xcea   : > { %v8858_v36 = vpop.f32.mrf.mxu1 }
 0xceb   : > { %v6519_v41 = vadd.f32 %v6518_v57, %v6423_v35 }
 0xcec   : > { %v8831_v26 = vpop.f32.mrf.mxu0  ;;  %v6853_v33 = vpop.f32.mrf.mxu1 }
 0xced   : > { %v6610_v4 = vadd.f32 %v8831_v26, %v6525_v53 }
 0xcee   : > { %v6602_v3 = vpop.f32.mrf.mxu0 }
 0xcef   : > { %v6603_v27 = vadd.f32 %v6602_v3, %v6519_v41  ;;  %v6694_v16 = vadd.f32 %v8840_v24, %v6610_v4 }
 0xcf1   : > { %v6686_v43 = vadd.f32 %v6685_v19, %v6603_v27 }
 0xcf2   : > { %v8849_v56 = vpop.f32.mrf.mxu0 }
 0xcf3   : > { %v6780_v39 = vadd.f32 %v8849_v56, %v6694_v16 }
 0xcf4   : > { %v6773_v15 = vpop.f32.mrf.mxu0 }
 0xcf5   : > { %v6860_v48 = vadd.f32 %v8858_v36, %v6780_v39  ;;  %v6774_v37 = vadd.f32 %v6773_v15, %v6686_v43 }
 0xcf7   : > { %v6866_v50 = vmin.f32 %v6860_v48, 0.0  ;;  %v6854_v0 = vadd.f32 %v6853_v33, %v6774_v37  ;;  %vm6864_vm7 = vcmp.gt.f32.partialorder %v6860_v48, 0.0 }
 0xcf9   : > { %v6869_v44 = vmul.f32 1.442695, %v6866_v50  ;;  %v6865_v63 = vmin.f32 %v6854_v0, 0.0  ;;  %vm6863_vm10 = vcmp.gt.f32.partialorder %v6854_v0, 0.0 }
 0xcfb   : > { %9040 = vpow2.f32 %v6869_v44  ;;  %v6867_v5 = vmul.f32 1.442695, %v6865_v63 }
 0xcfd   : > { %9042 = vpow2.f32 %v6867_v5 }
 0xd08   : > { %v9041_v51 = vpop.eup %9040 }
 0xd09   : > { %v7648_v2 = vadd.f32 -1.0, %v9041_v51 }
 0xd0a   : > { %v9043_v55 = vpop.eup %9042 }
 0xd0b   : > { %v6874_v29 = vsel %vm6864_vm7, %v6860_v48, %v7648_v2  ;;  %v7647_v45 = vadd.f32 -1.0, %v9043_v55 }
 0xd0c   : > { %6879 = vst.msk [vmem:[#allocation4 + $0x9] sm:$0xff] %vm549_vm2, %v6874_v29 }
 0xd0d   : > { %v6873_v20 = vsel %vm6863_vm10, %v6854_v0, %v7647_v45 }
 0xd0e   : > { %6878 = vst.msk [vmem:[#allocation4 + $0x1] sm:$0xff] %vm549_vm2, %v6873_v20 }
 0xd13   : > { %v6883_v42 = vld [vmem:[#allocation4 + $0x9] sm:$0xff] }
 0xd14   : > { %6890 = vrot.lane.b32.xlu1 %v6883_v42, %s9057_s22  ;;  %v6885_v11 = vld [vmem:[#allocation4 + $0xa] sm:$0xff] }
 0xd15   : > { %v6882_v54 = vld [vmem:[#allocation4 + $0x1] sm:$0xff] }
 0xd16   : > { %6888 = vrot.lane.b32.xlu0 %v6882_v54, %s9057_s22  ;;  %v6884_v62 = vld [vmem:[#allocation4 + $0x2] sm:$0xff] }
 0xd17   : > { %v6880_v35 = vld [vmem:[#allocation4] sm:$0xff]  ;;  %v6881_v3 = vld [vmem:[#allocation4 + $0x8] sm:$0xff] }
 0xd18   : > { %6924 = vrot.lane.b32.xlu1 %v10511_v32, %s9054_s19 }
 0xd1a   : > { %6896 = vrot.lane.b32.xlu0 %v6884_v62, %s9063_s26 }
 0xd1e   : > { %6898 = vrot.lane.b32.xlu0 %v6885_v11, %s9063_s26 }
 0xd22   : > { %6942 = vrot.lane.b32.xlu0 %v7649_v13, %s9054_s19  ;;  %s7603_s19 = sshll.u32 %s10750_s13, 2 }
 0xd23   : > { %s168_s26 = scalar_lea.vmem %s10747_s3, %s7603_s19 }
 0xd86   : > { %v6891_v60 = vpop.permute.xlu1 %6890 }
 0xd87   : > { %v6903_v16 = vsel %vm549_vm2, %v6881_v3, %v6891_v60 }
 0xd88   : > { %v6889_v57 = vpop.permute.xlu0 %6888 }
 0xd89   : > { %v6902_v32 = vsel %vm549_vm2, %v6880_v35, %v6889_v57  ;;  %vm7541_vm2 = vcmask 257024  }
 0xd8a   : > { %v6925_v23 = vpop.permute.xlu1 %6924 }
 0xd8b   : > { %v10665_v53 = vand.u32 4294901760, %v6925_v23 }
 0xd8c   : > { %v6897_v41 = vpop.permute.xlu0 %6896 }
 0xd8d   : > { %v7099_v24 = vsub.f32 %v6925_v23, %v10665_v53  ;;  %v6904_v26 = vsel %vm2231_vm13, %v6902_v32, %v6897_v41  ;;  %8869 = vmatprep.subr.mxu0 %v10665_v53 }
 0xd8e   : > { %v6946_v4 = vsel %vm2275_vm14, %v6904_v26, 0  ;;  %8870 = vmatpush3.msra.mxu0 %v10665_v53 }
 0xd8f   : > { %v7022_v27 = vand.u32 4294901760, %v6946_v4  ;;  %8889 = vmatprep.subr.mxu0 %v10598_v8  ;;  %v10674_v19 = vand.u32 4294901760, %v7099_v24 }
 0xd90   : > { %v6899_v36 = vpop.permute.xlu0 %6898 }
 0xd91   : > { %v7023_v56 = vsub.f32 %v6946_v4, %v7022_v27  ;;  %v6905_v39 = vsel %vm2231_vm13, %v6903_v16, %v6899_v36  ;;  %8886 = vmatprep.mubr.f32.mxu1 %v7022_v27  ;;  %v7101_v43 = vsub.f32 %v7099_v24, %v10674_v19 }
 0xd92   : > { %v6949_v15 = vsel %vm2275_vm14, %v6905_v39, 0 }
 0xd93   : > { %v10680_v48 = vand.u32 4294901760, %v6949_v15  ;;  %v7102_v37 = vand.u32 4294901760, %v7101_v43  ;;  %v7024_v33 = vand.u32 4294901760, %v7023_v56 }
 0xd95   : > { %v7033_v50 = vsub.f32 %v6949_v15, %v10680_v48  ;;  %8884 = vmatprep.subr.mxu1 %v7102_v37  ;;  %v7025_v0 = vsub.f32 %v7023_v56, %v7024_v33 }
 0xd96   : > { %8885 = vmatpush3.msra.mxu1 %v7102_v37 }
 0xd97   : > { %v7034_v44 = vand.u32 4294901760, %v7033_v50  ;;  %8887 = vmatmul.mubr.f32.vlgmr.msra.gmra.mxu1 %v10680_v48  ;;  %8904 = vmatprep.subr.mxu1 %v10593_v21  ;;  %v7026_v63 = vand.u32 4294901760, %v7025_v0 }
 0xd98   : > { %8905 = vmatpush3.msra.mxu1 %v10593_v21  ;;  %8916 = vmatprep.mubr.f32.mxu1 %v7024_v33 }
 0xd99   : > { %8871 = vmatprep.mubr.f32.mxu0 %v7026_v63  ;;  %8906 = vmatprep.subr.mxu1 %v10595_v1  ;;  %v7035_v5 = vsub.f32 %v7033_v50, %v7034_v44 }
 0xd9a   : > { %8907 = vmatpush3.msra.mxu1 %v10595_v1 }
 0xd9b   : > { %8908 = vmatprep.subr.mxu1 %v10614_v17  ;;  %v7036_v7 = vand.u32 4294901760, %v7035_v5 }
 0xd9c   : > { %8909 = vmatpush3.msra.mxu1 %v10614_v17 }
 0xd9d   : > { %8872 = vmatmul.mubr.f32.vlgmr.msra.gmra.mxu0 %v7036_v7  ;;  %8910 = vmatprep.subr.mxu1 %v10612_v59 }
 0xd9e   : > { %8890 = vmatpush3.msra.mxu0 %v10598_v8  ;;  %8901 = vmatprep.mubr.f32.mxu0 %v7023_v56 }
 0xd9f   : > { %8891 = vmatprep.subr.mxu0 %v10610_v46  ;;  %8911 = vmatpush3.msra.mxu1 %v10612_v59 }
 0xda0   : > { %8892 = vmatpush3.msra.mxu0 %v10610_v46  ;;  %8912 = vmatprep.subr.mxu1 %v10626_v28 }
 0xda1   : > { %8893 = vmatprep.subr.mxu0 %v10617_v47  ;;  %8913 = vmatpush3.msra.mxu1 %v10626_v28 }
 0xda2   : > { %8894 = vmatpush3.msra.mxu0 %v10617_v47  ;;  %8914 = vmatprep.subr.mxu1 %v10665_v53 }
 0xda3   : > { %8895 = vmatprep.subr.mxu0 %v10624_v61  ;;  %8915 = vmatpush3.msra.mxu1 %v10665_v53 }
 0xda4   : > { %8896 = vmatpush3.msra.mxu0 %v10624_v61  ;;  %8917 = vmatmul.mubr.f32.vlgmr.msra.gmra.mxu1 %v7034_v44 }
 0xda5   : > { %8934 = vmatprep.subr.mxu1 %v10593_v21  ;;  %8897 = vmatprep.subr.mxu0 %v10638_v14 }
 0xda6   : > { %8935 = vmatpush3.msra.mxu1 %v10593_v21  ;;  %8946 = vmatprep.mubr.f32.mxu1 %v7022_v27 }
 0xda7   : > { %8898 = vmatpush3.msra.mxu0 %v10638_v14  ;;  %8936 = vmatprep.subr.mxu1 %v10595_v1 }
 0xda8   : > { %8899 = vmatprep.subr.mxu0 %v7099_v24  ;;  %8937 = vmatpush3.msra.mxu1 %v10595_v1  ;;  %v6943_v1 = vpop.permute.xlu0 %6942 }
 0xda9   : > { %8900 = vmatpush3.msra.mxu0 %v7099_v24  ;;  %8938 = vmatprep.subr.mxu1 %v10614_v17 }
 0xdaa   : > { %8902 = vmatmul.mubr.f32.vlgmr.msra.gmra.mxu0 %v7033_v50  ;;  %8919 = vmatprep.subr.mxu0 %v10604_v49 }
 0xdab   : > { %8939 = vmatpush3.msra.mxu1 %v10614_v17  ;;  %8920 = vmatpush3.msra.mxu0 %v10604_v49 }
 0xdac   : > { %8931 = vmatprep.mubr.f32.mxu0 %v7022_v27  ;;  %8940 = vmatprep.subr.mxu1 %v10612_v59 }
 0xdad   : > { %8921 = vmatprep.subr.mxu0 %v10621_v22  ;;  %8941 = vmatpush3.msra.mxu1 %v10612_v59 }
 0xdae   : > { %8922 = vmatpush3.msra.mxu0 %v10621_v22  ;;  %8942 = vmatprep.subr.mxu1 %v10626_v28 }
 0xdaf   : > { %8923 = vmatprep.subr.mxu0 %v10634_v10  ;;  %8943 = vmatpush3.msra.mxu1 %v10626_v28 }
 0xdb0   : > { %8924 = vmatpush3.msra.mxu0 %v10634_v10  ;;  %8944 = vmatprep.subr.mxu1 %v10665_v53 }
 0xdb1   : > { %8925 = vmatprep.subr.mxu0 %v10643_v9  ;;  %8945 = vmatpush3.msra.mxu1 %v10665_v53 }
 0xdb2   : > { %8926 = vmatpush3.msra.mxu0 %v10643_v9  ;;  %8947 = vmatmul.mubr.f32.vlgmr.msra.gmra.mxu1 %v10680_v48 }
 0xdb3   : > { %8927 = vmatprep.subr.mxu0 %v10649_v12 }
 0xdb4   : > { %8928 = vmatpush3.msra.mxu0 %v10649_v12 }
 0xdb5   : > { %8929 = vmatprep.subr.mxu0 %v10674_v19 }
 0xdb6   : > { %8930 = vmatpush3.msra.mxu0 %v10674_v19 }
 0xdb7   : > { %8932 = vmatmul.mubr.f32.vlgmr.msra.gmra.mxu0 %v10680_v48 }
 0xe57   : > { %v8888_v8 = vpop.f32.mrf.mxu1 }
 0xe59   : > { %v7139_v17 = vpop.f32.mrf.mxu1 }
 0xe5d   : > { %v8873_v21 = vpop.f32.mrf.mxu0 }
 0xe5e   : > { %v7039_v46 = vadd.f32 %v8873_v21, %v6943_v1 }
 0xe5f   : > { %v7028_v49 = vpop.f32.mrf.mxu0 }
 0xe60   : > { %v7029_v30 = vadd.f32 %v7028_v49, %v6943_v1  ;;  %v7146_v47 = vadd.f32 %v8888_v8, %v7039_v46 }
 0xe62   : > { %v7140_v28 = vadd.f32 %v7139_v17, %v7029_v30 }
 0xe64   : > { %v8918_v58 = vpop.f32.mrf.mxu1 }
 0xe66   : > { %v7315_v10 = vpop.f32.mrf.mxu1 }
 0xe6a   : > { %v8903_v59 = vpop.f32.mrf.mxu0 }
 0xe6b   : > { %v7237_v61 = vadd.f32 %v8903_v59, %v7146_v47 }
 0xe6c   : > { %v7229_v22 = vpop.f32.mrf.mxu0 }
 0xe6d   : > { %v7230_v18 = vadd.f32 %v7229_v22, %v7140_v28  ;;  %v7324_v40 = vadd.f32 %v8918_v58, %v7237_v61 }
 0xe6f   : > { %v7316_v51 = vadd.f32 %v7315_v10, %v7230_v18 }
 0xe72   : > { %v8948_v14 = vpop.f32.mrf.mxu1 }
 0xe74   : > { %v7495_v55 = vpop.f32.mrf.mxu1 }
 0xe77   : > { %v8933_v34 = vpop.f32.mrf.mxu0 }
 0xe78   : > { %v7419_v9 = vadd.f32 %v8933_v34, %v7324_v40 }
 0xe79   : > { %v7412_v52 = vpop.f32.mrf.mxu0 }
 0xe7a   : > { %v7502_v38 = vadd.f32 %v8948_v14, %v7419_v9  ;;  %v7413_v2 = vadd.f32 %v7412_v52, %v7316_v51 }
 0xe7c   : > { %v7496_v31 = vadd.f32 %v7495_v55, %v7413_v2  ;;  %7509 = vrot.lane.b32.xlu0 %v7502_v38, %s9059_s5 }
 0xe7e   : > { %7507 = vrot.lane.b32.xlu1 %v7496_v31, %s9059_s5 }
 0xeee   : > { %v7510_v12 = vpop.permute.xlu0 %7509 }
 0xeef   : > { %7514 = vst.msk [vmem:[#allocation6 + $0x8] sm:$0xff] %vm4406_vm11, %v7510_v12 }
 0xef0   : > { %v7508_v29 = vpop.permute.xlu1 %7507 }
 0xef1   : > { %7513 = vst.msk [vmem:[#allocation6] sm:$0xff] %vm4406_vm11, %v7508_v29 }
 0xef6   : > { %v7516_v45 = vld [vmem:[#allocation6 + $0x8] sm:$0xff] }
 0xef7   : > { %v7518_v6 = vmax.f32 %v7516_v45, 0.0 }
 0xef8   : > { %v7515_v20 = vld [vmem:[#allocation6] sm:$0xff] }
 0xef9   : > { %7520 = vst.msk [vmem:[#allocation6 + $0x8] sm:$0xff] %vm2231_vm13, %v7518_v6  ;;  %v7517_v25 = vmax.f32 %v7515_v20, 0.0 }
 0xefb   : > { %7519 = vst.msk [vmem:[#allocation6] sm:$0xff] %vm2231_vm13, %v7517_v25 }
 0xf02   : > { %v7521_v42 = vld [vmem:[#allocation6] ss:$3 sm:$0xf]  ;;  %v7523_v54 = vld [vmem:[#allocation6 + $0x1] ss:$3 sm:$0xf] }
 0xf03   : > { %v7524_v62 = vadd.f32 %v7523_v54, %v7521_v42  ;;  %v7526_v11 = vld [vmem:[#allocation6 + $0x2] ss:$3 sm:$0xf]  ;;  %v7529_v60 = vld [vmem:[#allocation6 + $0x3] ss:$3 sm:$0xf] }
 0xf04   : > { %v7532_v23 = vld [vmem:[#allocation6 + $0x4] ss:$3 sm:$0xf]  ;;  %v7535_v53 = vld [vmem:[#allocation6 + $0x5] ss:$3 sm:$0xf] }
 0xf05   : > { %v7527_v13 = vadd.f32 %v7526_v11, %v7524_v62  ;;  %v7538_v41 = vld [vmem:[#allocation6 + $0x6] ss:$3 sm:$0xf] }
 0xf07   : > { %v7530_v57 = vadd.f32 %v7529_v60, %v7527_v13 }
 0xf09   : > { %v7533_v35 = vadd.f32 %v7532_v23, %v7530_v57 }
 0xf0b   : > { %v7536_v32 = vadd.f32 %v7535_v53, %v7533_v35 }
 0xf0d   : > { %v7539_v24 = vadd.f32 %v7538_v41, %v7536_v32 }
 0xf0f   : > { %v7540_v26 = vmul.f32 0.14285715, %v7539_v24 }
 0xf11   : > { %7542 = vst.msk [vmem:[%s168_s26] sm:$0xf] %vm7541_vm2, %v7540_v26 }
 0xf12 PF: > { %s13_s12 = sadd.s32 1, %s9051_s12  }
 0xf13   : > { %p10_p4 = scmp.ge.s32.totalorder %s13_s12, 4  }
 0xf15   :  { %12 = sbr.rel (!%p10_p4) target bundleno = 1 (0x1), region = 137 }

</bundles_post_ra>
